<compile_context>
chip_gen: v7x
topology: tpu7x:2x2x1
jax: 0.10.0
libtpu: 0.0.40
codegen_flags: <defaults>
</compile_context>

<pallas_src>
import numpy as np
import jax
import jax.numpy as jnp
from jax import lax
from jax.experimental import pallas as pl
from jax.experimental.pallas import tpu as pltpu


_VMEM_LIMIT = 48 * 1024 * 1024      # safe on v7x (64 MiB) and v5e/v6e (128 MiB)
_BLOCK_BUDGET = 4 * 1024 * 1024     # target bytes for the main input block


def _largest_divisor_leq(n, cap):
    cap = int(max(1, min(n, cap)))
    for d in range(cap, 0, -1):
        if n % d == 0:
            return d
    return 1


# ----------------------------- Pallas kernels ------------------------------

def _spatial_kernel(x_ref, w_ref, b_ref, o_ref):
    # x_ref: (F, 6, TH, Wh, C) phase-decomposed zero-padded frame rows:
    #   planes 0..3: x_pad[2i+ph, 2j+pw]  (plane = 2*ph + pw)
    #   planes 4..5: x_pad[2i+2, 2j+pw]   (the +1-row phase -> no row halo needed)
    # w_ref: (9, C, C) effective per-tap weights (avg-pool and, if this is the
    #        last stage, conv3 already folded in by the wrapper)
    # b_ref: (1, C) f32 effective bias
    # o_ref: (F, TH, Wo, C)
    F, TH, Wo, C = o_ref.shape
    M = F * TH * Wo
    acc = jnp.zeros((M, C), jnp.float32)
    for kh in range(3):
        for kw in range(3):
            pw, dw = kw % 2, kw // 2
            plane = 2 * kh + pw if kh < 2 else 4 + pw
            patch = x_ref[:, plane, :, dw:dw + Wo, :]
            acc = acc + jnp.dot(patch.reshape(M, C), w_ref[3 * kh + kw],
                                preferred_element_type=jnp.float32)
    acc = acc + b_ref[...]
    o_ref[...] = acc.reshape(F, TH, Wo, C).astype(o_ref.dtype)


def _temporal_kernel(f0_ref, f1_ref, f2_ref, w_ref, b_ref, o_ref):
    # f*_ref: (TH, Wo, C) frames e[2t], e[2t+1], e[2t+2] of the causally padded
    #   sequence (clamping done in the index maps; no wrapper-side concat).
    # w_ref: (3, C, C) effective weights (temporal avg-pool + conv3 folded in)
    # b_ref: (1, C) f32; o_ref: (TH, Wo, C)
    TH, Wo, C = o_ref.shape
    M = TH * Wo
    acc = jnp.dot(f0_ref[...].reshape(M, C), w_ref[0], preferred_element_type=jnp.float32)
    acc = acc + jnp.dot(f1_ref[...].reshape(M, C), w_ref[1], preferred_element_type=jnp.float32)
    acc = acc + jnp.dot(f2_ref[...].reshape(M, C), w_ref[2], preferred_element_type=jnp.float32)
    acc = acc + b_ref[...]
    o_ref[...] = acc.reshape(TH, Wo, C).astype(o_ref.dtype)


# ------------------------------- stages -------------------------------------

def _spatial_stage(h, w_eff, b_eff):
    # h: (B, T, H, W, C) -> (B, T, H//2, W//2, C)
    B, T, H, W, C = h.shape
    assert H % 2 == 0 and W % 2 == 0, "spatial dims must be even (as in torch usage)"
    Ho, Wo = H // 2, W // 2
    Wh = Wo + 1
    BT = B * T
    dtype = h.dtype
    itemsize = np.dtype(dtype).itemsize

    # 6-plane phase decomposition (pad bottom/right by 2 so extents stay even;
    # the extra zero row/col is never read).  Planes 4/5 hold the +1-row phase
    # so row tiles never need a halo.
    hp = jnp.pad(h, ((0, 0), (0, 0), (0, 2), (0, 2), (0, 0)))
    main = hp[:, :, :H, :, :].reshape(B, T, Ho, 2, Wh, 2, C)
    main = jnp.transpose(main, (0, 1, 3, 5, 2, 4, 6)).reshape(B, T, 4, Ho, Wh, C)
    nxt = hp[:, :, 2:, :, :].reshape(B, T, Ho, 2, Wh, 2, C)[:, :, :, 0]
    nxt = jnp.transpose(nxt, (0, 1, 4, 2, 3, 5))                  # (B, T, 2, Ho, Wh, C)
    planes = jnp.concatenate([main, nxt], axis=2).reshape(BT, 6, Ho, Wh, C)

    # Block sizing: whole frames (and several of them) per block when small,
    # halo-free row tiles when one frame alone would exceed the budget.
    frame_bytes = 6 * Ho * Wh * C * itemsize
    if frame_bytes <= _BLOCK_BUDGET:
        TH = Ho
        cap = max(1, min(_BLOCK_BUDGET // frame_bytes, max(1, BT // 2)))
        F = _largest_divisor_leq(BT, cap)
    else:
        F = 1
        row_bytes = 6 * Wh * C * itemsize
        TH = _largest_divisor_leq(Ho, max(1, _BLOCK_BUDGET // row_bytes))
    grid = (BT // F, Ho // TH)

    out = pl.pallas_call(
        _spatial_kernel,
        out_shape=jax.ShapeDtypeStruct((BT, Ho, Wo, C), dtype),
        grid=grid,
        in_specs=[
            pl.BlockSpec((F, 6, TH, Wh, C), lambda f, r: (f, 0, r, 0, 0)),
            pl.BlockSpec((9, C, C), lambda f, r: (0, 0, 0)),
            pl.BlockSpec((1, C), lambda f, r: (0, 0)),
        ],
        out_specs=pl.BlockSpec((F, TH, Wo, C), lambda f, r: (f, r, 0, 0)),
        compiler_params=pltpu.CompilerParams(
            dimension_semantics=("parallel", "parallel"),
            vmem_limit_bytes=_VMEM_LIMIT),
    )(planes, w_eff.astype(dtype), b_eff.astype(jnp.float32))
    return out.reshape(B, T, Ho, Wo, C)


def _temporal_stage(h, w_eff, b_eff):
    # h: (B, T, Ho, Wo, C) -> (B, (T+1)//2, Ho, Wo, C)
    B, T, Ho, Wo, C = h.shape
    To = (T + 1) // 2
    dtype = h.dtype
    itemsize = np.dtype(dtype).itemsize

    frame_bytes = Ho * Wo * C * itemsize
    if 3 * frame_bytes <= _BLOCK_BUDGET:
        TH = Ho
    else:
        row_bytes = 3 * Wo * C * itemsize
        TH = _largest_divisor_leq(Ho, max(1, _BLOCK_BUDGET // row_bytes))
    grid = (B, To, Ho // TH)

    # Causal left boundary handled in the index maps: output t consumes frames
    # max(2t-2, 0), max(2t-1, 0), 2t of the ORIGINAL sequence (== e[2t], e[2t+1],
    # e[2t+2] of torch's doubly left-padded sequence) -- no wrapper-side concat.
    f0_spec = pl.BlockSpec((None, None, TH, Wo, C),
                           lambda b, t, r: (b, jnp.maximum(2 * t - 2, 0), r, 0, 0))
    f1_spec = pl.BlockSpec((None, None, TH, Wo, C),
                           lambda b, t, r: (b, jnp.maximum(2 * t - 1, 0), r, 0, 0))
    f2_spec = pl.BlockSpec((None, None, TH, Wo, C),
                           lambda b, t, r: (b, 2 * t, r, 0, 0))

    out = pl.pallas_call(
        _temporal_kernel,
        out_shape=jax.ShapeDtypeStruct((B, To, Ho, Wo, C), dtype),
        grid=grid,
        in_specs=[
            f0_spec, f1_spec, f2_spec,
            pl.BlockSpec((3, C, C), lambda b, t, r: (0, 0, 0)),
            pl.BlockSpec((1, C), lambda b, t, r: (0, 0)),
        ],
        out_specs=pl.BlockSpec((None, None, TH, Wo, C),
                               lambda b, t, r: (b, t, r, 0, 0)),
        compiler_params=pltpu.CompilerParams(
            dimension_semantics=("parallel", "parallel", "parallel"),
            vmem_limit_bytes=_VMEM_LIMIT),
    )(h, h, h, w_eff.astype(dtype), b_eff.astype(jnp.float32))
    return out


# ------------------------------- wrapper ------------------------------------

def cosmos_downsample3d(x, params, spatial_downsample=True, temporal_downsample=True):
    """x: (B, C, T, H, W) (PyTorch NCDHW). Returns (B, C, T', H', W')."""
    if not spatial_downsample and not temporal_downsample:
        return x
    B, C, T, H, W = x.shape
    h = jnp.transpose(x, (0, 2, 3, 4, 1))          # channels-last (B, T, H, W, C)

    eye = jnp.eye(C, dtype=jnp.float32)
    w1 = params["w1"].reshape(9, C, C)             # tap k = 3*kh + kw, (Cin, Cout)
    w2, w3 = params["w2"], params["w3"]
    b1, b2, b3 = params["b1"], params["b2"], params["b3"]

    if spatial_downsample:
        # Fold the 2x2 spatial avg-pool into the 4 taps whose patch equals the
        # pooled pixel (kh<2, kw<2); fold conv3 in when this is the last stage.
        pool = jnp.stack([0.25 * eye if (k // 3 < 2 and k % 3 < 2) else jnp.zeros_like(eye)
                          for k in range(9)])
        ws = w1 + pool
        bs = b1
        if not temporal_downsample:                # conv3 fused into this stage
            ws = ws @ w3
            bs = b1 @ w3 + b3
        h = _spatial_stage(h, ws, bs)

    if temporal_downsample:
        # Fold the temporal avg-pool (0.5*(e[2t+1]+e[2t+2])) and conv3 into the
        # 3 temporal taps: y = f0@(w2_0 w3) + f1@((w2_1+0.5I) w3) + f2@((w2_2+0.5I) w3) + (b2 w3 + b3)
        wt = jnp.stack([w2[0] @ w3, (w2[1] + 0.5 * eye) @ w3, (w2[2] + 0.5 * eye) @ w3])
        bt = b2 @ w3 + b3
        h = _temporal_stage(h, wt, bt)

    return jnp.transpose(h, (0, 4, 1, 2, 3))       # back to (B, C, T', H', W')


# ------------------------- pure-JAX reference (for check) -------------------

def _ref_forward(x, params, spatial_downsample=True, temporal_downsample=True):
    if not spatial_downsample and not temporal_downsample:
        return x
    B, C, T, H, W = x.shape
    dn = ("NCDHW", "OIDHW", "NCDHW")

    def bias(b):
        return b.reshape(1, C, 1, 1, 1)

    h = x
    if spatial_downsample:
        hp = jnp.pad(h, ((0, 0), (0, 0), (0, 0), (0, 1), (0, 1)))
        w1 = jnp.transpose(params["w1"], (3, 2, 0, 1))[:, :, None, :, :]   # (Co,Ci,1,3,3)
        conv = lax.conv_general_dilated(hp, w1, (1, 2, 2), "VALID", dimension_numbers=dn)
        conv = conv + bias(params["b1"])
        pool = lax.reduce_window(hp, 0.0, lax.add, (1, 1, 1, 2, 2), (1, 1, 1, 2, 2), "VALID") / 4.0
        h = conv + pool
    if temporal_downsample:
        hc = jnp.concatenate([h[:, :, :1], h], axis=2)
        hc2 = jnp.concatenate([hc[:, :, :1], hc], axis=2)
        w2 = jnp.transpose(params["w2"], (2, 1, 0))[:, :, :, None, None]    # (Co,Ci,3,1,1)
        conv = lax.conv_general_dilated(hc2, w2, (2, 1, 1), "VALID", dimension_numbers=dn)
        conv = conv + bias(params["b2"])
        pool = lax.reduce_window(hc, 0.0, lax.add, (1, 1, 2, 1, 1), (1, 1, 2, 1, 1), "VALID") / 2.0
        h = conv + pool
    w3 = jnp.transpose(params["w3"], (1, 0))[:, :, None, None, None]        # (Co,Ci,1,1,1)
    h = lax.conv_general_dilated(h, w3, (1, 1, 1), "VALID", dimension_numbers=dn)
    return h + bias(params["b3"])


# ------------------------------- params -------------------------------------

def init_params(key, C):
    # Deterministic synthetic weights (shapes match the nn.Conv3d layers):
    #  w1 <-> conv1.weight[co,ci,0,kh,kw] stored as (kh,kw,ci,co)
    #  w2 <-> conv2.weight[co,ci,k,0,0]   stored as (k,ci,co)
    #  w3 <-> conv3.weight[co,ci,0,0,0]   stored as (ci,co)
    ks = jax.random.split(key, 6)
    s1 = 1.0 / np.sqrt(C * 9)
    s2 = 1.0 / np.sqrt(C * 3)
    s3 = 1.0 / np.sqrt(C)
    return {
        "w1": jax.random.uniform(ks[0], (3, 3, C, C), jnp.float32, -s1, s1),
        "b1": jax.random.uniform(ks[1], (1, C), jnp.float32, -s1, s1),
        "w2": jax.random.uniform(ks[2], (3, C, C), jnp.float32, -s2, s2),
        "b2": jax.random.uniform(ks[3], (1, C), jnp.float32, -s2, s2),
        "w3": jax.random.uniform(ks[4], (C, C), jnp.float32, -s3, s3),
        "b3": jax.random.uniform(ks[5], (1, C), jnp.float32, -s3, s3),
    }


if __name__ == "__main__":
    key = jax.random.PRNGKey(0)
    kx, kp = jax.random.split(key)
    B, C, T, H, W = 2, 4, 8, 16, 16
    x = jax.random.normal(kx, (B, C, T, H, W), jnp.float32)
    params = init_params(kp, C)

    fn = jax.jit(cosmos_downsample3d,
                 static_argnames=("spatial_downsample", "temporal_downsample"))

    # both downsamples (conv3 fused into the temporal kernel)
    out = jax.block_until_ready(fn(x, params, spatial_downsample=True, temporal_downsample=True))
    assert out.shape == (B, C, (T + 1) // 2, H // 2, W // 2), out.shape
    ref = _ref_forward(x, params, True, True)
    np.testing.assert_allclose(np.asarray(out), np.asarray(ref), rtol=1e-3, atol=1e-3)

    # spatial only (conv3 fused into the spatial kernel)
    out_s = jax.block_until_ready(fn(x, params, spatial_downsample=True, temporal_downsample=False))
    ref_s = _ref_forward(x, params, True, False)
    np.testing.assert_allclose(np.asarray(out_s), np.asarray(ref_s), rtol=1e-3, atol=1e-3)

    # temporal only (conv3 fused into the temporal kernel)
    out_t = jax.block_until_ready(fn(x, params, spatial_downsample=False, temporal_downsample=True))
    ref_t = _ref_forward(x, params, False, True)
    np.testing.assert_allclose(np.asarray(out_t), np.asarray(ref_t), rtol=1e-3, atol=1e-3)

    print("KERNEL_OK")
</pallas_src>

<mosaic_0001>
module attributes {stable_mosaic.version = 11 : i64} {
  func.func @_spatial_kernel(%arg0: i32, %arg1: i32, %arg2: memref<8x6x8x9x4xf32, #tpu.memory_space<vmem>>, %arg3: memref<9x4x4xf32, #tpu.memory_space<vmem>>, %arg4: memref<1x4xf32, #tpu.memory_space<vmem>>, %arg5: memref<8x8x8x4xf32, #tpu.memory_space<vmem>>) attributes {dimension_semantics = [#tpu.dimension_semantics<parallel>, #tpu.dimension_semantics<parallel>], iteration_bounds = array<i64: 2, 1>, scalar_prefetch = 0 : i64, scratch_operands = 0 : i64, tpu.core_type = #tpu.core_type<tc>, window_params = [{transform_indices = @transform_0, window_bounds = array<i64: 8, 6, 8, 9, 4>}, {pipeline_mode = #tpu.pipeline_mode<synchronous>, transform_indices = @transform_1, window_bounds = array<i64: 9, 4, 4>}, {pipeline_mode = #tpu.pipeline_mode<synchronous>, transform_indices = @transform_2, window_bounds = array<i64: 1, 4>}, {transform_indices = @transform_3, window_bounds = array<i64: 8, 8, 8, 4>}]} {
    %cst = arith.constant 0.000000e+00 : f32
    %0 = vector.broadcast %cst : f32 to vector<512x4xf32>
    %c0 = arith.constant 0 : index
    %c0_0 = arith.constant 0 : index
    %c0_1 = arith.constant 0 : index
    %c0_2 = arith.constant 0 : index
    %c0_3 = arith.constant 0 : index
    %1 = vector.load %arg2[%c0, %c0_0, %c0_1, %c0_2, %c0_3] : memref<8x6x8x9x4xf32, #tpu.memory_space<vmem>>, vector<8x1x8x8x4xf32>
    %2 = vector.shape_cast %1 : vector<8x1x8x8x4xf32> to vector<8x8x8x4xf32>
    %3 = vector.shape_cast %2 : vector<8x8x8x4xf32> to vector<512x4xf32>
    %c0_4 = arith.constant 0 : index
    %c0_5 = arith.constant 0 : index
    %c0_6 = arith.constant 0 : index
    %4 = vector.load %arg3[%c0_4, %c0_5, %c0_6] : memref<9x4x4xf32, #tpu.memory_space<vmem>>, vector<1x4x4xf32>
    %5 = vector.shape_cast %4 : vector<1x4x4xf32> to vector<4x4xf32>
    %cst_7 = arith.constant dense<0.000000e+00> : vector<512x4xf32>
    %6 = tpu.matmul %3, %5, %cst_7 {dimension_numbers = #tpu.dot_dimension_numbers<[1], [0], [0], [1], [0, 0, 1, 1], [], []>} : vector<512x4xf32>, vector<4x4xf32>, vector<512x4xf32> -> vector<512x4xf32>
    %7 = arith.addf %0, %6 : vector<512x4xf32>
    %c0_8 = arith.constant 0 : index
    %c1 = arith.constant 1 : index
    %c0_9 = arith.constant 0 : index
    %c0_10 = arith.constant 0 : index
    %c0_11 = arith.constant 0 : index
    %8 = vector.load %arg2[%c0_8, %c1, %c0_9, %c0_10, %c0_11] : memref<8x6x8x9x4xf32, #tpu.memory_space<vmem>>, vector<8x1x8x8x4xf32>
    %9 = vector.shape_cast %8 : vector<8x1x8x8x4xf32> to vector<8x8x8x4xf32>
    %10 = vector.shape_cast %9 : vector<8x8x8x4xf32> to vector<512x4xf32>
    %c1_12 = arith.constant 1 : index
    %c0_13 = arith.constant 0 : index
    %c0_14 = arith.constant 0 : index
    %11 = vector.load %arg3[%c1_12, %c0_13, %c0_14] : memref<9x4x4xf32, #tpu.memory_space<vmem>>, vector<1x4x4xf32>
    %12 = vector.shape_cast %11 : vector<1x4x4xf32> to vector<4x4xf32>
    %cst_15 = arith.constant dense<0.000000e+00> : vector<512x4xf32>
    %13 = tpu.matmul %10, %12, %cst_15 {dimension_numbers = #tpu.dot_dimension_numbers<[1], [0], [0], [1], [0, 0, 1, 1], [], []>} : vector<512x4xf32>, vector<4x4xf32>, vector<512x4xf32> -> vector<512x4xf32>
    %14 = arith.addf %7, %13 : vector<512x4xf32>
    %c0_16 = arith.constant 0 : index
    %c0_17 = arith.constant 0 : index
    %c0_18 = arith.constant 0 : index
    %c1_19 = arith.constant 1 : index
    %c0_20 = arith.constant 0 : index
    %15 = vector.load %arg2[%c0_16, %c0_17, %c0_18, %c1_19, %c0_20] : memref<8x6x8x9x4xf32, #tpu.memory_space<vmem>>, vector<8x1x8x8x4xf32>
    %16 = vector.shape_cast %15 : vector<8x1x8x8x4xf32> to vector<8x8x8x4xf32>
    %17 = vector.shape_cast %16 : vector<8x8x8x4xf32> to vector<512x4xf32>
    %c2 = arith.constant 2 : index
    %c0_21 = arith.constant 0 : index
    %c0_22 = arith.constant 0 : index
    %18 = vector.load %arg3[%c2, %c0_21, %c0_22] : memref<9x4x4xf32, #tpu.memory_space<vmem>>, vector<1x4x4xf32>
    %19 = vector.shape_cast %18 : vector<1x4x4xf32> to vector<4x4xf32>
    %cst_23 = arith.constant dense<0.000000e+00> : vector<512x4xf32>
    %20 = tpu.matmul %17, %19, %cst_23 {dimension_numbers = #tpu.dot_dimension_numbers<[1], [0], [0], [1], [0, 0, 1, 1], [], []>} : vector<512x4xf32>, vector<4x4xf32>, vector<512x4xf32> -> vector<512x4xf32>
    %21 = arith.addf %14, %20 : vector<512x4xf32>
    %c0_24 = arith.constant 0 : index
    %c2_25 = arith.constant 2 : index
    %c0_26 = arith.constant 0 : index
    %c0_27 = arith.constant 0 : index
    %c0_28 = arith.constant 0 : index
    %22 = vector.load %arg2[%c0_24, %c2_25, %c0_26, %c0_27, %c0_28] : memref<8x6x8x9x4xf32, #tpu.memory_space<vmem>>, vector<8x1x8x8x4xf32>
    %23 = vector.shape_cast %22 : vector<8x1x8x8x4xf32> to vector<8x8x8x4xf32>
    %24 = vector.shape_cast %23 : vector<8x8x8x4xf32> to vector<512x4xf32>
    %c3 = arith.constant 3 : index
    %c0_29 = arith.constant 0 : index
    %c0_30 = arith.constant 0 : index
    %25 = vector.load %arg3[%c3, %c0_29, %c0_30] : memref<9x4x4xf32, #tpu.memory_space<vmem>>, vector<1x4x4xf32>
    %26 = vector.shape_cast %25 : vector<1x4x4xf32> to vector<4x4xf32>
    %cst_31 = arith.constant dense<0.000000e+00> : vector<512x4xf32>
    %27 = tpu.matmul %24, %26, %cst_31 {dimension_numbers = #tpu.dot_dimension_numbers<[1], [0], [0], [1], [0, 0, 1, 1], [], []>} : vector<512x4xf32>, vector<4x4xf32>, vector<512x4xf32> -> vector<512x4xf32>
    %28 = arith.addf %21, %27 : vector<512x4xf32>
    %c0_32 = arith.constant 0 : index
    %c3_33 = arith.constant 3 : index
    %c0_34 = arith.constant 0 : index
    %c0_35 = arith.constant 0 : index
    %c0_36 = arith.constant 0 : index
    %29 = vector.load %arg2[%c0_32, %c3_33, %c0_34, %c0_35, %c0_36] : memref<8x6x8x9x4xf32, #tpu.memory_space<vmem>>, vector<8x1x8x8x4xf32>
    %30 = vector.shape_cast %29 : vector<8x1x8x8x4xf32> to vector<8x8x8x4xf32>
    %31 = vector.shape_cast %30 : vector<8x8x8x4xf32> to vector<512x4xf32>
    %c4 = arith.constant 4 : index
    %c0_37 = arith.constant 0 : index
    %c0_38 = arith.constant 0 : index
    %32 = vector.load %arg3[%c4, %c0_37, %c0_38] : memref<9x4x4xf32, #tpu.memory_space<vmem>>, vector<1x4x4xf32>
    %33 = vector.shape_cast %32 : vector<1x4x4xf32> to vector<4x4xf32>
    %cst_39 = arith.constant dense<0.000000e+00> : vector<512x4xf32>
    %34 = tpu.matmul %31, %33, %cst_39 {dimension_numbers = #tpu.dot_dimension_numbers<[1], [0], [0], [1], [0, 0, 1, 1], [], []>} : vector<512x4xf32>, vector<4x4xf32>, vector<512x4xf32> -> vector<512x4xf32>
    %35 = arith.addf %28, %34 : vector<512x4xf32>
    %c0_40 = arith.constant 0 : index
    %c2_41 = arith.constant 2 : index
    %c0_42 = arith.constant 0 : index
    %c1_43 = arith.constant 1 : index
    %c0_44 = arith.constant 0 : index
    %36 = vector.load %arg2[%c0_40, %c2_41, %c0_42, %c1_43, %c0_44] : memref<8x6x8x9x4xf32, #tpu.memory_space<vmem>>, vector<8x1x8x8x4xf32>
    %37 = vector.shape_cast %36 : vector<8x1x8x8x4xf32> to vector<8x8x8x4xf32>
    %38 = vector.shape_cast %37 : vector<8x8x8x4xf32> to vector<512x4xf32>
    %c5 = arith.constant 5 : index
    %c0_45 = arith.constant 0 : index
    %c0_46 = arith.constant 0 : index
    %39 = vector.load %arg3[%c5, %c0_45, %c0_46] : memref<9x4x4xf32, #tpu.memory_space<vmem>>, vector<1x4x4xf32>
    %40 = vector.shape_cast %39 : vector<1x4x4xf32> to vector<4x4xf32>
    %cst_47 = arith.constant dense<0.000000e+00> : vector<512x4xf32>
    %41 = tpu.matmul %38, %40, %cst_47 {dimension_numbers = #tpu.dot_dimension_numbers<[1], [0], [0], [1], [0, 0, 1, 1], [], []>} : vector<512x4xf32>, vector<4x4xf32>, vector<512x4xf32> -> vector<512x4xf32>
    %42 = arith.addf %35, %41 : vector<512x4xf32>
    %c0_48 = arith.constant 0 : index
    %c4_49 = arith.constant 4 : index
    %c0_50 = arith.constant 0 : index
    %c0_51 = arith.constant 0 : index
    %c0_52 = arith.constant 0 : index
    %43 = vector.load %arg2[%c0_48, %c4_49, %c0_50, %c0_51, %c0_52] : memref<8x6x8x9x4xf32, #tpu.memory_space<vmem>>, vector<8x1x8x8x4xf32>
    %44 = vector.shape_cast %43 : vector<8x1x8x8x4xf32> to vector<8x8x8x4xf32>
    %45 = vector.shape_cast %44 : vector<8x8x8x4xf32> to vector<512x4xf32>
    %c6 = arith.constant 6 : index
    %c0_53 = arith.constant 0 : index
    %c0_54 = arith.constant 0 : index
    %46 = vector.load %arg3[%c6, %c0_53, %c0_54] : memref<9x4x4xf32, #tpu.memory_space<vmem>>, vector<1x4x4xf32>
    %47 = vector.shape_cast %46 : vector<1x4x4xf32> to vector<4x4xf32>
    %cst_55 = arith.constant dense<0.000000e+00> : vector<512x4xf32>
    %48 = tpu.matmul %45, %47, %cst_55 {dimension_numbers = #tpu.dot_dimension_numbers<[1], [0], [0], [1], [0, 0, 1, 1], [], []>} : vector<512x4xf32>, vector<4x4xf32>, vector<512x4xf32> -> vector<512x4xf32>
    %49 = arith.addf %42, %48 : vector<512x4xf32>
    %c0_56 = arith.constant 0 : index
    %c5_57 = arith.constant 5 : index
    %c0_58 = arith.constant 0 : index
    %c0_59 = arith.constant 0 : index
    %c0_60 = arith.constant 0 : index
    %50 = vector.load %arg2[%c0_56, %c5_57, %c0_58, %c0_59, %c0_60] : memref<8x6x8x9x4xf32, #tpu.memory_space<vmem>>, vector<8x1x8x8x4xf32>
    %51 = vector.shape_cast %50 : vector<8x1x8x8x4xf32> to vector<8x8x8x4xf32>
    %52 = vector.shape_cast %51 : vector<8x8x8x4xf32> to vector<512x4xf32>
    %c7 = arith.constant 7 : index
    %c0_61 = arith.constant 0 : index
    %c0_62 = arith.constant 0 : index
    %53 = vector.load %arg3[%c7, %c0_61, %c0_62] : memref<9x4x4xf32, #tpu.memory_space<vmem>>, vector<1x4x4xf32>
    %54 = vector.shape_cast %53 : vector<1x4x4xf32> to vector<4x4xf32>
    %cst_63 = arith.constant dense<0.000000e+00> : vector<512x4xf32>
    %55 = tpu.matmul %52, %54, %cst_63 {dimension_numbers = #tpu.dot_dimension_numbers<[1], [0], [0], [1], [0, 0, 1, 1], [], []>} : vector<512x4xf32>, vector<4x4xf32>, vector<512x4xf32> -> vector<512x4xf32>
    %56 = arith.addf %49, %55 : vector<512x4xf32>
    %c0_64 = arith.constant 0 : index
    %c4_65 = arith.constant 4 : index
    %c0_66 = arith.constant 0 : index
    %c1_67 = arith.constant 1 : index
    %c0_68 = arith.constant 0 : index
    %57 = vector.load %arg2[%c0_64, %c4_65, %c0_66, %c1_67, %c0_68] : memref<8x6x8x9x4xf32, #tpu.memory_space<vmem>>, vector<8x1x8x8x4xf32>
    %58 = vector.shape_cast %57 : vector<8x1x8x8x4xf32> to vector<8x8x8x4xf32>
    %59 = vector.shape_cast %58 : vector<8x8x8x4xf32> to vector<512x4xf32>
    %c8 = arith.constant 8 : index
    %c0_69 = arith.constant 0 : index
    %c0_70 = arith.constant 0 : index
    %60 = vector.load %arg3[%c8, %c0_69, %c0_70] : memref<9x4x4xf32, #tpu.memory_space<vmem>>, vector<1x4x4xf32>
    %61 = vector.shape_cast %60 : vector<1x4x4xf32> to vector<4x4xf32>
    %cst_71 = arith.constant dense<0.000000e+00> : vector<512x4xf32>
    %62 = tpu.matmul %59, %61, %cst_71 {dimension_numbers = #tpu.dot_dimension_numbers<[1], [0], [0], [1], [0, 0, 1, 1], [], []>} : vector<512x4xf32>, vector<4x4xf32>, vector<512x4xf32> -> vector<512x4xf32>
    %63 = arith.addf %56, %62 : vector<512x4xf32>
    %c0_72 = arith.constant 0 : index
    %c0_73 = arith.constant 0 : index
    %64 = vector.load %arg4[%c0_72, %c0_73] : memref<1x4xf32, #tpu.memory_space<vmem>>, vector<1x4xf32>
    %65 = vector.broadcast %64 : vector<1x4xf32> to vector<512x4xf32>
    %66 = arith.addf %63, %65 : vector<512x4xf32>
    %67 = vector.shape_cast %66 : vector<512x4xf32> to vector<8x8x8x4xf32>
    %c0_74 = arith.constant 0 : index
    %c0_75 = arith.constant 0 : index
    %c0_76 = arith.constant 0 : index
    %c0_77 = arith.constant 0 : index
    %68 = vector.load %arg5[%c0_74, %c0_75, %c0_76, %c0_77] : memref<8x8x8x4xf32, #tpu.memory_space<vmem>>, vector<8x8x8x4xf32>
    tpu.vector_store %arg5[%c0_74, %c0_75, %c0_76, %c0_77], %67 {strides = array<i32>} : memref<8x8x8x4xf32, #tpu.memory_space<vmem>>, vector<8x8x8x4xf32>,
    return
  }
  func.func @transform_0(%arg0: i32, %arg1: i32) -> (i32, i32, i32, i32, i32) {
    %c0_i32 = arith.constant 0 : i32
    %c0_i32_0 = arith.constant 0 : i32
    %c0_i32_1 = arith.constant 0 : i32
    %c0_i32_2 = arith.constant 0 : i32
    return %arg0, %c0_i32, %arg1, %c0_i32_0, %c0_i32_1 : i32, i32, i32, i32, i32
  }
  func.func @transform_1(%arg0: i32, %arg1: i32) -> (i32, i32, i32) {
    %c0_i32 = arith.constant 0 : i32
    %c0_i32_0 = arith.constant 0 : i32
    %c0_i32_1 = arith.constant 0 : i32
    %c0_i32_2 = arith.constant 0 : i32
    return %c0_i32, %c0_i32_0, %c0_i32_1 : i32, i32, i32
  }
  func.func @transform_2(%arg0: i32, %arg1: i32) -> (i32, i32) {
    %c0_i32 = arith.constant 0 : i32
    %c0_i32_0 = arith.constant 0 : i32
    %c0_i32_1 = arith.constant 0 : i32
    return %c0_i32, %c0_i32_0 : i32, i32
  }
  func.func @transform_3(%arg0: i32, %arg1: i32) -> (i32, i32, i32, i32) {
    %c0_i32 = arith.constant 0 : i32
    %c0_i32_0 = arith.constant 0 : i32
    %c0_i32_1 = arith.constant 0 : i32
    return %arg0, %arg1, %c0_i32, %c0_i32_0 : i32, i32, i32, i32
  }
}

module attributes {stable_mosaic.version = 11 : i64} {
  func.func @_temporal_kernel(%arg0: i32, %arg1: i32, %arg2: i32, %arg3: memref<1x1x8x8x4xf32, #tpu.memory_space<vmem>>, %arg4: memref<1x1x8x8x4xf32, #tpu.memory_space<vmem>>, %arg5: memref<1x1x8x8x4xf32, #tpu.memory_space<vmem>>, %arg6: memref<3x4x4xf32, #tpu.memory_space<vmem>>, %arg7: memref<1x4xf32, #tpu.memory_space<vmem>>, %arg8: memref<1x1x8x8x4xf32, #tpu.memory_space<vmem>>) attributes {dimension_semantics = [#tpu.dimension_semantics<parallel>, #tpu.dimension_semantics<parallel>, #tpu.dimension_semantics<parallel>], iteration_bounds = array<i64: 2, 4, 1>, scalar_prefetch = 0 : i64, scratch_operands = 0 : i64, tpu.core_type = #tpu.core_type<tc>, window_params = [{transform_indices = @transform_0, window_bounds = array<i64: 1, 1, 8, 8, 4>}, {transform_indices = @transform_1, window_bounds = array<i64: 1, 1, 8, 8, 4>}, {transform_indices = @transform_2, window_bounds = array<i64: 1, 1, 8, 8, 4>}, {pipeline_mode = #tpu.pipeline_mode<synchronous>, transform_indices = @transform_3, window_bounds = array<i64: 3, 4, 4>}, {pipeline_mode = #tpu.pipeline_mode<synchronous>, transform_indices = @transform_4, window_bounds = array<i64: 1, 4>}, {transform_indices = @transform_5, window_bounds = array<i64: 1, 1, 8, 8, 4>}]} {
    %c0 = arith.constant 0 : index
    %c0_0 = arith.constant 0 : index
    %c0_1 = arith.constant 0 : index
    %c0_2 = arith.constant 0 : index
    %c0_3 = arith.constant 0 : index
    %0 = vector.load %arg3[%c0, %c0_0, %c0_1, %c0_2, %c0_3] : memref<1x1x8x8x4xf32, #tpu.memory_space<vmem>>, vector<1x1x8x8x4xf32>
    %1 = vector.shape_cast %0 : vector<1x1x8x8x4xf32> to vector<8x8x4xf32>
    %2 = vector.shape_cast %1 : vector<8x8x4xf32> to vector<64x4xf32>
    %c0_4 = arith.constant 0 : index
    %c0_5 = arith.constant 0 : index
    %c0_6 = arith.constant 0 : index
    %3 = vector.load %arg6[%c0_4, %c0_5, %c0_6] : memref<3x4x4xf32, #tpu.memory_space<vmem>>, vector<1x4x4xf32>
    %4 = vector.shape_cast %3 : vector<1x4x4xf32> to vector<4x4xf32>
    %cst = arith.constant dense<0.000000e+00> : vector<64x4xf32>
    %5 = tpu.matmul %2, %4, %cst {dimension_numbers = #tpu.dot_dimension_numbers<[1], [0], [0], [1], [0, 0, 1, 1], [], []>} : vector<64x4xf32>, vector<4x4xf32>, vector<64x4xf32> -> vector<64x4xf32>
    %c0_7 = arith.constant 0 : index
    %c0_8 = arith.constant 0 : index
    %c0_9 = arith.constant 0 : index
    %c0_10 = arith.constant 0 : index
    %c0_11 = arith.constant 0 : index
    %6 = vector.load %arg4[%c0_7, %c0_8, %c0_9, %c0_10, %c0_11] : memref<1x1x8x8x4xf32, #tpu.memory_space<vmem>>, vector<1x1x8x8x4xf32>
    %7 = vector.shape_cast %6 : vector<1x1x8x8x4xf32> to vector<8x8x4xf32>
    %8 = vector.shape_cast %7 : vector<8x8x4xf32> to vector<64x4xf32>
    %c1 = arith.constant 1 : index
    %c0_12 = arith.constant 0 : index
    %c0_13 = arith.constant 0 : index
    %9 = vector.load %arg6[%c1, %c0_12, %c0_13] : memref<3x4x4xf32, #tpu.memory_space<vmem>>, vector<1x4x4xf32>
    %10 = vector.shape_cast %9 : vector<1x4x4xf32> to vector<4x4xf32>
    %cst_14 = arith.constant dense<0.000000e+00> : vector<64x4xf32>
    %11 = tpu.matmul %8, %10, %cst_14 {dimension_numbers = #tpu.dot_dimension_numbers<[1], [0], [0], [1], [0, 0, 1, 1], [], []>} : vector<64x4xf32>, vector<4x4xf32>, vector<64x4xf32> -> vector<64x4xf32>
    %12 = arith.addf %5, %11 : vector<64x4xf32>
    %c0_15 = arith.constant 0 : index
    %c0_16 = arith.constant 0 : index
    %c0_17 = arith.constant 0 : index
    %c0_18 = arith.constant 0 : index
    %c0_19 = arith.constant 0 : index
    %13 = vector.load %arg5[%c0_15, %c0_16, %c0_17, %c0_18, %c0_19] : memref<1x1x8x8x4xf32, #tpu.memory_space<vmem>>, vector<1x1x8x8x4xf32>
    %14 = vector.shape_cast %13 : vector<1x1x8x8x4xf32> to vector<8x8x4xf32>
    %15 = vector.shape_cast %14 : vector<8x8x4xf32> to vector<64x4xf32>
    %c2 = arith.constant 2 : index
    %c0_20 = arith.constant 0 : index
    %c0_21 = arith.constant 0 : index
    %16 = vector.load %arg6[%c2, %c0_20, %c0_21] : memref<3x4x4xf32, #tpu.memory_space<vmem>>, vector<1x4x4xf32>
    %17 = vector.shape_cast %16 : vector<1x4x4xf32> to vector<4x4xf32>
    %cst_22 = arith.constant dense<0.000000e+00> : vector<64x4xf32>
    %18 = tpu.matmul %15, %17, %cst_22 {dimension_numbers = #tpu.dot_dimension_numbers<[1], [0], [0], [1], [0, 0, 1, 1], [], []>} : vector<64x4xf32>, vector<4x4xf32>, vector<64x4xf32> -> vector<64x4xf32>
    %19 = arith.addf %12, %18 : vector<64x4xf32>
    %c0_23 = arith.constant 0 : index
    %c0_24 = arith.constant 0 : index
    %20 = vector.load %arg7[%c0_23, %c0_24] : memref<1x4xf32, #tpu.memory_space<vmem>>, vector<1x4xf32>
    %21 = vector.broadcast %20 : vector<1x4xf32> to vector<64x4xf32>
    %22 = arith.addf %19, %21 : vector<64x4xf32>
    %23 = vector.shape_cast %22 : vector<64x4xf32> to vector<8x8x4xf32>
    %c0_25 = arith.constant 0 : index
    %c0_26 = arith.constant 0 : index
    %c0_27 = arith.constant 0 : index
    %c0_28 = arith.constant 0 : index
    %c0_29 = arith.constant 0 : index
    %24 = vector.load %arg8[%c0_25, %c0_26, %c0_27, %c0_28, %c0_29] : memref<1x1x8x8x4xf32, #tpu.memory_space<vmem>>, vector<1x1x8x8x4xf32>
    %25 = vector.shape_cast %24 : vector<1x1x8x8x4xf32> to vector<8x8x4xf32>
    %26 = vector.shape_cast %23 : vector<8x8x4xf32> to vector<1x1x8x8x4xf32>
    tpu.vector_store %arg8[%c0_25, %c0_26, %c0_27, %c0_28, %c0_29], %26 {strides = array<i32>} : memref<1x1x8x8x4xf32, #tpu.memory_space<vmem>>, vector<1x1x8x8x4xf32>,
    return
  }
  func.func @transform_0(%arg0: i32, %arg1: i32, %arg2: i32) -> (i32, i32, i32, i32, i32) {
    %c2_i32 = arith.constant 2 : i32
    %0 = arith.muli %c2_i32, %arg1 : i32
    %c2_i32_0 = arith.constant 2 : i32
    %1 = arith.subi %0, %c2_i32_0 : i32
    %c0_i32 = arith.constant 0 : i32
    %2 = arith.maxsi %1, %c0_i32 : i32
    %c0_i32_1 = arith.constant 0 : i32
    %c0_i32_2 = arith.constant 0 : i32
    %c0_i32_3 = arith.constant 0 : i32
    return %arg0, %2, %arg2, %c0_i32_1, %c0_i32_2 : i32, i32, i32, i32, i32
  }
  func.func @transform_1(%arg0: i32, %arg1: i32, %arg2: i32) -> (i32, i32, i32, i32, i32) {
    %c2_i32 = arith.constant 2 : i32
    %0 = arith.muli %c2_i32, %arg1 : i32
    %c1_i32 = arith.constant 1 : i32
    %1 = arith.subi %0, %c1_i32 : i32
    %c0_i32 = arith.constant 0 : i32
    %2 = arith.maxsi %1, %c0_i32 : i32
    %c0_i32_0 = arith.constant 0 : i32
    %c0_i32_1 = arith.constant 0 : i32
    %c0_i32_2 = arith.constant 0 : i32
    return %arg0, %2, %arg2, %c0_i32_0, %c0_i32_1 : i32, i32, i32, i32, i32
  }
  func.func @transform_2(%arg0: i32, %arg1: i32, %arg2: i32) -> (i32, i32, i32, i32, i32) {
    %c2_i32 = arith.constant 2 : i32
    %0 = arith.muli %c2_i32, %arg1 : i32
    %c0_i32 = arith.constant 0 : i32
    %c0_i32_0 = arith.constant 0 : i32
    %c0_i32_1 = arith.constant 0 : i32
    return %arg0, %0, %arg2, %c0_i32, %c0_i32_0 : i32, i32, i32, i32, i32
  }
  func.func @transform_3(%arg0: i32, %arg1: i32, %arg2: i32) -> (i32, i32, i32) {
    %c0_i32 = arith.constant 0 : i32
    %c0_i32_0 = arith.constant 0 : i32
    %c0_i32_1 = arith.constant 0 : i32
    %c0_i32_2 = arith.constant 0 : i32
    return %c0_i32, %c0_i32_0, %c0_i32_1 : i32, i32, i32
  }
  func.func @transform_4(%arg0: i32, %arg1: i32, %arg2: i32) -> (i32, i32) {
    %c0_i32 = arith.constant 0 : i32
    %c0_i32_0 = arith.constant 0 : i32
    %c0_i32_1 = arith.constant 0 : i32
    return %c0_i32, %c0_i32_0 : i32, i32
  }
  func.func @transform_5(%arg0: i32, %arg1: i32, %arg2: i32) -> (i32, i32, i32, i32, i32) {
    %c0_i32 = arith.constant 0 : i32
    %c0_i32_0 = arith.constant 0 : i32
    %c0_i32_1 = arith.constant 0 : i32
    return %arg0, %arg1, %arg2, %c0_i32, %c0_i32_0 : i32, i32, i32, i32, i32
  }
}

</mosaic_0001>

<bundles_post_ra>
// kernel: cosmos_downsample3d.3
= control target key start
LH: loop header
LB: loop body
LE: loop exit
PB: predicated region body
PF: predicated region fallthrough
CT: control target
= control target key end

     0   :  { %s1354_s18 = smov 0   ;;  %s1356_s19 = smov 0   ;;  %s1518_s0 = inlined_call_operand.vmem [shape: f32[2,8,8,8,4], index: 0, kind: input, shape index: {}, may-alias: {0,1,2}]   ;;  %s1519_s1 = inlined_call_operand.vmem [shape: f32[2,8,8,8,4], index: 1, kind: input, shape index: {}, may-alias: {0,1,2}]   ;;  %s1520_s2 = inlined_call_operand.vmem [shape: f32[2,8,8,8,4], index: 2, kind: input, shape index: {}, may-alias: {0,1,2}]   ;;  %s1521_s3 = inlined_call_operand.vmem [shape: f32[3,4,4], index: 3, kind: input, shape index: {}]   ;;  %s1522_s4 = inlined_call_operand.vmem [shape: f32[1,4], index: 4, kind: input, shape index: {}]   ;;  %s1523_s5 = inlined_call_operand.vmem [shape: f32[2,4,8,8,4], index: 5, kind: output, shape index: {}]  }
   0x1   :  { %s1358_s20 = smov 0   ;;  %s1360_s21 = smov 0  }
   0x2   :  { %s1362_s22 = smov 0  }
   0x3 LB: > { %s30_s23 = sadd.s32 1, %s1314_s20  ;;  %s34_s24 = sadd.s32 1, %s1318_s21  ;;  %s1322_s22 = sphi %s1362_s22, %s15_s22   ;;  %s1318_s21 = sphi %s1360_s21, %s1527_s21   ;;  %s1314_s20 = sphi %s1358_s20, %s1526_s20   ;;  %s1310_s19 = sphi %s1356_s19, %s1525_s19   ;;  %s1306_s18 = sphi %s1354_s18, %s1524_s18  }
   0x4   : > { %p32_p0 = scmp.ge.s32.totalorder %s30_s23, 4  ;;  %p1093_p1 = scmp.ge.s32.totalorder %s1322_s22, 1 }
   0x5   : > { %p305_p2 = scmp.lt.s32.totalorder %s1322_s22, 9 }
   0x6   : > { %s1529_s23 = smov (%p32_p0, %s30_s23), 0  ;;  %s1531_s24 = smov (!%p32_p0, %s34_s24), %s1318_s21 }
   0x7   : > { %p306_p3 = pnand %p1093_p1, %p305_p2  ;;  %p36_p4 = scmp.ge.s32.totalorder %s1531_s24, 2 }
   0x8   : > { %v1121_v0 = vld [vmem:[%s1521_s3 + $0x4] sm:$0xf] (!%p306_p3)  ;;  %vm502_vm0 = vcmask (!%p306_p3), 1043456   ;;  %v466_v1 = vld [vmem:[%s1521_s3] sm:$0xf] (!%p306_p3)  ;;  %s1393_s29 = sshll.u32 (!%p306_p3), %s1306_s18, 1 }
   0x9   : > { %s1533_s24 = smov (%p36_p4, %s1531_s24), 0  ;;  %309 = sbr.rel (%p306_p3) target bundleno = 266 (0x10a), region = 40 }
   0xa   : > { %1184 = vmatprep.subr.msk.mxu1 (!%p306_p3), %vm502_vm0, %v1121_v0  ;;  %1198 = vmatprep.subr.msk.mxu0 (!%p306_p3), %vm502_vm0, %v466_v1  ;;  %p389_p5 = scmp.lt.s32.totalorder (!%p306_p3), %s1310_s19, 1  ;;  %s1105_s30 = sadd.s32 (!%p306_p3), 4294967295, %s1393_s29  ;;  %v1140_v2 = vld [vmem:[%s1521_s3 + $0x8] sm:$0xf] (!%p306_p3)  ;;  %vm477_vm1 = vcmask (!%p306_p3), 31744  }
   0xb   : > { %1185 = vmatpush3.msk.msra.mxu1 (!%p306_p3), %vm502_vm0, %v1121_v0  ;;  %1199 = vmatpush3.msk.msra.mxu0 (!%p306_p3), %vm502_vm0, %v466_v1  ;;  %p408_p6 = scmp.gt.s32.totalorder (!%p306_p3), %s1105_s30, 0  ;;  %p1106_p7 = scmp.lt.s32.totalorder (!%p306_p3), %s1105_s30, 7  ;;  %v1150_v32 = vld [vmem:[%s1522_s4] ss:$0 sm:$0xff] (!%p306_p3) }
   0xc   : > { %1226 = vmatprep.subr.msk.mxu1 (!%p306_p3), %vm502_vm0, %v466_v1  ;;  %1212 = vmatprep.subr.msk.mxu0 (!%p306_p3), %vm502_vm0, %v1140_v2  ;;  %s1095_s9 = sadd.s32 (!%p306_p3), 4294967294, %s1393_s29  ;;  %p432_p9 = scmp.lt.s32.totalorder (!%p306_p3), %s1393_s29, 7 }
   0xd   : > { %p386_p8 = scmp.gt.s32.totalorder (!%p306_p3), %s1095_s9, 0  ;;  %p1096_p10 = scmp.lt.s32.totalorder (!%p306_p3), %s1095_s9, 7 }
   0xe   : > { %p447_p11 = scmp.lt.s32.totalorder (!%p306_p3), %s1306_s18, 3 }
  0x10   : > { %s1535_s19 = smov (!%p389_p5, %s1310_s19), 1  ;;  %s1537_s30 = smov (!%p408_p6, %s1105_s30), 0 }
  0x11   : > { %s1102_s8 = sshll.u32 %s1535_s19, 6  ;;  %s1539_s30 = smov (!%p1106_p7, %s1537_s30), 7 }
  0x12   : > { %s1111_s10 = sshll.u32 %s1539_s30, 3  ;;  %s1541_s9 = smov (!%p386_p8, %s1095_s9), 0 }
  0x13   : > { %s420_s11 = sadd.s32 %s1111_s10, %s1102_s8  ;;  %s1543_s29 = smov (!%p432_p9, %s1393_s29), 7 }
  0x14   : > { %s1113_s12 = sshll.u32 %s420_s11, 3  ;;  %s1545_s9 = smov (!%p1096_p10, %s1541_s9), 7 }
  0x15   : > { %s1413_s15 = scalar_lea.vmem %s1519_s1, %s1113_s12  ;;  %s1115_s16 = sshll.u32 %s1543_s29, 3 }
  0x16   : > { %v467_v3 = vld [vmem:[%s1413_s15] sm:$0xff]  ;;  %v468_v4 = vld [vmem:[%s1413_s15 + $0x8] sm:$0xff]  ;;  %v469_v5 = vld [vmem:[%s1413_s15 + $0x10] sm:$0xff]  ;;  %s1101_s17 = sshll.u32 %s1545_s9, 3  ;;  %s439_s25 = sadd.s32 %s1115_s16, %s1102_s8 }
  0x17   : > { %1186 = vmatprep.mubr.msk.f32.mxu1 %vm477_vm1, %v467_v3  ;;  %v470_v6 = vld [vmem:[%s1413_s15 + $0x18] sm:$0xff]  ;;  %v471_v7 = vld [vmem:[%s1413_s15 + $0x20] sm:$0xff]  ;;  %s398_s26 = sadd.s32 %s1102_s8, %s1101_s17  ;;  %s1117_s28 = sshll.u32 %s439_s25, 3  ;;  %v472_v8 = vld [vmem:[%s1413_s15 + $0x28] sm:$0xff] }
  0x18   : > { %1187 = vmatmul.mubr.msk.f32.vlgmr.msra.gmra.mrb[0].mxu1 %vm477_vm1, %v468_v4  ;;  %s1103_s27 = sshll.u32 %s398_s26, 3  ;;  %s1440_s9 = scalar_lea.vmem %s1520_s2, %s1117_s28  ;;  %v473_v12 = vld [vmem:[%s1413_s15 + $0x30] sm:$0xff]  ;;  %v474_v14 = vld [vmem:[%s1413_s15 + $0x38] sm:$0xff] }
  0x19   : > { %1227 = vmatpush3.msk.msra.mxu1 %vm502_vm0, %v466_v1  ;;  %1189 = vmatprep.mubr.msk.f32.mxu1 %vm477_vm1, %v469_v5  ;;  %s1429_s7 = scalar_lea.vmem %s1518_s0, %s1103_s27  ;;  %v743_v15 = vld [vmem:[%s1440_s9] sm:$0xff]  ;;  %v744_v17 = vld [vmem:[%s1440_s9 + $0x8] sm:$0xff]  ;;  %v745_v19 = vld [vmem:[%s1440_s9 + $0x10] sm:$0xff]  ;;  %s1547_s18 = smov (!%p447_p11, %s1306_s18), 3 }
  0x1a   : > { %v458_v9 = vld [vmem:[%s1429_s7] sm:$0xff]  ;;  %v459_v10 = vld [vmem:[%s1429_s7 + $0x8] sm:$0xff]  ;;  %v460_v11 = vld [vmem:[%s1429_s7 + $0x10] sm:$0xff]  ;;  %s1119_s10 = sshll.u32 %s1535_s19, 5  ;;  %s1118_s11 = sshll.u32 %s1547_s18, 3 }
  0x1b   : > { %1200 = vmatprep.mubr.msk.f32.mxu0 %vm477_vm1, %v458_v9  ;;  %v461_v13 = vld [vmem:[%s1429_s7 + $0x18] sm:$0xff]  ;;  %v462_v16 = vld [vmem:[%s1429_s7 + $0x20] sm:$0xff]  ;;  %v463_v18 = vld [vmem:[%s1429_s7 + $0x28] sm:$0xff]  ;;  %s454_s12 = sadd.s32 %s1119_s10, %s1118_s11 }
  0x1c   : > { %1190 = vmatmul.mubr.msk.f32.gmra.mrb[2].mxu1 %vm477_vm1, %v470_v6  ;;  %1201 = vmatmul.mubr.msk.f32.vlgmr.msra.gmra.mrb[0].mxu0 %vm477_vm1, %v459_v10  ;;  %v464_v20 = vld [vmem:[%s1429_s7 + $0x30] sm:$0xff]  ;;  %v746_v21 = vld [vmem:[%s1440_s9 + $0x18] sm:$0xff]  ;;  %v747_v23 = vld [vmem:[%s1440_s9 + $0x20] sm:$0xff]  ;;  %s1120_s13 = sshll.u32 %s454_s12, 3 }
  0x1d   : > { %1192 = vmatprep.mubr.msk.f32.mxu1 %vm477_vm1, %v471_v7  ;;  %1213 = vmatpush3.msk.msra.mxu0 %vm502_vm0, %v1140_v2  ;;  %v465_v22 = vld [vmem:[%s1429_s7 + $0x38] sm:$0xff]  ;;  %v748_v24 = vld [vmem:[%s1440_s9 + $0x28] sm:$0xff]  ;;  %v749_v25 = vld [vmem:[%s1440_s9 + $0x30] sm:$0xff]  ;;  %s1485_s25 = scalar_lea.vmem %s1523_s5, %s1120_s13 }
  0x1e   : > { %1203 = vmatprep.mubr.msk.f32.mxu0 %vm477_vm1, %v460_v11  ;;  %v750_v26 = vld [vmem:[%s1440_s9 + $0x38] sm:$0xff] }
  0x20   : > { %1193 = vmatmul.mubr.msk.f32.gmra.mrb[4].mxu1 %vm477_vm1, %v472_v8  ;;  %1204 = vmatmul.mubr.msk.f32.gmra.mrb[2].mxu0 %vm477_vm1, %v461_v13 }
  0x21   : > { %1195 = vmatprep.mubr.msk.f32.mxu1 %vm477_vm1, %v473_v12  ;;  %1214 = vmatprep.mubr.msk.f32.mxu0 %vm477_vm1, %v743_v15 }
  0x24   : > { %1196 = vmatmul.mubr.msk.f32.gmra.mrb[6].mxu1 %vm477_vm1, %v474_v14  ;;  %1215 = vmatmul.mubr.msk.f32.vlgmr.msra.gmra.mrb[0].mxu0 %vm477_vm1, %v744_v17 }
  0x25   : > { %1206 = vmatprep.mubr.msk.f32.mxu1 %vm477_vm1, %v462_v16  ;;  %1217 = vmatprep.mubr.msk.f32.mxu0 %vm477_vm1, %v745_v19 }
  0x28   : > { %1207 = vmatmul.mubr.msk.f32.vlgmr.msra.gmra.mrb[4].mxu1 %vm477_vm1, %v463_v18  ;;  %1218 = vmatmul.mubr.msk.f32.gmra.mrb[2].mxu0 %vm477_vm1, %v746_v21 }
  0x29   : > { %1209 = vmatprep.mubr.msk.f32.mxu1 %vm477_vm1, %v464_v20  ;;  %1220 = vmatprep.mubr.msk.f32.mxu0 %vm477_vm1, %v747_v23 }
  0x2c   : > { %1210 = vmatmul.mubr.msk.f32.gmra.mrb[6].mxu1 %vm477_vm1, %v465_v22  ;;  %1221 = vmatmul.mubr.msk.f32.gmra.mrb[4].mxu0 %vm477_vm1, %v748_v24 }
  0x2d   : > { %1223 = vmatprep.mubr.msk.f32.mxu0 %vm477_vm1, %v749_v25 }
  0x30   : > { %1224 = vmatmul.mubr.msk.f32.gmra.mrb[6].mxu0 %vm477_vm1, %v750_v26 }
  0xeb   : > { %v1188_v27 = vpop.f32.mrb[0].mxu1 }
  0xec   : > { %v572_v28 = vpop.f32.mrb[1].mxu1 }
  0xef   : > { %v1191_v29 = vpop.f32.mrb[2].mxu1 }
  0xf0   : > { %v582_v30 = vpop.f32.mrb[3].mxu1 }
  0xf7   : > { %v1216_v31 = vpop.f32.mrb[0].mxu0 }
  0xf8   : > { %v1228_v34 = vadd.f32 %v1216_v31, %v1188_v27  ;;  %v846_v35 = vpop.f32.mrb[1].mxu0 }
  0xf9   : > { %v1229_v37 = vadd.f32 %v846_v35, %v572_v28 }
  0xfa   : > { %v901_v38 = vadd.f32 %v1228_v34, %v1150_v32 }
  0xfb   : > { %v1208_v33 = vpop.f32.mrb[4].mxu1  ;;  %v900_v39 = vadd.f32 %v1229_v37, %v1150_v32  ;;  %v1219_v40 = vpop.f32.mrb[2].mxu0 }
  0xfc   : > { %v724_v36 = vpop.f32.mrb[5].mxu1  ;;  %909 = vst.msk [vmem:[%s1485_s25 + $0x8] sm:$0xff] %vm477_vm1, %v901_v38  ;;  %v1230_v42 = vadd.f32 %v1219_v40, %v1191_v29  ;;  %v856_v43 = vpop.f32.mrb[3].mxu0 }
  0xfd   : > { %908 = vst.msk [vmem:[%s1485_s25] sm:$0xff] %vm477_vm1, %v900_v39  ;;  %v1231_v45 = vadd.f32 %v856_v43, %v582_v30 }
  0xfe   : > { %v903_v46 = vadd.f32 %v1230_v42, %v1150_v32 }
  0xff   : > { %v1211_v41 = vpop.f32.mrb[6].mxu1  ;;  %v902_v47 = vadd.f32 %v1231_v45, %v1150_v32  ;;  %v1222_v48 = vpop.f32.mrb[4].mxu0 }
 0x100   : > { %v734_v44 = vpop.f32.mrb[7].mxu1  ;;  %911 = vst.msk [vmem:[%s1485_s25 + $0x18] sm:$0xff] %vm477_vm1, %v903_v46  ;;  %v1232_v49 = vadd.f32 %v1222_v48, %v1208_v33  ;;  %v866_v50 = vpop.f32.mrb[5].mxu0 }
 0x101   : > { %910 = vst.msk [vmem:[%s1485_s25 + $0x10] sm:$0xff] %vm477_vm1, %v902_v47  ;;  %v1233_v51 = vadd.f32 %v866_v50, %v724_v36 }
 0x102   : > { %v905_v52 = vadd.f32 %v1232_v49, %v1150_v32 }
 0x103   : > { %v904_v53 = vadd.f32 %v1233_v51, %v1150_v32  ;;  %v1225_v54 = vpop.f32.mrb[6].mxu0 }
 0x104   : > { %913 = vst.msk [vmem:[%s1485_s25 + $0x28] sm:$0xff] %vm477_vm1, %v905_v52  ;;  %v1234_v55 = vadd.f32 %v1225_v54, %v1211_v41  ;;  %v876_v56 = vpop.f32.mrb[7].mxu0 }
 0x105   : > { %912 = vst.msk [vmem:[%s1485_s25 + $0x20] sm:$0xff] %vm477_vm1, %v904_v53  ;;  %v1235_v57 = vadd.f32 %v876_v56, %v734_v44 }
 0x106   : > { %v907_v58 = vadd.f32 %v1234_v55, %v1150_v32 }
 0x107   : > { %v906_v59 = vadd.f32 %v1235_v57, %v1150_v32 }
 0x108   : > { %915 = vst.msk [vmem:[%s1485_s25 + $0x38] sm:$0xff] %vm477_vm1, %v907_v58 }
 0x109   : > { %914 = vst.msk [vmem:[%s1485_s25 + $0x30] sm:$0xff] %vm477_vm1, %v906_v59 }
 0x10a PF: > { %s15_s22 = sadd.s32 1, %s1322_s22   ;;  %s1524_s18 = smov %s1314_s20 }
 0x10b   : > { %p12_p12 = scmp.ge.s32.totalorder %s15_s22, 10   ;;  %s1525_s19 = smov %s1318_s21 }
 0x10c   : > { %s1526_s20 = smov %s1529_s23  ;;  %s1527_s21 = smov %s1533_s24 }
 0x10d   :  { %14 = sbr.rel (!%p12_p12) target bundleno = 3 (0x3), region = 78 }

// kernel: cosmos_downsample3d.2
= control target key start
LH: loop header
LB: loop body
LE: loop exit
PB: predicated region body
PF: predicated region fallthrough
CT: control target
= control target key end

     0   :  { %s9823_s12 = smov 0   ;;  %s9825_s13 = smov 0   ;;  %s11353_s0 = inlined_call_operand.vmem [shape: f32[16,6,8,9,4], index: 0, kind: input, shape index: {}]   ;;  %s11354_s1 = inlined_call_operand.vmem [shape: f32[9,4,4], index: 1, kind: input, shape index: {}]   ;;  %s11355_s2 = inlined_call_operand.vmem [shape: f32[1,4], index: 2, kind: input, shape index: {}]   ;;  %s11356_s3 = inlined_call_operand.vmem [shape: f32[16,8,8,4], index: 3, kind: output, shape index: {}]  }
   0x1   :  { %s9827_s14 = smov 0  }
   0x2 LB: > { %s25_s15 = sadd.s32 1, %s9797_s13  ;;  %p6721_p0 = scmp.ge.s32.totalorder %s9801_s14, 1  ;;  %s9801_s14 = sphi %s9827_s14, %s13_s14   ;;  %s9797_s13 = sphi %s9825_s13, %s11358_s13   ;;  %s9793_s12 = sphi %s9823_s12, %s11357_s12  }
   0x3   : > { %p27_p1 = scmp.ge.s32.totalorder %s25_s15, 2  ;;  %p161_p2 = scmp.lt.s32.totalorder %s9801_s14, 3 }
   0x5   : > { %s11360_s15 = smov (%p27_p1, %s25_s15), 0  ;;  %p162_p3 = pnand %p6721_p0, %p161_p2 }
   0x6   : > { %v6791_v0 = vld [vmem:[%s11354_s1 + $0x4] sm:$0xf] (!%p162_p3)  ;;  %vm546_vm0 = vcmask (!%p162_p3), 1043456   ;;  %v7182_v1 = vld [vmem:[%s11354_s1 + $0x10] sm:$0xf] (!%p162_p3)  ;;  %s6722_s20 = sshll.u32 (!%p162_p3), %s9793_s12, 3 }
   0x7   : > { %165 = sbr.rel (%p162_p3) target bundleno = 811 (0x32b), region = 32  ;;  %8357 = vmatprep.subr.msk.mxu1 (!%p162_p3), %vm546_vm0, %v6791_v0  ;;  %8749 = vmatprep.subr.msk.mxu0 (!%p162_p3), %vm546_vm0, %v7182_v1  ;;  %p198_p4 = scmp.lt.s32.totalorder (!%p162_p3), %s6722_s20, 15  ;;  %v285_v2 = vld [vmem:[%s11354_s1] sm:$0xf] (!%p162_p3)  ;;  %v7312_v3 = vld [vmem:[%s11354_s1 + $0x14] sm:$0xf] (!%p162_p3) }
   0x8   : > { %8358 = vmatpush3.msk.msra.mxu1 (!%p162_p3), %vm546_vm0, %v6791_v0  ;;  %8750 = vmatpush3.msk.msra.mxu0 (!%p162_p3), %vm546_vm0, %v7182_v1  ;;  %vm353_vm1 = vcmask (!%p162_p3), 31744   ;;  %v9880_v10 = vld [vmem:[%s11354_s1 + $0x18] sm:$0xf] (!%p162_p3)  ;;  %v9885_v11 = vld [vmem:[%s11354_s1 + $0x8] sm:$0xf] (!%p162_p3) }
   0x9   : > { %8455 = vmatprep.subr.msk.mxu1 (!%p162_p3), %vm546_vm0, %v285_v2  ;;  %8847 = vmatprep.subr.msk.mxu0 (!%p162_p3), %vm546_vm0, %v7312_v3 }
   0xe   : > { %s11362_s20 = smov (!%p198_p4, %s6722_s20), 15 }
   0xf   : > { %s9753_s25 = smul.u32 768, %s11362_s20  ;;  %s7771_s17 = sshll.u32 %s11362_s20, 6 }
  0x10   : > { %s11128_s23 = scalar_lea.vmem %s11356_s3, %s7771_s17 }
  0x11   : > { %s9865_s28 = scalar_lea.vmem %s11353_s0, %s9753_s25 }
  0x12   : > { %v6727_v4 = vld [vmem:[%s9865_s28 + $0x80] sm:$0xff]  ;;  %v6728_v6 = vld [vmem:[%s9865_s28 + $0x90] sm:$0xff] }
  0x13   : > { %v7118_v5 = vld [vmem:[%s9865_s28 + $0x180] sm:$0xff]  ;;  %8359 = vmatprep.mubr.msk.f32.mxu1 %vm353_vm1, %v6727_v4  ;;  %v7119_v7 = vld [vmem:[%s9865_s28 + $0x190] sm:$0xff] }
  0x14   : > { %8751 = vmatprep.mubr.msk.f32.mxu0 %vm353_vm1, %v7118_v5  ;;  %v6729_v8 = vld [vmem:[%s9865_s28 + $0xa0] sm:$0xff]  ;;  %8360 = vmatmul.mubr.msk.f32.vlgmr.msra.gmra.mrb[0].mxu1 %vm353_vm1, %v6728_v6  ;;  %v6730_v12 = vld [vmem:[%s9865_s28 + $0xb0] sm:$0xff] }
  0x15   : > { %v7120_v9 = vld [vmem:[%s9865_s28 + $0x1a0] sm:$0xff]  ;;  %8752 = vmatmul.mubr.msk.f32.vlgmr.msra.gmra.mrb[0].mxu0 %vm353_vm1, %v7119_v7  ;;  %8456 = vmatpush3.msk.msra.mxu1 %vm546_vm0, %v285_v2  ;;  %v7121_v13 = vld [vmem:[%s9865_s28 + $0x1b0] sm:$0xff] }
  0x16   : > { %8848 = vmatpush3.msk.msra.mxu0 %vm546_vm0, %v7312_v3  ;;  %8362 = vmatprep.mubr.msk.f32.mxu1 %vm353_vm1, %v6729_v8  ;;  %v6731_v14 = vld [vmem:[%s9865_s28 + $0xc0] sm:$0xff]  ;;  %v6732_v16 = vld [vmem:[%s9865_s28 + $0xd0] sm:$0xff] }
  0x17   : > { %8754 = vmatprep.mubr.msk.f32.mxu0 %vm353_vm1, %v7120_v9  ;;  %v7122_v15 = vld [vmem:[%s9865_s28 + $0x1c0] sm:$0xff]  ;;  %8945 = vmatprep.subr.msk.mxu0 %vm546_vm0, %v9880_v10  ;;  %v7123_v17 = vld [vmem:[%s9865_s28 + $0x1d0] sm:$0xff] }
  0x18   : > { %8553 = vmatprep.subr.msk.mxu1 %vm546_vm0, %v9885_v11  ;;  %8363 = vmatmul.mubr.msk.f32.gmra.mrb[2].mxu1 %vm353_vm1, %v6730_v12  ;;  %v6733_v18 = vld [vmem:[%s9865_s28 + $0xe0] sm:$0xff]  ;;  %v6734_v20 = vld [vmem:[%s9865_s28 + $0xf0] sm:$0xff] }
  0x19   : > { %8755 = vmatmul.mubr.msk.f32.gmra.mrb[2].mxu0 %vm353_vm1, %v7121_v13  ;;  %8365 = vmatprep.mubr.msk.f32.mxu1 %vm353_vm1, %v6731_v14  ;;  %v7124_v19 = vld [vmem:[%s9865_s28 + $0x1e0] sm:$0xff]  ;;  %v7125_v21 = vld [vmem:[%s9865_s28 + $0x1f0] sm:$0xff]  ;;  %v10022_v14 = vld [vmem:[%s11354_s1 + $0x1c] sm:$0xf] }
  0x1a   : > { %8757 = vmatprep.mubr.msk.f32.mxu0 %vm353_vm1, %v7122_v15  ;;  %v6735_v22 = vld [vmem:[%s9865_s28 + $0x380] sm:$0xff]  ;;  %v6736_v24 = vld [vmem:[%s9865_s28 + $0x390] sm:$0xff] }
  0x1b   : > { %v7126_v23 = vld [vmem:[%s9865_s28 + $0x480] sm:$0xff]  ;;  %v7127_v25 = vld [vmem:[%s9865_s28 + $0x490] sm:$0xff] }
  0x1c   : > { %8366 = vmatmul.mubr.msk.f32.gmra.mrb[4].mxu1 %vm353_vm1, %v6732_v16  ;;  %v6737_v26 = vld [vmem:[%s9865_s28 + $0x3a0] sm:$0xff]  ;;  %v6738_v28 = vld [vmem:[%s9865_s28 + $0x3b0] sm:$0xff] }
  0x1d   : > { %8758 = vmatmul.mubr.msk.f32.gmra.mrb[4].mxu0 %vm353_vm1, %v7123_v17  ;;  %8368 = vmatprep.mubr.msk.f32.mxu1 %vm353_vm1, %v6733_v18  ;;  %v7128_v27 = vld [vmem:[%s9865_s28 + $0x4a0] sm:$0xff]  ;;  %v7129_v29 = vld [vmem:[%s9865_s28 + $0x4b0] sm:$0xff] }
  0x1e   : > { %8760 = vmatprep.mubr.msk.f32.mxu0 %vm353_vm1, %v7124_v19  ;;  %v6739_v30 = vld [vmem:[%s9865_s28 + $0x3c0] sm:$0xff]  ;;  %v6740_v32 = vld [vmem:[%s9865_s28 + $0x3d0] sm:$0xff] }
  0x1f   : > { %v7130_v31 = vld [vmem:[%s9865_s28 + $0x4c0] sm:$0xff]  ;;  %v7131_v33 = vld [vmem:[%s9865_s28 + $0x4d0] sm:$0xff] }
  0x20   : > { %8369 = vmatmul.mubr.msk.f32.gmra.mrb[6].mxu1 %vm353_vm1, %v6734_v20  ;;  %v6741_v34 = vld [vmem:[%s9865_s28 + $0x3e0] sm:$0xff]  ;;  %v6742_v36 = vld [vmem:[%s9865_s28 + $0x3f0] sm:$0xff] }
  0x21   : > { %8761 = vmatmul.mubr.msk.f32.gmra.mrb[6].mxu0 %vm353_vm1, %v7125_v21  ;;  %8371 = vmatprep.mubr.msk.f32.mxu1 %vm353_vm1, %v6735_v22  ;;  %v7132_v35 = vld [vmem:[%s9865_s28 + $0x4e0] sm:$0xff]  ;;  %v7133_v37 = vld [vmem:[%s9865_s28 + $0x4f0] sm:$0xff] }
  0x22   : > { %8763 = vmatprep.mubr.msk.f32.mxu0 %vm353_vm1, %v7126_v23  ;;  %v6743_v38 = vld [vmem:[%s9865_s28 + $0x680] sm:$0xff]  ;;  %v6744_v40 = vld [vmem:[%s9865_s28 + $0x690] sm:$0xff] }
  0x23   : > { %v7134_v39 = vld [vmem:[%s9865_s28 + $0x780] sm:$0xff]  ;;  %v7135_v41 = vld [vmem:[%s9865_s28 + $0x790] sm:$0xff] }
  0x24   : > { %8372 = vmatmul.mubr.msk.f32.gmra.mrb[8].mxu1 %vm353_vm1, %v6736_v24  ;;  %v6745_v42 = vld [vmem:[%s9865_s28 + $0x6a0] sm:$0xff]  ;;  %v6746_v44 = vld [vmem:[%s9865_s28 + $0x6b0] sm:$0xff] }
  0x25   : > { %8764 = vmatmul.mubr.msk.f32.gmra.mrb[8].mxu0 %vm353_vm1, %v7127_v25  ;;  %8374 = vmatprep.mubr.msk.f32.mxu1 %vm353_vm1, %v6737_v26  ;;  %v7136_v43 = vld [vmem:[%s9865_s28 + $0x7a0] sm:$0xff]  ;;  %v7137_v45 = vld [vmem:[%s9865_s28 + $0x7b0] sm:$0xff] }
  0x26   : > { %8766 = vmatprep.mubr.msk.f32.mxu0 %vm353_vm1, %v7128_v27  ;;  %v6747_v46 = vld [vmem:[%s9865_s28 + $0x6c0] sm:$0xff]  ;;  %v6748_v48 = vld [vmem:[%s9865_s28 + $0x6d0] sm:$0xff] }
  0x27   : > { %v7138_v47 = vld [vmem:[%s9865_s28 + $0x7c0] sm:$0xff]  ;;  %v7139_v49 = vld [vmem:[%s9865_s28 + $0x7d0] sm:$0xff] }
  0x28   : > { %8375 = vmatmul.mubr.msk.f32.gmra.mrb[10].mxu1 %vm353_vm1, %v6738_v28  ;;  %v6749_v50 = vld [vmem:[%s9865_s28 + $0x6e0] sm:$0xff]  ;;  %v6750_v52 = vld [vmem:[%s9865_s28 + $0x6f0] sm:$0xff] }
  0x29   : > { %8767 = vmatmul.mubr.msk.f32.gmra.mrb[10].mxu0 %vm353_vm1, %v7129_v29  ;;  %8377 = vmatprep.mubr.msk.f32.mxu1 %vm353_vm1, %v6739_v30  ;;  %v7140_v51 = vld [vmem:[%s9865_s28 + $0x7e0] sm:$0xff]  ;;  %v7141_v53 = vld [vmem:[%s9865_s28 + $0x7f0] sm:$0xff] }
  0x2a   : > { %8769 = vmatprep.mubr.msk.f32.mxu0 %vm353_vm1, %v7130_v31  ;;  %v6751_v54 = vld [vmem:[%s9865_s28 + $0x980] sm:$0xff]  ;;  %v6752_v56 = vld [vmem:[%s9865_s28 + $0x990] sm:$0xff] }
  0x2b   : > { %v7142_v55 = vld [vmem:[%s9865_s28 + $0xa80] sm:$0xff]  ;;  %v7143_v57 = vld [vmem:[%s9865_s28 + $0xa90] sm:$0xff] }
  0x2c   : > { %8378 = vmatmul.mubr.msk.f32.gmra.mrb[12].mxu1 %vm353_vm1, %v6740_v32  ;;  %v6753_v58 = vld [vmem:[%s9865_s28 + $0x9a0] sm:$0xff]  ;;  %v6754_v60 = vld [vmem:[%s9865_s28 + $0x9b0] sm:$0xff] }
  0x2d   : > { %8770 = vmatmul.mubr.msk.f32.gmra.mrb[12].mxu0 %vm353_vm1, %v7131_v33  ;;  %8380 = vmatprep.mubr.msk.f32.mxu1 %vm353_vm1, %v6741_v34  ;;  %v7144_v59 = vld [vmem:[%s9865_s28 + $0xaa0] sm:$0xff]  ;;  %v7145_v61 = vld [vmem:[%s9865_s28 + $0xab0] sm:$0xff] }
  0x2e   : > { %8772 = vmatprep.mubr.msk.f32.mxu0 %vm353_vm1, %v7132_v35  ;;  %v6755_v62 = vld [vmem:[%s9865_s28 + $0x9c0] sm:$0xff]  ;;  %v6756_v0 = vld [vmem:[%s9865_s28 + $0x9d0] sm:$0xff] }
  0x2f   : > { %v7146_v63 = vld [vmem:[%s9865_s28 + $0xac0] sm:$0xff]  ;;  %v7147_v1 = vld [vmem:[%s9865_s28 + $0xad0] sm:$0xff] }
  0x30   : > { %8381 = vmatmul.mubr.msk.f32.gmra.mrb[14].mxu1 %vm353_vm1, %v6742_v36  ;;  %v6757_v2 = vld [vmem:[%s9865_s28 + $0x9e0] sm:$0xff]  ;;  %v6758_v4 = vld [vmem:[%s9865_s28 + $0x9f0] sm:$0xff] }
  0x31   : > { %8773 = vmatmul.mubr.msk.f32.gmra.mrb[14].mxu0 %vm353_vm1, %v7133_v37  ;;  %8383 = vmatprep.mubr.msk.f32.mxu1 %vm353_vm1, %v6743_v38  ;;  %v7148_v3 = vld [vmem:[%s9865_s28 + $0xae0] sm:$0xff]  ;;  %v7149_v5 = vld [vmem:[%s9865_s28 + $0xaf0] sm:$0xff] }
  0x32   : > { %8775 = vmatprep.mubr.msk.f32.mxu0 %vm353_vm1, %v7134_v39  ;;  %v6759_v6 = vld [vmem:[%s9865_s28 + $0xc80] sm:$0xff]  ;;  %v6760_v8 = vld [vmem:[%s9865_s28 + $0xc90] sm:$0xff] }
  0x33   : > { %v7248_v7 = vld [vmem:[%s9865_s28 + $0x101] sm:$0xff]  ;;  %v7249_v9 = vld [vmem:[%s9865_s28 + $0x111] sm:$0xff] }
  0x34   : > { %8384 = vmatmul.mubr.msk.f32.gmra.mrb[16].mxu1 %vm353_vm1, %v6744_v40  ;;  %v6761_v12 = vld [vmem:[%s9865_s28 + $0xca0] sm:$0xff]  ;;  %v6762_v15 = vld [vmem:[%s9865_s28 + $0xcb0] sm:$0xff] }
  0x35   : > { %8776 = vmatmul.mubr.msk.f32.gmra.mrb[16].mxu0 %vm353_vm1, %v7135_v41  ;;  %8386 = vmatprep.mubr.msk.f32.mxu1 %vm353_vm1, %v6745_v42  ;;  %v7250_v13 = vld [vmem:[%s9865_s28 + $0x121] sm:$0xff]  ;;  %v7251_v16 = vld [vmem:[%s9865_s28 + $0x131] sm:$0xff] }
  0x36   : > { %8778 = vmatprep.mubr.msk.f32.mxu0 %vm353_vm1, %v7136_v43  ;;  %v6763_v17 = vld [vmem:[%s9865_s28 + $0xcc0] sm:$0xff]  ;;  %v7253_v19 = vld [vmem:[%s9865_s28 + $0x151] sm:$0xff] }
  0x37   : > { %v7252_v18 = vld [vmem:[%s9865_s28 + $0x141] sm:$0xff]  ;;  %v6766_v22 = vld [vmem:[%s9865_s28 + $0xcf0] sm:$0xff] }
  0x38   : > { %8387 = vmatmul.mubr.msk.f32.gmra.mrb[18].mxu1 %vm353_vm1, %v6746_v44  ;;  %v6765_v20 = vld [vmem:[%s9865_s28 + $0xce0] sm:$0xff]  ;;  %v7255_v23 = vld [vmem:[%s9865_s28 + $0x171] sm:$0xff] }
  0x39   : > { %8779 = vmatmul.mubr.msk.f32.gmra.mrb[18].mxu0 %vm353_vm1, %v7137_v45  ;;  %8389 = vmatprep.mubr.msk.f32.mxu1 %vm353_vm1, %v6747_v46  ;;  %v7254_v21 = vld [vmem:[%s9865_s28 + $0x161] sm:$0xff]  ;;  %v6768_v26 = vld [vmem:[%s9865_s28 + $0xf90] sm:$0xff] }
  0x3a   : > { %8781 = vmatprep.mubr.msk.f32.mxu0 %vm353_vm1, %v7138_v47  ;;  %v6767_v24 = vld [vmem:[%s9865_s28 + $0xf80] sm:$0xff]  ;;  %v7257_v27 = vld [vmem:[%s9865_s28 + $0x411] sm:$0xff] }
  0x3b   : > { %v7256_v25 = vld [vmem:[%s9865_s28 + $0x401] sm:$0xff]  ;;  %v6770_v30 = vld [vmem:[%s9865_s28 + $0xfb0] sm:$0xff] }
  0x3c   : > { %8390 = vmatmul.mubr.msk.f32.gmra.mrb[20].mxu1 %vm353_vm1, %v6748_v48  ;;  %v6769_v28 = vld [vmem:[%s9865_s28 + $0xfa0] sm:$0xff]  ;;  %v7259_v31 = vld [vmem:[%s9865_s28 + $0x431] sm:$0xff] }
  0x3d   : > { %8782 = vmatmul.mubr.msk.f32.gmra.mrb[20].mxu0 %vm353_vm1, %v7139_v49  ;;  %8392 = vmatprep.mubr.msk.f32.mxu1 %vm353_vm1, %v6749_v50  ;;  %v7258_v29 = vld [vmem:[%s9865_s28 + $0x421] sm:$0xff]  ;;  %v6772_v34 = vld [vmem:[%s9865_s28 + $0xfd0] sm:$0xff] }
  0x3e   : > { %8784 = vmatprep.mubr.msk.f32.mxu0 %vm353_vm1, %v7140_v51  ;;  %v6771_v32 = vld [vmem:[%s9865_s28 + $0xfc0] sm:$0xff]  ;;  %v7261_v35 = vld [vmem:[%s9865_s28 + $0x451] sm:$0xff] }
  0x3f   : > { %v7260_v33 = vld [vmem:[%s9865_s28 + $0x441] sm:$0xff]  ;;  %v6774_v38 = vld [vmem:[%s9865_s28 + $0xff0] sm:$0xff] }
  0x40   : > { %8393 = vmatmul.mubr.msk.f32.gmra.mrb[22].mxu1 %vm353_vm1, %v6750_v52  ;;  %v6773_v36 = vld [vmem:[%s9865_s28 + $0xfe0] sm:$0xff]  ;;  %v7263_v39 = vld [vmem:[%s9865_s28 + $0x471] sm:$0xff] }
  0x41   : > { %8785 = vmatmul.mubr.msk.f32.gmra.mrb[22].mxu0 %vm353_vm1, %v7141_v53  ;;  %8395 = vmatprep.mubr.msk.f32.mxu1 %vm353_vm1, %v6751_v54  ;;  %v7262_v37 = vld [vmem:[%s9865_s28 + $0x461] sm:$0xff]  ;;  %v6776_v42 = vld [vmem:[%s9865_s28 + $0x1290] sm:$0xff] }
  0x42   : > { %8787 = vmatprep.mubr.msk.f32.mxu0 %vm353_vm1, %v7142_v55  ;;  %v6775_v40 = vld [vmem:[%s9865_s28 + $0x1280] sm:$0xff]  ;;  %v7265_v43 = vld [vmem:[%s9865_s28 + $0x711] sm:$0xff] }
  0x43   : > { %v7264_v41 = vld [vmem:[%s9865_s28 + $0x701] sm:$0xff]  ;;  %v6778_v46 = vld [vmem:[%s9865_s28 + $0x12b0] sm:$0xff] }
  0x44   : > { %8396 = vmatmul.mubr.msk.f32.gmra.mrb[24].mxu1 %vm353_vm1, %v6752_v56  ;;  %v6777_v44 = vld [vmem:[%s9865_s28 + $0x12a0] sm:$0xff]  ;;  %v7267_v47 = vld [vmem:[%s9865_s28 + $0x731] sm:$0xff] }
  0x45   : > { %8788 = vmatmul.mubr.msk.f32.gmra.mrb[24].mxu0 %vm353_vm1, %v7143_v57  ;;  %8398 = vmatprep.mubr.msk.f32.mxu1 %vm353_vm1, %v6753_v58  ;;  %v7266_v45 = vld [vmem:[%s9865_s28 + $0x721] sm:$0xff]  ;;  %v6780_v50 = vld [vmem:[%s9865_s28 + $0x12d0] sm:$0xff] }
  0x46   : > { %8790 = vmatprep.mubr.msk.f32.mxu0 %vm353_vm1, %v7144_v59  ;;  %v6779_v48 = vld [vmem:[%s9865_s28 + $0x12c0] sm:$0xff]  ;;  %v7269_v51 = vld [vmem:[%s9865_s28 + $0x751] sm:$0xff] }
  0x47   : > { %v7268_v49 = vld [vmem:[%s9865_s28 + $0x741] sm:$0xff]  ;;  %v6782_v54 = vld [vmem:[%s9865_s28 + $0x12f0] sm:$0xff] }
  0x48   : > { %8399 = vmatmul.mubr.msk.f32.gmra.mrb[26].mxu1 %vm353_vm1, %v6754_v60  ;;  %v6781_v52 = vld [vmem:[%s9865_s28 + $0x12e0] sm:$0xff]  ;;  %v7271_v55 = vld [vmem:[%s9865_s28 + $0x771] sm:$0xff] }
  0x49   : > { %8791 = vmatmul.mubr.msk.f32.gmra.mrb[26].mxu0 %vm353_vm1, %v7145_v61  ;;  %8401 = vmatprep.mubr.msk.f32.mxu1 %vm353_vm1, %v6755_v62  ;;  %v7270_v53 = vld [vmem:[%s9865_s28 + $0x761] sm:$0xff]  ;;  %v6784_v58 = vld [vmem:[%s9865_s28 + $0x1590] sm:$0xff] }
  0x4a   : > { %8793 = vmatprep.mubr.msk.f32.mxu0 %vm353_vm1, %v7146_v63  ;;  %v6783_v56 = vld [vmem:[%s9865_s28 + $0x1580] sm:$0xff]  ;;  %v7273_v59 = vld [vmem:[%s9865_s28 + $0xa11] sm:$0xff] }
  0x4b   : > { %v7272_v57 = vld [vmem:[%s9865_s28 + $0xa01] sm:$0xff]  ;;  %v6786_v62 = vld [vmem:[%s9865_s28 + $0x15b0] sm:$0xff] }
  0x4c   : > { %8402 = vmatmul.mubr.msk.f32.gmra.mrb[28].mxu1 %vm353_vm1, %v6756_v0  ;;  %v6785_v60 = vld [vmem:[%s9865_s28 + $0x15a0] sm:$0xff]  ;;  %v7275_v63 = vld [vmem:[%s9865_s28 + $0xa31] sm:$0xff] }
  0x4d   : > { %8794 = vmatmul.mubr.msk.f32.gmra.mrb[28].mxu0 %vm353_vm1, %v7147_v1  ;;  %8404 = vmatprep.mubr.msk.f32.mxu1 %vm353_vm1, %v6757_v2  ;;  %v7274_v61 = vld [vmem:[%s9865_s28 + $0xa21] sm:$0xff]  ;;  %v6788_v2 = vld [vmem:[%s9865_s28 + $0x15d0] sm:$0xff] }
  0x4e   : > { %8796 = vmatprep.mubr.msk.f32.mxu0 %vm353_vm1, %v7148_v3  ;;  %v6787_v0 = vld [vmem:[%s9865_s28 + $0x15c0] sm:$0xff]  ;;  %v7277_v3 = vld [vmem:[%s9865_s28 + $0xa51] sm:$0xff] }
  0x4f   : > { %v7276_v1 = vld [vmem:[%s9865_s28 + $0xa41] sm:$0xff] }
  0x50   : > { %8405 = vmatmul.mubr.msk.f32.gmra.mrb[30].mxu1 %vm353_vm1, %v6758_v4  ;;  %v6789_v4 = vld [vmem:[%s9865_s28 + $0x15e0] sm:$0xff] }
  0x51   : > { %8797 = vmatmul.mubr.msk.f32.gmra.mrb[30].mxu0 %vm353_vm1, %v7149_v5  ;;  %8407 = vmatprep.mubr.msk.f32.mxu1 %vm353_vm1, %v6759_v6  ;;  %v7278_v5 = vld [vmem:[%s9865_s28 + $0xa61] sm:$0xff]  ;;  %v6790_v6 = vld [vmem:[%s9865_s28 + $0x15f0] sm:$0xff] }
  0x52   : > { %8849 = vmatprep.mubr.msk.f32.mxu0 %vm353_vm1, %v7248_v7  ;;  %v7279_v7 = vld [vmem:[%s9865_s28 + $0xa71] sm:$0xff] }
  0x54   : > { %8408 = vmatmul.mubr.msk.f32.gmra.mrb[32].mxu1 %vm353_vm1, %v6760_v8  ;;  %v221_v8 = vld [vmem:[%s9865_s28] sm:$0xff] }
  0x55   : > { %8850 = vmatmul.mubr.msk.f32.vlgmr.msra.gmra.mrb[0].mxu0 %vm353_vm1, %v7249_v9  ;;  %8410 = vmatprep.mubr.msk.f32.mxu1 %vm353_vm1, %v6761_v12  ;;  %v7280_v9 = vld [vmem:[%s9865_s28 + $0xd01] sm:$0xff]  ;;  %v222_v12 = vld [vmem:[%s9865_s28 + $0x10] sm:$0xff] }
  0x56   : > { %8946 = vmatpush3.msk.msra.mxu0 %vm546_vm0, %v9880_v10  ;;  %8852 = vmatprep.mubr.msk.f32.mxu0 %vm353_vm1, %v7250_v13  ;;  %v6764_v10 = vld [vmem:[%s9865_s28 + $0xcd0] sm:$0xff] }
  0x57   : > { %9043 = vmatprep.subr.msk.mxu0 %vm546_vm0, %v10022_v14  ;;  %v7281_v13 = vld [vmem:[%s9865_s28 + $0xd11] sm:$0xff] }
  0x58   : > { %8411 = vmatmul.mubr.msk.f32.gmra.mrb[34].mxu1 %vm353_vm1, %v6762_v15  ;;  %v223_v15 = vld [vmem:[%s9865_s28 + $0x20] sm:$0xff] }
  0x59   : > { %8853 = vmatmul.mubr.msk.f32.gmra.mrb[2].mxu0 %vm353_vm1, %v7251_v16  ;;  %8413 = vmatprep.mubr.msk.f32.mxu1 %vm353_vm1, %v6763_v17  ;;  %v7282_v16 = vld [vmem:[%s9865_s28 + $0xd21] sm:$0xff]  ;;  %v10159_v17 = vld [vmem:[%s11354_s1 + $0xc] sm:$0xf] }
  0x5a   : > { %8855 = vmatprep.mubr.msk.f32.mxu0 %vm353_vm1, %v7252_v18  ;;  %v224_v18 = vld [vmem:[%s9865_s28 + $0x30] sm:$0xff] }
  0x5c   : > { %8414 = vmatmul.mubr.msk.f32.gmra.mrb[36].mxu1 %vm353_vm1, %v6764_v10  ;;  %v7283_v10 = vld [vmem:[%s9865_s28 + $0xd31] sm:$0xff] }
  0x5d   : > { %8856 = vmatmul.mubr.msk.f32.gmra.mrb[4].mxu0 %vm353_vm1, %v7253_v19  ;;  %8416 = vmatprep.mubr.msk.f32.mxu1 %vm353_vm1, %v6765_v20  ;;  %v225_v19 = vld [vmem:[%s9865_s28 + $0x40] sm:$0xff] }
  0x5e   : > { %8858 = vmatprep.mubr.msk.f32.mxu0 %vm353_vm1, %v7254_v21  ;;  %v7284_v20 = vld [vmem:[%s9865_s28 + $0xd41] sm:$0xff]  ;;  %v7285_v21 = vld [vmem:[%s9865_s28 + $0xd51] sm:$0xff] }
  0x60   : > { %8417 = vmatmul.mubr.msk.f32.gmra.mrb[38].mxu1 %vm353_vm1, %v6766_v22  ;;  %v227_v22 = vld [vmem:[%s9865_s28 + $0x60] sm:$0xff] }
  0x61   : > { %8859 = vmatmul.mubr.msk.f32.gmra.mrb[6].mxu0 %vm353_vm1, %v7255_v23  ;;  %8419 = vmatprep.mubr.msk.f32.mxu1 %vm353_vm1, %v6767_v24  ;;  %v7286_v23 = vld [vmem:[%s9865_s28 + $0xd61] sm:$0xff]  ;;  %v228_v24 = vld [vmem:[%s9865_s28 + $0x70] sm:$0xff] }
  0x62   : > { %8861 = vmatprep.mubr.msk.f32.mxu0 %vm353_vm1, %v7256_v25  ;;  %v7287_v25 = vld [vmem:[%s9865_s28 + $0xd71] sm:$0xff] }
  0x64   : > { %8420 = vmatmul.mubr.msk.f32.gmra.mrb[40].mxu1 %vm353_vm1, %v6768_v26  ;;  %v229_v26 = vld [vmem:[%s9865_s28 + $0x300] sm:$0xff] }
  0x65   : > { %8862 = vmatmul.mubr.msk.f32.gmra.mrb[8].mxu0 %vm353_vm1, %v7257_v27  ;;  %8422 = vmatprep.mubr.msk.f32.mxu1 %vm353_vm1, %v6769_v28  ;;  %v7288_v27 = vld [vmem:[%s9865_s28 + $0x1001] sm:$0xff]  ;;  %v230_v28 = vld [vmem:[%s9865_s28 + $0x310] sm:$0xff] }
  0x66   : > { %8864 = vmatprep.mubr.msk.f32.mxu0 %vm353_vm1, %v7258_v29  ;;  %v7289_v29 = vld [vmem:[%s9865_s28 + $0x1011] sm:$0xff] }
  0x68   : > { %8423 = vmatmul.mubr.msk.f32.gmra.mrb[42].mxu1 %vm353_vm1, %v6770_v30  ;;  %v231_v30 = vld [vmem:[%s9865_s28 + $0x320] sm:$0xff] }
  0x69   : > { %8865 = vmatmul.mubr.msk.f32.gmra.mrb[10].mxu0 %vm353_vm1, %v7259_v31  ;;  %8425 = vmatprep.mubr.msk.f32.mxu1 %vm353_vm1, %v6771_v32  ;;  %v7290_v31 = vld [vmem:[%s9865_s28 + $0x1021] sm:$0xff]  ;;  %v232_v32 = vld [vmem:[%s9865_s28 + $0x330] sm:$0xff] }
  0x6a   : > { %8867 = vmatprep.mubr.msk.f32.mxu0 %vm353_vm1, %v7260_v33  ;;  %v7291_v33 = vld [vmem:[%s9865_s28 + $0x1031] sm:$0xff] }
  0x6c   : > { %8426 = vmatmul.mubr.msk.f32.gmra.mrb[44].mxu1 %vm353_vm1, %v6772_v34  ;;  %v233_v34 = vld [vmem:[%s9865_s28 + $0x340] sm:$0xff] }
  0x6d   : > { %8868 = vmatmul.mubr.msk.f32.gmra.mrb[12].mxu0 %vm353_vm1, %v7261_v35  ;;  %8428 = vmatprep.mubr.msk.f32.mxu1 %vm353_vm1, %v6773_v36  ;;  %v7292_v35 = vld [vmem:[%s9865_s28 + $0x1041] sm:$0xff]  ;;  %v234_v36 = vld [vmem:[%s9865_s28 + $0x350] sm:$0xff] }
  0x6e   : > { %8870 = vmatprep.mubr.msk.f32.mxu0 %vm353_vm1, %v7262_v37  ;;  %v7293_v37 = vld [vmem:[%s9865_s28 + $0x1051] sm:$0xff] }
  0x70   : > { %8429 = vmatmul.mubr.msk.f32.gmra.mrb[46].mxu1 %vm353_vm1, %v6774_v38  ;;  %v235_v38 = vld [vmem:[%s9865_s28 + $0x360] sm:$0xff] }
  0x71   : > { %8871 = vmatmul.mubr.msk.f32.gmra.mrb[14].mxu0 %vm353_vm1, %v7263_v39  ;;  %8431 = vmatprep.mubr.msk.f32.mxu1 %vm353_vm1, %v6775_v40  ;;  %v7294_v39 = vld [vmem:[%s9865_s28 + $0x1061] sm:$0xff]  ;;  %v236_v40 = vld [vmem:[%s9865_s28 + $0x370] sm:$0xff] }
  0x72   : > { %8873 = vmatprep.mubr.msk.f32.mxu0 %vm353_vm1, %v7264_v41  ;;  %v7295_v41 = vld [vmem:[%s9865_s28 + $0x1071] sm:$0xff] }
  0x74   : > { %8432 = vmatmul.mubr.msk.f32.gmra.mrb[48].mxu1 %vm353_vm1, %v6776_v42  ;;  %v237_v42 = vld [vmem:[%s9865_s28 + $0x600] sm:$0xff] }
  0x75   : > { %8874 = vmatmul.mubr.msk.f32.gmra.mrb[16].mxu0 %vm353_vm1, %v7265_v43  ;;  %8434 = vmatprep.mubr.msk.f32.mxu1 %vm353_vm1, %v6777_v44  ;;  %v7296_v43 = vld [vmem:[%s9865_s28 + $0x1301] sm:$0xff]  ;;  %v238_v44 = vld [vmem:[%s9865_s28 + $0x610] sm:$0xff] }
  0x76   : > { %8876 = vmatprep.mubr.msk.f32.mxu0 %vm353_vm1, %v7266_v45  ;;  %v7297_v45 = vld [vmem:[%s9865_s28 + $0x1311] sm:$0xff] }
  0x78   : > { %8435 = vmatmul.mubr.msk.f32.gmra.mrb[50].mxu1 %vm353_vm1, %v6778_v46  ;;  %v239_v46 = vld [vmem:[%s9865_s28 + $0x620] sm:$0xff] }
  0x79   : > { %8877 = vmatmul.mubr.msk.f32.gmra.mrb[18].mxu0 %vm353_vm1, %v7267_v47  ;;  %8437 = vmatprep.mubr.msk.f32.mxu1 %vm353_vm1, %v6779_v48  ;;  %v7298_v47 = vld [vmem:[%s9865_s28 + $0x1321] sm:$0xff]  ;;  %v240_v48 = vld [vmem:[%s9865_s28 + $0x630] sm:$0xff] }
  0x7a   : > { %8879 = vmatprep.mubr.msk.f32.mxu0 %vm353_vm1, %v7268_v49  ;;  %v7299_v49 = vld [vmem:[%s9865_s28 + $0x1331] sm:$0xff] }
  0x7c   : > { %8438 = vmatmul.mubr.msk.f32.gmra.mrb[52].mxu1 %vm353_vm1, %v6780_v50  ;;  %v241_v50 = vld [vmem:[%s9865_s28 + $0x640] sm:$0xff] }
  0x7d   : > { %8880 = vmatmul.mubr.msk.f32.gmra.mrb[20].mxu0 %vm353_vm1, %v7269_v51  ;;  %8440 = vmatprep.mubr.msk.f32.mxu1 %vm353_vm1, %v6781_v52  ;;  %v7300_v51 = vld [vmem:[%s9865_s28 + $0x1341] sm:$0xff]  ;;  %v242_v52 = vld [vmem:[%s9865_s28 + $0x650] sm:$0xff] }
  0x7e   : > { %8882 = vmatprep.mubr.msk.f32.mxu0 %vm353_vm1, %v7270_v53  ;;  %v7301_v53 = vld [vmem:[%s9865_s28 + $0x1351] sm:$0xff] }
  0x80   : > { %8441 = vmatmul.mubr.msk.f32.gmra.mrb[54].mxu1 %vm353_vm1, %v6782_v54  ;;  %v243_v54 = vld [vmem:[%s9865_s28 + $0x660] sm:$0xff] }
  0x81   : > { %8883 = vmatmul.mubr.msk.f32.gmra.mrb[22].mxu0 %vm353_vm1, %v7271_v55  ;;  %8443 = vmatprep.mubr.msk.f32.mxu1 %vm353_vm1, %v6783_v56  ;;  %v7302_v55 = vld [vmem:[%s9865_s28 + $0x1361] sm:$0xff]  ;;  %v244_v56 = vld [vmem:[%s9865_s28 + $0x670] sm:$0xff] }
  0x82   : > { %8885 = vmatprep.mubr.msk.f32.mxu0 %vm353_vm1, %v7272_v57  ;;  %v7303_v57 = vld [vmem:[%s9865_s28 + $0x1371] sm:$0xff] }
  0x84   : > { %8444 = vmatmul.mubr.msk.f32.gmra.mrb[56].mxu1 %vm353_vm1, %v6784_v58  ;;  %v245_v58 = vld [vmem:[%s9865_s28 + $0x900] sm:$0xff] }
  0x85   : > { %8886 = vmatmul.mubr.msk.f32.gmra.mrb[24].mxu0 %vm353_vm1, %v7273_v59  ;;  %8446 = vmatprep.mubr.msk.f32.mxu1 %vm353_vm1, %v6785_v60  ;;  %v7304_v59 = vld [vmem:[%s9865_s28 + $0x1601] sm:$0xff]  ;;  %v246_v60 = vld [vmem:[%s9865_s28 + $0x910] sm:$0xff] }
  0x86   : > { %8888 = vmatprep.mubr.msk.f32.mxu0 %vm353_vm1, %v7274_v61  ;;  %v7305_v61 = vld [vmem:[%s9865_s28 + $0x1611] sm:$0xff] }
  0x88   : > { %8447 = vmatmul.mubr.msk.f32.gmra.mrb[58].mxu1 %vm353_vm1, %v6786_v62  ;;  %v247_v62 = vld [vmem:[%s9865_s28 + $0x920] sm:$0xff] }
  0x89   : > { %8889 = vmatmul.mubr.msk.f32.gmra.mrb[26].mxu0 %vm353_vm1, %v7275_v63  ;;  %8449 = vmatprep.mubr.msk.f32.mxu1 %vm353_vm1, %v6787_v0  ;;  %v7306_v63 = vld [vmem:[%s9865_s28 + $0x1621] sm:$0xff]  ;;  %v248_v0 = vld [vmem:[%s9865_s28 + $0x930] sm:$0xff] }
  0x8a   : > { %8891 = vmatprep.mubr.msk.f32.mxu0 %vm353_vm1, %v7276_v1  ;;  %v7307_v1 = vld [vmem:[%s9865_s28 + $0x1631] sm:$0xff] }
  0x8c   : > { %8450 = vmatmul.mubr.msk.f32.gmra.mrb[60].mxu1 %vm353_vm1, %v6788_v2  ;;  %v249_v2 = vld [vmem:[%s9865_s28 + $0x940] sm:$0xff] }
  0x8d   : > { %8892 = vmatmul.mubr.msk.f32.gmra.mrb[28].mxu0 %vm353_vm1, %v7277_v3  ;;  %8452 = vmatprep.mubr.msk.f32.mxu1 %vm353_vm1, %v6789_v4  ;;  %v7308_v3 = vld [vmem:[%s9865_s28 + $0x1641] sm:$0xff]  ;;  %v250_v4 = vld [vmem:[%s9865_s28 + $0x950] sm:$0xff] }
  0x8e   : > { %8894 = vmatprep.mubr.msk.f32.mxu0 %vm353_vm1, %v7278_v5  ;;  %v7309_v5 = vld [vmem:[%s9865_s28 + $0x1651] sm:$0xff] }
  0x90   : > { %8453 = vmatmul.mubr.msk.f32.gmra.mrb[62].mxu1 %vm353_vm1, %v6790_v6  ;;  %v251_v6 = vld [vmem:[%s9865_s28 + $0x960] sm:$0xff] }
  0x91   : > { %8895 = vmatmul.mubr.msk.f32.gmra.mrb[30].mxu0 %vm353_vm1, %v7279_v7  ;;  %8457 = vmatprep.mubr.msk.f32.mxu1 %vm353_vm1, %v221_v8  ;;  %v7310_v7 = vld [vmem:[%s9865_s28 + $0x1661] sm:$0xff]  ;;  %v252_v8 = vld [vmem:[%s9865_s28 + $0x970] sm:$0xff] }
  0x92   : > { %8897 = vmatprep.mubr.msk.f32.mxu0 %vm353_vm1, %v7280_v9  ;;  %v7311_v9 = vld [vmem:[%s9865_s28 + $0x1671] sm:$0xff] }
  0x94   : > { %8458 = vmatmul.mubr.msk.f32.vlgmr.msra.gmra.mrb[0].mxu1 %vm353_vm1, %v222_v12  ;;  %v253_v12 = vld [vmem:[%s9865_s28 + $0xc00] sm:$0xff] }
  0x95   : > { %8898 = vmatmul.mubr.msk.f32.gmra.mrb[32].mxu0 %vm353_vm1, %v7281_v13  ;;  %8554 = vmatpush3.msk.msra.mxu1 %vm546_vm0, %v9885_v11  ;;  %v226_v11 = vld [vmem:[%s9865_s28 + $0x50] sm:$0xff]  ;;  %v7378_v13 = vld [vmem:[%s9865_s28 + $0x200] sm:$0xff] }
  0x96   : > { %8460 = vmatprep.mubr.msk.f32.mxu1 %vm353_vm1, %v223_v15  ;;  %8900 = vmatprep.mubr.msk.f32.mxu0 %vm353_vm1, %v7282_v16  ;;  %v254_v15 = vld [vmem:[%s9865_s28 + $0xc10] sm:$0xff] }
  0x97   : > { %8651 = vmatprep.subr.msk.mxu1 %vm546_vm0, %v10159_v17  ;;  %v7379_v16 = vld [vmem:[%s9865_s28 + $0x210] sm:$0xff] }
  0x98   : > { %8461 = vmatmul.mubr.msk.f32.gmra.mrb[2].mxu1 %vm353_vm1, %v224_v18  ;;  %v255_v18 = vld [vmem:[%s9865_s28 + $0xc20] sm:$0xff] }
  0x99   : > { %8901 = vmatmul.mubr.msk.f32.gmra.mrb[34].mxu0 %vm353_vm1, %v7283_v10  ;;  %8463 = vmatprep.mubr.msk.f32.mxu1 %vm353_vm1, %v225_v19  ;;  %v7380_v10 = vld [vmem:[%s9865_s28 + $0x220] sm:$0xff] }
  0x9a   : > { %8903 = vmatprep.mubr.msk.f32.mxu0 %vm353_vm1, %v7284_v20  ;;  %v10296_v19 = vld [vmem:[%s11354_s1 + $0x20] sm:$0xf]  ;;  %v256_v20 = vld [vmem:[%s9865_s28 + $0xc30] sm:$0xff] }
  0x9c   : > { %8464 = vmatmul.mubr.msk.f32.gmra.mrb[4].mxu1 %vm353_vm1, %v226_v11  ;;  %v7381_v11 = vld [vmem:[%s9865_s28 + $0x230] sm:$0xff] }
  0x9d   : > { %8904 = vmatmul.mubr.msk.f32.gmra.mrb[36].mxu0 %vm353_vm1, %v7285_v21  ;;  %8466 = vmatprep.mubr.msk.f32.mxu1 %vm353_vm1, %v227_v22  ;;  %v257_v21 = vld [vmem:[%s9865_s28 + $0xc40] sm:$0xff] }
  0x9e   : > { %8906 = vmatprep.mubr.msk.f32.mxu0 %vm353_vm1, %v7286_v23  ;;  %v7382_v22 = vld [vmem:[%s9865_s28 + $0x240] sm:$0xff]  ;;  %v7383_v23 = vld [vmem:[%s9865_s28 + $0x250] sm:$0xff] }
  0xa0   : > { %8467 = vmatmul.mubr.msk.f32.gmra.mrb[6].mxu1 %vm353_vm1, %v228_v24  ;;  %v259_v24 = vld [vmem:[%s9865_s28 + $0xc60] sm:$0xff] }
  0xa1   : > { %8907 = vmatmul.mubr.msk.f32.gmra.mrb[38].mxu0 %vm353_vm1, %v7287_v25  ;;  %8469 = vmatprep.mubr.msk.f32.mxu1 %vm353_vm1, %v229_v26  ;;  %v7384_v25 = vld [vmem:[%s9865_s28 + $0x260] sm:$0xff]  ;;  %v260_v26 = vld [vmem:[%s9865_s28 + $0xc70] sm:$0xff] }
  0xa2   : > { %8909 = vmatprep.mubr.msk.f32.mxu0 %vm353_vm1, %v7288_v27  ;;  %v7385_v27 = vld [vmem:[%s9865_s28 + $0x270] sm:$0xff] }
  0xa4   : > { %8470 = vmatmul.mubr.msk.f32.gmra.mrb[8].mxu1 %vm353_vm1, %v230_v28  ;;  %v261_v28 = vld [vmem:[%s9865_s28 + $0xf00] sm:$0xff] }
  0xa5   : > { %8910 = vmatmul.mubr.msk.f32.gmra.mrb[40].mxu0 %vm353_vm1, %v7289_v29  ;;  %8472 = vmatprep.mubr.msk.f32.mxu1 %vm353_vm1, %v231_v30  ;;  %v7386_v29 = vld [vmem:[%s9865_s28 + $0x500] sm:$0xff]  ;;  %v262_v30 = vld [vmem:[%s9865_s28 + $0xf10] sm:$0xff] }
  0xa6   : > { %8912 = vmatprep.mubr.msk.f32.mxu0 %vm353_vm1, %v7290_v31  ;;  %v7387_v31 = vld [vmem:[%s9865_s28 + $0x510] sm:$0xff] }
  0xa8   : > { %8473 = vmatmul.mubr.msk.f32.gmra.mrb[10].mxu1 %vm353_vm1, %v232_v32  ;;  %v263_v32 = vld [vmem:[%s9865_s28 + $0xf20] sm:$0xff] }
  0xa9   : > { %8913 = vmatmul.mubr.msk.f32.gmra.mrb[42].mxu0 %vm353_vm1, %v7291_v33  ;;  %8475 = vmatprep.mubr.msk.f32.mxu1 %vm353_vm1, %v233_v34  ;;  %v7388_v33 = vld [vmem:[%s9865_s28 + $0x520] sm:$0xff]  ;;  %v264_v34 = vld [vmem:[%s9865_s28 + $0xf30] sm:$0xff] }
  0xaa   : > { %8915 = vmatprep.mubr.msk.f32.mxu0 %vm353_vm1, %v7292_v35  ;;  %v7389_v35 = vld [vmem:[%s9865_s28 + $0x530] sm:$0xff] }
  0xac   : > { %8476 = vmatmul.mubr.msk.f32.gmra.mrb[12].mxu1 %vm353_vm1, %v234_v36  ;;  %v265_v36 = vld [vmem:[%s9865_s28 + $0xf40] sm:$0xff] }
  0xad   : > { %8916 = vmatmul.mubr.msk.f32.gmra.mrb[44].mxu0 %vm353_vm1, %v7293_v37  ;;  %8478 = vmatprep.mubr.msk.f32.mxu1 %vm353_vm1, %v235_v38  ;;  %v7390_v37 = vld [vmem:[%s9865_s28 + $0x540] sm:$0xff]  ;;  %v266_v38 = vld [vmem:[%s9865_s28 + $0xf50] sm:$0xff] }
  0xae   : > { %8918 = vmatprep.mubr.msk.f32.mxu0 %vm353_vm1, %v7294_v39  ;;  %v7391_v39 = vld [vmem:[%s9865_s28 + $0x550] sm:$0xff] }
  0xb0   : > { %8479 = vmatmul.mubr.msk.f32.gmra.mrb[14].mxu1 %vm353_vm1, %v236_v40  ;;  %v267_v40 = vld [vmem:[%s9865_s28 + $0xf60] sm:$0xff] }
  0xb1   : > { %8919 = vmatmul.mubr.msk.f32.gmra.mrb[46].mxu0 %vm353_vm1, %v7295_v41  ;;  %8481 = vmatprep.mubr.msk.f32.mxu1 %vm353_vm1, %v237_v42  ;;  %v7392_v41 = vld [vmem:[%s9865_s28 + $0x560] sm:$0xff]  ;;  %v268_v42 = vld [vmem:[%s9865_s28 + $0xf70] sm:$0xff] }
  0xb2   : > { %8921 = vmatprep.mubr.msk.f32.mxu0 %vm353_vm1, %v7296_v43  ;;  %v7393_v43 = vld [vmem:[%s9865_s28 + $0x570] sm:$0xff] }
  0xb4   : > { %8482 = vmatmul.mubr.msk.f32.gmra.mrb[16].mxu1 %vm353_vm1, %v238_v44  ;;  %v269_v44 = vld [vmem:[%s9865_s28 + $0x1200] sm:$0xff] }
  0xb5   : > { %8922 = vmatmul.mubr.msk.f32.gmra.mrb[48].mxu0 %vm353_vm1, %v7297_v45  ;;  %8484 = vmatprep.mubr.msk.f32.mxu1 %vm353_vm1, %v239_v46  ;;  %v7394_v45 = vld [vmem:[%s9865_s28 + $0x800] sm:$0xff]  ;;  %v270_v46 = vld [vmem:[%s9865_s28 + $0x1210] sm:$0xff] }
  0xb6   : > { %8924 = vmatprep.mubr.msk.f32.mxu0 %vm353_vm1, %v7298_v47  ;;  %v7395_v47 = vld [vmem:[%s9865_s28 + $0x810] sm:$0xff] }
  0xb8   : > { %8485 = vmatmul.mubr.msk.f32.gmra.mrb[18].mxu1 %vm353_vm1, %v240_v48  ;;  %v271_v48 = vld [vmem:[%s9865_s28 + $0x1220] sm:$0xff] }
  0xb9   : > { %8925 = vmatmul.mubr.msk.f32.gmra.mrb[50].mxu0 %vm353_vm1, %v7299_v49  ;;  %8487 = vmatprep.mubr.msk.f32.mxu1 %vm353_vm1, %v241_v50  ;;  %v7396_v49 = vld [vmem:[%s9865_s28 + $0x820] sm:$0xff]  ;;  %v272_v50 = vld [vmem:[%s9865_s28 + $0x1230] sm:$0xff] }
  0xba   : > { %8927 = vmatprep.mubr.msk.f32.mxu0 %vm353_vm1, %v7300_v51  ;;  %v7397_v51 = vld [vmem:[%s9865_s28 + $0x830] sm:$0xff] }
  0xbc   : > { %8488 = vmatmul.mubr.msk.f32.gmra.mrb[20].mxu1 %vm353_vm1, %v242_v52  ;;  %v273_v52 = vld [vmem:[%s9865_s28 + $0x1240] sm:$0xff] }
  0xbd   : > { %8928 = vmatmul.mubr.msk.f32.gmra.mrb[52].mxu0 %vm353_vm1, %v7301_v53  ;;  %8490 = vmatprep.mubr.msk.f32.mxu1 %vm353_vm1, %v243_v54  ;;  %v7398_v53 = vld [vmem:[%s9865_s28 + $0x840] sm:$0xff]  ;;  %v274_v54 = vld [vmem:[%s9865_s28 + $0x1250] sm:$0xff] }
  0xbe   : > { %8930 = vmatprep.mubr.msk.f32.mxu0 %vm353_vm1, %v7302_v55  ;;  %v7399_v55 = vld [vmem:[%s9865_s28 + $0x850] sm:$0xff] }
  0xc0   : > { %8491 = vmatmul.mubr.msk.f32.gmra.mrb[22].mxu1 %vm353_vm1, %v244_v56  ;;  %v275_v56 = vld [vmem:[%s9865_s28 + $0x1260] sm:$0xff] }
  0xc1   : > { %8931 = vmatmul.mubr.msk.f32.gmra.mrb[54].mxu0 %vm353_vm1, %v7303_v57  ;;  %8493 = vmatprep.mubr.msk.f32.mxu1 %vm353_vm1, %v245_v58  ;;  %v7400_v57 = vld [vmem:[%s9865_s28 + $0x860] sm:$0xff]  ;;  %v276_v58 = vld [vmem:[%s9865_s28 + $0x1270] sm:$0xff] }
  0xc2   : > { %8933 = vmatprep.mubr.msk.f32.mxu0 %vm353_vm1, %v7304_v59  ;;  %v7401_v59 = vld [vmem:[%s9865_s28 + $0x870] sm:$0xff] }
  0xc4   : > { %8494 = vmatmul.mubr.msk.f32.gmra.mrb[24].mxu1 %vm353_vm1, %v246_v60  ;;  %v277_v60 = vld [vmem:[%s9865_s28 + $0x1500] sm:$0xff] }
  0xc5   : > { %8934 = vmatmul.mubr.msk.f32.gmra.mrb[56].mxu0 %vm353_vm1, %v7305_v61  ;;  %8496 = vmatprep.mubr.msk.f32.mxu1 %vm353_vm1, %v247_v62  ;;  %v7402_v61 = vld [vmem:[%s9865_s28 + $0xb00] sm:$0xff]  ;;  %v278_v62 = vld [vmem:[%s9865_s28 + $0x1510] sm:$0xff] }
  0xc6   : > { %8936 = vmatprep.mubr.msk.f32.mxu0 %vm353_vm1, %v7306_v63  ;;  %v7403_v63 = vld [vmem:[%s9865_s28 + $0xb10] sm:$0xff] }
  0xc8   : > { %8497 = vmatmul.mubr.msk.f32.gmra.mrb[26].mxu1 %vm353_vm1, %v248_v0  ;;  %v279_v0 = vld [vmem:[%s9865_s28 + $0x1520] sm:$0xff] }
  0xc9   : > { %8937 = vmatmul.mubr.msk.f32.gmra.mrb[58].mxu0 %vm353_vm1, %v7307_v1  ;;  %8499 = vmatprep.mubr.msk.f32.mxu1 %vm353_vm1, %v249_v2  ;;  %v7404_v1 = vld [vmem:[%s9865_s28 + $0xb20] sm:$0xff]  ;;  %v280_v2 = vld [vmem:[%s9865_s28 + $0x1530] sm:$0xff] }
  0xca   : > { %8939 = vmatprep.mubr.msk.f32.mxu0 %vm353_vm1, %v7308_v3  ;;  %v7405_v3 = vld [vmem:[%s9865_s28 + $0xb30] sm:$0xff] }
  0xcc   : > { %8500 = vmatmul.mubr.msk.f32.gmra.mrb[28].mxu1 %vm353_vm1, %v250_v4  ;;  %v281_v4 = vld [vmem:[%s9865_s28 + $0x1540] sm:$0xff] }
  0xcd   : > { %8940 = vmatmul.mubr.msk.f32.gmra.mrb[60].mxu0 %vm353_vm1, %v7309_v5  ;;  %8502 = vmatprep.mubr.msk.f32.mxu1 %vm353_vm1, %v251_v6  ;;  %v7406_v5 = vld [vmem:[%s9865_s28 + $0xb40] sm:$0xff]  ;;  %v282_v6 = vld [vmem:[%s9865_s28 + $0x1550] sm:$0xff] }
  0xce   : > { %8942 = vmatprep.mubr.msk.f32.mxu0 %vm353_vm1, %v7310_v7  ;;  %v7407_v7 = vld [vmem:[%s9865_s28 + $0xb50] sm:$0xff] }
  0xd0   : > { %8503 = vmatmul.mubr.msk.f32.gmra.mrb[30].mxu1 %vm353_vm1, %v252_v8  ;;  %v283_v8 = vld [vmem:[%s9865_s28 + $0x1560] sm:$0xff] }
  0xd1   : > { %8943 = vmatmul.mubr.msk.f32.gmra.mrb[62].mxu0 %vm353_vm1, %v7311_v9  ;;  %8505 = vmatprep.mubr.msk.f32.mxu1 %vm353_vm1, %v253_v12  ;;  %v7408_v9 = vld [vmem:[%s9865_s28 + $0xb60] sm:$0xff]  ;;  %v284_v12 = vld [vmem:[%s9865_s28 + $0x1570] sm:$0xff] }
  0xd2   : > { %8947 = vmatprep.mubr.msk.f32.mxu0 %vm353_vm1, %v7378_v13  ;;  %v7409_v13 = vld [vmem:[%s9865_s28 + $0xb70] sm:$0xff] }
  0xd4   : > { %8506 = vmatmul.mubr.msk.f32.gmra.mrb[32].mxu1 %vm353_vm1, %v254_v15  ;;  %v1515_v15 = vld [vmem:[%s9865_s28 + $0x1] sm:$0xff] }
  0xd5   : > { %8948 = vmatmul.mubr.msk.f32.vlgmr.msra.gmra.mrb[0].mxu0 %vm353_vm1, %v7379_v16  ;;  %8508 = vmatprep.mubr.msk.f32.mxu1 %vm353_vm1, %v255_v18  ;;  %v7410_v16 = vld [vmem:[%s9865_s28 + $0xe00] sm:$0xff]  ;;  %v1516_v18 = vld [vmem:[%s9865_s28 + $0x11] sm:$0xff] }
  0xd6   : > { %9044 = vmatpush3.msk.msra.mxu0 %vm546_vm0, %v10022_v14  ;;  %8950 = vmatprep.mubr.msk.f32.mxu0 %vm353_vm1, %v7380_v10  ;;  %v258_v14 = vld [vmem:[%s9865_s28 + $0xc50] sm:$0xff] }
  0xd7   : > { %9141 = vmatprep.subr.msk.mxu0 %vm546_vm0, %v10296_v19  ;;  %v7411_v10 = vld [vmem:[%s9865_s28 + $0xe10] sm:$0xff] }
  0xd8   : > { %8509 = vmatmul.mubr.msk.f32.gmra.mrb[34].mxu1 %vm353_vm1, %v256_v20  ;;  %v1517_v20 = vld [vmem:[%s9865_s28 + $0x21] sm:$0xff] }
  0xd9   : > { %8951 = vmatmul.mubr.msk.f32.gmra.mrb[2].mxu0 %vm353_vm1, %v7381_v11  ;;  %8511 = vmatprep.mubr.msk.f32.mxu1 %vm353_vm1, %v257_v21  ;;  %v7412_v11 = vld [vmem:[%s9865_s28 + $0xe20] sm:$0xff]  ;;  %v1518_v21 = vld [vmem:[%s9865_s28 + $0x31] sm:$0xff] }
  0xda   : > { %8953 = vmatprep.mubr.msk.f32.mxu0 %vm353_vm1, %v7382_v22  ;;  %v7413_v22 = vld [vmem:[%s9865_s28 + $0xe30] sm:$0xff] }
  0xdc   : > { %8512 = vmatmul.mubr.msk.f32.gmra.mrb[36].mxu1 %vm353_vm1, %v258_v14  ;;  %v1519_v14 = vld [vmem:[%s9865_s28 + $0x41] sm:$0xff] }
  0xdd   : > { %8954 = vmatmul.mubr.msk.f32.gmra.mrb[4].mxu0 %vm353_vm1, %v7383_v23  ;;  %8514 = vmatprep.mubr.msk.f32.mxu1 %vm353_vm1, %v259_v24  ;;  %v7414_v23 = vld [vmem:[%s9865_s28 + $0xe40] sm:$0xff]  ;;  %v10443_v24 = vld [vmem:[%s11354_s1 + $0x10] sm:$0xf] }
  0xde   : > { %8956 = vmatprep.mubr.msk.f32.mxu0 %vm353_vm1, %v7384_v25  ;;  %v7415_v25 = vld [vmem:[%s9865_s28 + $0xe50] sm:$0xff] }
  0xe0   : > { %8515 = vmatmul.mubr.msk.f32.gmra.mrb[38].mxu1 %vm353_vm1, %v260_v26  ;;  %v1521_v26 = vld [vmem:[%s9865_s28 + $0x61] sm:$0xff] }
  0xe1   : > { %8957 = vmatmul.mubr.msk.f32.gmra.mrb[6].mxu0 %vm353_vm1, %v7385_v27  ;;  %8517 = vmatprep.mubr.msk.f32.mxu1 %vm353_vm1, %v261_v28  ;;  %v7416_v27 = vld [vmem:[%s9865_s28 + $0xe60] sm:$0xff]  ;;  %v1522_v28 = vld [vmem:[%s9865_s28 + $0x71] sm:$0xff] }
  0xe2   : > { %8959 = vmatprep.mubr.msk.f32.mxu0 %vm353_vm1, %v7386_v29  ;;  %v7417_v29 = vld [vmem:[%s9865_s28 + $0xe70] sm:$0xff] }
  0xe4   : > { %8518 = vmatmul.mubr.msk.f32.gmra.mrb[40].mxu1 %vm353_vm1, %v262_v30  ;;  %v1523_v30 = vld [vmem:[%s9865_s28 + $0x301] sm:$0xff] }
  0xe5   : > { %8960 = vmatmul.mubr.msk.f32.gmra.mrb[8].mxu0 %vm353_vm1, %v7387_v31  ;;  %8520 = vmatprep.mubr.msk.f32.mxu1 %vm353_vm1, %v263_v32  ;;  %v7418_v31 = vld [vmem:[%s9865_s28 + $0x1100] sm:$0xff]  ;;  %v1524_v32 = vld [vmem:[%s9865_s28 + $0x311] sm:$0xff] }
  0xe6   : > { %8962 = vmatprep.mubr.msk.f32.mxu0 %vm353_vm1, %v7388_v33  ;;  %v7419_v33 = vld [vmem:[%s9865_s28 + $0x1110] sm:$0xff] }
  0xe8   : > { %8521 = vmatmul.mubr.msk.f32.gmra.mrb[42].mxu1 %vm353_vm1, %v264_v34  ;;  %v1525_v34 = vld [vmem:[%s9865_s28 + $0x321] sm:$0xff] }
  0xe9   : > { %8963 = vmatmul.mubr.msk.f32.gmra.mrb[10].mxu0 %vm353_vm1, %v7389_v35  ;;  %8523 = vmatprep.mubr.msk.f32.mxu1 %vm353_vm1, %v265_v36  ;;  %v7420_v35 = vld [vmem:[%s9865_s28 + $0x1120] sm:$0xff]  ;;  %v1526_v36 = vld [vmem:[%s9865_s28 + $0x331] sm:$0xff] }
  0xea   : > { %8965 = vmatprep.mubr.msk.f32.mxu0 %vm353_vm1, %v7390_v37  ;;  %v7421_v37 = vld [vmem:[%s9865_s28 + $0x1130] sm:$0xff] }
  0xec   : > { %8524 = vmatmul.mubr.msk.f32.gmra.mrb[44].mxu1 %vm353_vm1, %v266_v38  ;;  %v1527_v38 = vld [vmem:[%s9865_s28 + $0x341] sm:$0xff] }
  0xed   : > { %8966 = vmatmul.mubr.msk.f32.gmra.mrb[12].mxu0 %vm353_vm1, %v7391_v39  ;;  %8526 = vmatprep.mubr.msk.f32.mxu1 %vm353_vm1, %v267_v40  ;;  %v7422_v39 = vld [vmem:[%s9865_s28 + $0x1140] sm:$0xff]  ;;  %v1528_v40 = vld [vmem:[%s9865_s28 + $0x351] sm:$0xff] }
  0xee   : > { %8968 = vmatprep.mubr.msk.f32.mxu0 %vm353_vm1, %v7392_v41  ;;  %v7423_v41 = vld [vmem:[%s9865_s28 + $0x1150] sm:$0xff] }
  0xf0   : > { %8527 = vmatmul.mubr.msk.f32.gmra.mrb[46].mxu1 %vm353_vm1, %v268_v42  ;;  %v1529_v42 = vld [vmem:[%s9865_s28 + $0x361] sm:$0xff] }
  0xf1   : > { %8969 = vmatmul.mubr.msk.f32.gmra.mrb[14].mxu0 %vm353_vm1, %v7393_v43  ;;  %8529 = vmatprep.mubr.msk.f32.mxu1 %vm353_vm1, %v269_v44  ;;  %v7424_v43 = vld [vmem:[%s9865_s28 + $0x1160] sm:$0xff]  ;;  %v1530_v44 = vld [vmem:[%s9865_s28 + $0x371] sm:$0xff] }
  0xf2   : > { %8971 = vmatprep.mubr.msk.f32.mxu0 %vm353_vm1, %v7394_v45  ;;  %v7425_v45 = vld [vmem:[%s9865_s28 + $0x1170] sm:$0xff] }
  0xf4   : > { %8530 = vmatmul.mubr.msk.f32.gmra.mrb[48].mxu1 %vm353_vm1, %v270_v46  ;;  %v1531_v46 = vld [vmem:[%s9865_s28 + $0x601] sm:$0xff] }
  0xf5   : > { %8972 = vmatmul.mubr.msk.f32.gmra.mrb[16].mxu0 %vm353_vm1, %v7395_v47  ;;  %8532 = vmatprep.mubr.msk.f32.mxu1 %vm353_vm1, %v271_v48  ;;  %v7426_v47 = vld [vmem:[%s9865_s28 + $0x1400] sm:$0xff]  ;;  %v1532_v48 = vld [vmem:[%s9865_s28 + $0x611] sm:$0xff] }
  0xf6   : > { %8974 = vmatprep.mubr.msk.f32.mxu0 %vm353_vm1, %v7396_v49  ;;  %v7427_v49 = vld [vmem:[%s9865_s28 + $0x1410] sm:$0xff] }
  0xf8   : > { %8533 = vmatmul.mubr.msk.f32.gmra.mrb[50].mxu1 %vm353_vm1, %v272_v50  ;;  %v1533_v50 = vld [vmem:[%s9865_s28 + $0x621] sm:$0xff] }
  0xf9   : > { %8975 = vmatmul.mubr.msk.f32.gmra.mrb[18].mxu0 %vm353_vm1, %v7397_v51  ;;  %8535 = vmatprep.mubr.msk.f32.mxu1 %vm353_vm1, %v273_v52  ;;  %v7428_v51 = vld [vmem:[%s9865_s28 + $0x1420] sm:$0xff]  ;;  %v1534_v52 = vld [vmem:[%s9865_s28 + $0x631] sm:$0xff] }
  0xfa   : > { %8977 = vmatprep.mubr.msk.f32.mxu0 %vm353_vm1, %v7398_v53  ;;  %v7429_v53 = vld [vmem:[%s9865_s28 + $0x1430] sm:$0xff] }
  0xfc   : > { %8536 = vmatmul.mubr.msk.f32.gmra.mrb[52].mxu1 %vm353_vm1, %v274_v54  ;;  %v1535_v54 = vld [vmem:[%s9865_s28 + $0x641] sm:$0xff] }
  0xfd   : > { %8978 = vmatmul.mubr.msk.f32.gmra.mrb[20].mxu0 %vm353_vm1, %v7399_v55  ;;  %8538 = vmatprep.mubr.msk.f32.mxu1 %vm353_vm1, %v275_v56  ;;  %v7430_v55 = vld [vmem:[%s9865_s28 + $0x1440] sm:$0xff]  ;;  %v1536_v56 = vld [vmem:[%s9865_s28 + $0x651] sm:$0xff] }
  0xfe   : > { %8980 = vmatprep.mubr.msk.f32.mxu0 %vm353_vm1, %v7400_v57  ;;  %v7431_v57 = vld [vmem:[%s9865_s28 + $0x1450] sm:$0xff] }
 0x100   : > { %8539 = vmatmul.mubr.msk.f32.gmra.mrb[54].mxu1 %vm353_vm1, %v276_v58  ;;  %v1537_v58 = vld [vmem:[%s9865_s28 + $0x661] sm:$0xff] }
 0x101   : > { %8981 = vmatmul.mubr.msk.f32.gmra.mrb[22].mxu0 %vm353_vm1, %v7401_v59  ;;  %8541 = vmatprep.mubr.msk.f32.mxu1 %vm353_vm1, %v277_v60  ;;  %v7432_v59 = vld [vmem:[%s9865_s28 + $0x1460] sm:$0xff]  ;;  %v1538_v60 = vld [vmem:[%s9865_s28 + $0x671] sm:$0xff] }
 0x102   : > { %8983 = vmatprep.mubr.msk.f32.mxu0 %vm353_vm1, %v7402_v61  ;;  %v7433_v61 = vld [vmem:[%s9865_s28 + $0x1470] sm:$0xff] }
 0x104   : > { %8542 = vmatmul.mubr.msk.f32.gmra.mrb[56].mxu1 %vm353_vm1, %v278_v62  ;;  %v1539_v62 = vld [vmem:[%s9865_s28 + $0x901] sm:$0xff] }
 0x105   : > { %8984 = vmatmul.mubr.msk.f32.gmra.mrb[24].mxu0 %vm353_vm1, %v7403_v63  ;;  %8544 = vmatprep.mubr.msk.f32.mxu1 %vm353_vm1, %v279_v0  ;;  %v7434_v63 = vld [vmem:[%s9865_s28 + $0x1700] sm:$0xff]  ;;  %v1540_v0 = vld [vmem:[%s9865_s28 + $0x911] sm:$0xff] }
 0x106   : > { %8986 = vmatprep.mubr.msk.f32.mxu0 %vm353_vm1, %v7404_v1  ;;  %v7435_v1 = vld [vmem:[%s9865_s28 + $0x1710] sm:$0xff] }
 0x108   : > { %8545 = vmatmul.mubr.msk.f32.gmra.mrb[58].mxu1 %vm353_vm1, %v280_v2  ;;  %v1541_v2 = vld [vmem:[%s9865_s28 + $0x921] sm:$0xff] }
 0x109   : > { %8987 = vmatmul.mubr.msk.f32.gmra.mrb[26].mxu0 %vm353_vm1, %v7405_v3  ;;  %8547 = vmatprep.mubr.msk.f32.mxu1 %vm353_vm1, %v281_v4  ;;  %v7436_v3 = vld [vmem:[%s9865_s28 + $0x1720] sm:$0xff]  ;;  %v1542_v4 = vld [vmem:[%s9865_s28 + $0x931] sm:$0xff] }
 0x10a   : > { %8989 = vmatprep.mubr.msk.f32.mxu0 %vm353_vm1, %v7406_v5  ;;  %v7437_v5 = vld [vmem:[%s9865_s28 + $0x1730] sm:$0xff] }
 0x10c   : > { %8548 = vmatmul.mubr.msk.f32.gmra.mrb[60].mxu1 %vm353_vm1, %v282_v6  ;;  %v1543_v6 = vld [vmem:[%s9865_s28 + $0x941] sm:$0xff] }
 0x10d   : > { %8990 = vmatmul.mubr.msk.f32.gmra.mrb[28].mxu0 %vm353_vm1, %v7407_v7  ;;  %8550 = vmatprep.mubr.msk.f32.mxu1 %vm353_vm1, %v283_v8  ;;  %v7438_v7 = vld [vmem:[%s9865_s28 + $0x1740] sm:$0xff]  ;;  %v1544_v8 = vld [vmem:[%s9865_s28 + $0x951] sm:$0xff] }
 0x10e   : > { %8992 = vmatprep.mubr.msk.f32.mxu0 %vm353_vm1, %v7408_v9  ;;  %v7439_v9 = vld [vmem:[%s9865_s28 + $0x1750] sm:$0xff] }
 0x110   : > { %8551 = vmatmul.mubr.msk.f32.gmra.mrb[62].mxu1 %vm353_vm1, %v284_v12  ;;  %v1545_v12 = vld [vmem:[%s9865_s28 + $0x961] sm:$0xff] }
 0x111   : > { %8993 = vmatmul.mubr.msk.f32.gmra.mrb[30].mxu0 %vm353_vm1, %v7409_v13  ;;  %8555 = vmatprep.mubr.msk.f32.mxu1 %vm353_vm1, %v1515_v15  ;;  %v7440_v13 = vld [vmem:[%s9865_s28 + $0x1760] sm:$0xff]  ;;  %v1546_v15 = vld [vmem:[%s9865_s28 + $0x971] sm:$0xff] }
 0x112   : > { %8995 = vmatprep.mubr.msk.f32.mxu0 %vm353_vm1, %v7410_v16  ;;  %v7441_v16 = vld [vmem:[%s9865_s28 + $0x1770] sm:$0xff] }
 0x114   : > { %8556 = vmatmul.mubr.msk.f32.vlgmr.msra.gmra.mrb[0].mxu1 %vm353_vm1, %v1516_v18  ;;  %v1547_v18 = vld [vmem:[%s9865_s28 + $0xc01] sm:$0xff] }
 0x115   : > { %8996 = vmatmul.mubr.msk.f32.gmra.mrb[32].mxu0 %vm353_vm1, %v7411_v10  ;;  %8652 = vmatpush3.msk.msra.mxu1 %vm546_vm0, %v10159_v17  ;;  %v1520_v17 = vld [vmem:[%s9865_s28 + $0x51] sm:$0xff]  ;;  %v7508_v10 = vld [vmem:[%s9865_s28 + $0x280] sm:$0xff] }
 0x116   : > { %8558 = vmatprep.mubr.msk.f32.mxu1 %vm353_vm1, %v1517_v20  ;;  %8998 = vmatprep.mubr.msk.f32.mxu0 %vm353_vm1, %v7412_v11  ;;  %v1548_v20 = vld [vmem:[%s9865_s28 + $0xc11] sm:$0xff] }
 0x117   : > { %9239 = vmatprep.subr.msk.mxu1 %vm546_vm0, %v10443_v24  ;;  %v7509_v11 = vld [vmem:[%s9865_s28 + $0x290] sm:$0xff] }
 0x118   : > { %8559 = vmatmul.mubr.msk.f32.gmra.mrb[2].mxu1 %vm353_vm1, %v1518_v21  ;;  %v1549_v21 = vld [vmem:[%s9865_s28 + $0xc21] sm:$0xff] }
 0x119   : > { %8999 = vmatmul.mubr.msk.f32.gmra.mrb[34].mxu0 %vm353_vm1, %v7413_v22  ;;  %8561 = vmatprep.mubr.msk.f32.mxu1 %vm353_vm1, %v1519_v14  ;;  %v7510_v22 = vld [vmem:[%s9865_s28 + $0x2a0] sm:$0xff]  ;;  %v1550_v14 = vld [vmem:[%s9865_s28 + $0xc31] sm:$0xff] }
 0x11a   : > { %9001 = vmatprep.mubr.msk.f32.mxu0 %vm353_vm1, %v7414_v23  ;;  %v7511_v23 = vld [vmem:[%s9865_s28 + $0x2b0] sm:$0xff] }
 0x11c   : > { %8562 = vmatmul.mubr.msk.f32.gmra.mrb[4].mxu1 %vm353_vm1, %v1520_v17  ;;  %v1551_v17 = vld [vmem:[%s9865_s28 + $0xc41] sm:$0xff] }
 0x11d   : > { %9002 = vmatmul.mubr.msk.f32.gmra.mrb[36].mxu0 %vm353_vm1, %v7415_v25  ;;  %8564 = vmatprep.mubr.msk.f32.mxu1 %vm353_vm1, %v1521_v26  ;;  %v7512_v25 = vld [vmem:[%s9865_s28 + $0x2c0] sm:$0xff]  ;;  %v7513_v26 = vld [vmem:[%s9865_s28 + $0x2d0] sm:$0xff] }
 0x11e   : > { %9004 = vmatprep.mubr.msk.f32.mxu0 %vm353_vm1, %v7416_v27  ;;  %v1553_v27 = vld [vmem:[%s9865_s28 + $0xc61] sm:$0xff] }
 0x120   : > { %8565 = vmatmul.mubr.msk.f32.gmra.mrb[6].mxu1 %vm353_vm1, %v1522_v28  ;;  %v7514_v28 = vld [vmem:[%s9865_s28 + $0x2e0] sm:$0xff] }
 0x121   : > { %9005 = vmatmul.mubr.msk.f32.gmra.mrb[38].mxu0 %vm353_vm1, %v7417_v29  ;;  %8567 = vmatprep.mubr.msk.f32.mxu1 %vm353_vm1, %v1523_v30  ;;  %v1554_v29 = vld [vmem:[%s9865_s28 + $0xc71] sm:$0xff] }
 0x122   : > { %9007 = vmatprep.mubr.msk.f32.mxu0 %vm353_vm1, %v7418_v31  ;;  %v7515_v30 = vld [vmem:[%s9865_s28 + $0x2f0] sm:$0xff]  ;;  %v1555_v31 = vld [vmem:[%s9865_s28 + $0xf01] sm:$0xff] }
 0x124   : > { %8568 = vmatmul.mubr.msk.f32.gmra.mrb[8].mxu1 %vm353_vm1, %v1524_v32  ;;  %v7516_v32 = vld [vmem:[%s9865_s28 + $0x580] sm:$0xff] }
 0x125   : > { %9008 = vmatmul.mubr.msk.f32.gmra.mrb[40].mxu0 %vm353_vm1, %v7419_v33  ;;  %8570 = vmatprep.mubr.msk.f32.mxu1 %vm353_vm1, %v1525_v34  ;;  %v1556_v33 = vld [vmem:[%s9865_s28 + $0xf11] sm:$0xff] }
 0x126   : > { %9010 = vmatprep.mubr.msk.f32.mxu0 %vm353_vm1, %v7420_v35  ;;  %v7517_v34 = vld [vmem:[%s9865_s28 + $0x590] sm:$0xff]  ;;  %v1557_v35 = vld [vmem:[%s9865_s28 + $0xf21] sm:$0xff] }
 0x128   : > { %8571 = vmatmul.mubr.msk.f32.gmra.mrb[10].mxu1 %vm353_vm1, %v1526_v36  ;;  %v7518_v36 = vld [vmem:[%s9865_s28 + $0x5a0] sm:$0xff] }
 0x129   : > { %9011 = vmatmul.mubr.msk.f32.gmra.mrb[42].mxu0 %vm353_vm1, %v7421_v37  ;;  %8573 = vmatprep.mubr.msk.f32.mxu1 %vm353_vm1, %v1527_v38  ;;  %v1558_v37 = vld [vmem:[%s9865_s28 + $0xf31] sm:$0xff] }
 0x12a   : > { %9013 = vmatprep.mubr.msk.f32.mxu0 %vm353_vm1, %v7422_v39  ;;  %v7519_v38 = vld [vmem:[%s9865_s28 + $0x5b0] sm:$0xff]  ;;  %v1559_v39 = vld [vmem:[%s9865_s28 + $0xf41] sm:$0xff] }
 0x12c   : > { %8574 = vmatmul.mubr.msk.f32.gmra.mrb[12].mxu1 %vm353_vm1, %v1528_v40  ;;  %v7520_v40 = vld [vmem:[%s9865_s28 + $0x5c0] sm:$0xff] }
 0x12d   : > { %9014 = vmatmul.mubr.msk.f32.gmra.mrb[44].mxu0 %vm353_vm1, %v7423_v41  ;;  %8576 = vmatprep.mubr.msk.f32.mxu1 %vm353_vm1, %v1529_v42  ;;  %v1560_v41 = vld [vmem:[%s9865_s28 + $0xf51] sm:$0xff] }
 0x12e   : > { %9016 = vmatprep.mubr.msk.f32.mxu0 %vm353_vm1, %v7424_v43  ;;  %v7521_v42 = vld [vmem:[%s9865_s28 + $0x5d0] sm:$0xff]  ;;  %v1561_v43 = vld [vmem:[%s9865_s28 + $0xf61] sm:$0xff] }
 0x130   : > { %8577 = vmatmul.mubr.msk.f32.gmra.mrb[14].mxu1 %vm353_vm1, %v1530_v44  ;;  %v7522_v44 = vld [vmem:[%s9865_s28 + $0x5e0] sm:$0xff] }
 0x131   : > { %9017 = vmatmul.mubr.msk.f32.gmra.mrb[46].mxu0 %vm353_vm1, %v7425_v45  ;;  %8579 = vmatprep.mubr.msk.f32.mxu1 %vm353_vm1, %v1531_v46  ;;  %v1562_v45 = vld [vmem:[%s9865_s28 + $0xf71] sm:$0xff] }
 0x132   : > { %9019 = vmatprep.mubr.msk.f32.mxu0 %vm353_vm1, %v7426_v47  ;;  %v7523_v46 = vld [vmem:[%s9865_s28 + $0x5f0] sm:$0xff]  ;;  %v1563_v47 = vld [vmem:[%s9865_s28 + $0x1201] sm:$0xff] }
 0x134   : > { %8580 = vmatmul.mubr.msk.f32.gmra.mrb[16].mxu1 %vm353_vm1, %v1532_v48  ;;  %v7524_v48 = vld [vmem:[%s9865_s28 + $0x880] sm:$0xff] }
 0x135   : > { %9020 = vmatmul.mubr.msk.f32.gmra.mrb[48].mxu0 %vm353_vm1, %v7427_v49  ;;  %8582 = vmatprep.mubr.msk.f32.mxu1 %vm353_vm1, %v1533_v50  ;;  %v1564_v49 = vld [vmem:[%s9865_s28 + $0x1211] sm:$0xff] }
 0x136   : > { %9022 = vmatprep.mubr.msk.f32.mxu0 %vm353_vm1, %v7428_v51  ;;  %v7525_v50 = vld [vmem:[%s9865_s28 + $0x890] sm:$0xff]  ;;  %v1565_v51 = vld [vmem:[%s9865_s28 + $0x1221] sm:$0xff] }
 0x138   : > { %8583 = vmatmul.mubr.msk.f32.gmra.mrb[18].mxu1 %vm353_vm1, %v1534_v52  ;;  %v7526_v52 = vld [vmem:[%s9865_s28 + $0x8a0] sm:$0xff] }
 0x139   : > { %9023 = vmatmul.mubr.msk.f32.gmra.mrb[50].mxu0 %vm353_vm1, %v7429_v53  ;;  %8585 = vmatprep.mubr.msk.f32.mxu1 %vm353_vm1, %v1535_v54  ;;  %v1566_v53 = vld [vmem:[%s9865_s28 + $0x1231] sm:$0xff] }
 0x13a   : > { %9025 = vmatprep.mubr.msk.f32.mxu0 %vm353_vm1, %v7430_v55  ;;  %v7527_v54 = vld [vmem:[%s9865_s28 + $0x8b0] sm:$0xff]  ;;  %v1567_v55 = vld [vmem:[%s9865_s28 + $0x1241] sm:$0xff] }
 0x13c   : > { %8586 = vmatmul.mubr.msk.f32.gmra.mrb[20].mxu1 %vm353_vm1, %v1536_v56  ;;  %v7528_v56 = vld [vmem:[%s9865_s28 + $0x8c0] sm:$0xff] }
 0x13d   : > { %9026 = vmatmul.mubr.msk.f32.gmra.mrb[52].mxu0 %vm353_vm1, %v7431_v57  ;;  %8588 = vmatprep.mubr.msk.f32.mxu1 %vm353_vm1, %v1537_v58  ;;  %v1568_v57 = vld [vmem:[%s9865_s28 + $0x1251] sm:$0xff] }
 0x13e   : > { %9028 = vmatprep.mubr.msk.f32.mxu0 %vm353_vm1, %v7432_v59  ;;  %v7529_v58 = vld [vmem:[%s9865_s28 + $0x8d0] sm:$0xff]  ;;  %v1569_v59 = vld [vmem:[%s9865_s28 + $0x1261] sm:$0xff] }
 0x140   : > { %8589 = vmatmul.mubr.msk.f32.gmra.mrb[22].mxu1 %vm353_vm1, %v1538_v60  ;;  %v7530_v60 = vld [vmem:[%s9865_s28 + $0x8e0] sm:$0xff] }
 0x141   : > { %9029 = vmatmul.mubr.msk.f32.gmra.mrb[54].mxu0 %vm353_vm1, %v7433_v61  ;;  %8591 = vmatprep.mubr.msk.f32.mxu1 %vm353_vm1, %v1539_v62  ;;  %v1570_v61 = vld [vmem:[%s9865_s28 + $0x1271] sm:$0xff] }
 0x142   : > { %9031 = vmatprep.mubr.msk.f32.mxu0 %vm353_vm1, %v7434_v63  ;;  %v7531_v62 = vld [vmem:[%s9865_s28 + $0x8f0] sm:$0xff]  ;;  %v1571_v63 = vld [vmem:[%s9865_s28 + $0x1501] sm:$0xff] }
 0x144   : > { %8592 = vmatmul.mubr.msk.f32.gmra.mrb[24].mxu1 %vm353_vm1, %v1540_v0  ;;  %v7532_v0 = vld [vmem:[%s9865_s28 + $0xb80] sm:$0xff] }
 0x145   : > { %9032 = vmatmul.mubr.msk.f32.gmra.mrb[56].mxu0 %vm353_vm1, %v7435_v1  ;;  %8594 = vmatprep.mubr.msk.f32.mxu1 %vm353_vm1, %v1541_v2  ;;  %v1572_v1 = vld [vmem:[%s9865_s28 + $0x1511] sm:$0xff] }
 0x146   : > { %9034 = vmatprep.mubr.msk.f32.mxu0 %vm353_vm1, %v7436_v3  ;;  %v7533_v2 = vld [vmem:[%s9865_s28 + $0xb90] sm:$0xff]  ;;  %v1573_v3 = vld [vmem:[%s9865_s28 + $0x1521] sm:$0xff] }
 0x148   : > { %8595 = vmatmul.mubr.msk.f32.gmra.mrb[26].mxu1 %vm353_vm1, %v1542_v4  ;;  %v7534_v4 = vld [vmem:[%s9865_s28 + $0xba0] sm:$0xff] }
 0x149   : > { %9035 = vmatmul.mubr.msk.f32.gmra.mrb[58].mxu0 %vm353_vm1, %v7437_v5  ;;  %8597 = vmatprep.mubr.msk.f32.mxu1 %vm353_vm1, %v1543_v6  ;;  %v1574_v5 = vld [vmem:[%s9865_s28 + $0x1531] sm:$0xff] }
 0x14a   : > { %9037 = vmatprep.mubr.msk.f32.mxu0 %vm353_vm1, %v7438_v7  ;;  %v7535_v6 = vld [vmem:[%s9865_s28 + $0xbb0] sm:$0xff]  ;;  %v1575_v7 = vld [vmem:[%s9865_s28 + $0x1541] sm:$0xff] }
 0x14c   : > { %8598 = vmatmul.mubr.msk.f32.gmra.mrb[28].mxu1 %vm353_vm1, %v1544_v8  ;;  %v7536_v8 = vld [vmem:[%s9865_s28 + $0xbc0] sm:$0xff] }
 0x14d   : > { %9038 = vmatmul.mubr.msk.f32.gmra.mrb[60].mxu0 %vm353_vm1, %v7439_v9  ;;  %8600 = vmatprep.mubr.msk.f32.mxu1 %vm353_vm1, %v1545_v12  ;;  %v1576_v9 = vld [vmem:[%s9865_s28 + $0x1551] sm:$0xff] }
 0x14e   : > { %9040 = vmatprep.mubr.msk.f32.mxu0 %vm353_vm1, %v7440_v13  ;;  %v7537_v12 = vld [vmem:[%s9865_s28 + $0xbd0] sm:$0xff]  ;;  %v1577_v13 = vld [vmem:[%s9865_s28 + $0x1561] sm:$0xff] }
 0x150   : > { %8601 = vmatmul.mubr.msk.f32.gmra.mrb[30].mxu1 %vm353_vm1, %v1546_v15  ;;  %v7538_v15 = vld [vmem:[%s9865_s28 + $0xbe0] sm:$0xff] }
 0x151   : > { %9041 = vmatmul.mubr.msk.f32.gmra.mrb[62].mxu0 %vm353_vm1, %v7441_v16  ;;  %8603 = vmatprep.mubr.msk.f32.mxu1 %vm353_vm1, %v1547_v18  ;;  %v1578_v16 = vld [vmem:[%s9865_s28 + $0x1571] sm:$0xff] }
 0x152   : > { %9045 = vmatprep.mubr.msk.f32.mxu0 %vm353_vm1, %v7508_v10  ;;  %v7539_v18 = vld [vmem:[%s9865_s28 + $0xbf0] sm:$0xff]  ;;  %v6988_v10 = vld [vmem:[%s9865_s28 + $0x100] sm:$0xff] }
 0x154   : > { %8604 = vmatmul.mubr.msk.f32.gmra.mrb[32].mxu1 %vm353_vm1, %v1548_v20  ;;  %v7540_v20 = vld [vmem:[%s9865_s28 + $0xe80] sm:$0xff] }
 0x155   : > { %9046 = vmatmul.mubr.msk.f32.vlgmr.msra.gmra.mrb[0].mxu0 %vm353_vm1, %v7509_v11  ;;  %8606 = vmatprep.mubr.msk.f32.mxu1 %vm353_vm1, %v1549_v21  ;;  %v6989_v11 = vld [vmem:[%s9865_s28 + $0x110] sm:$0xff] }
 0x156   : > { %9142 = vmatpush3.msk.msra.mxu0 %vm546_vm0, %v10296_v19  ;;  %9048 = vmatprep.mubr.msk.f32.mxu0 %vm353_vm1, %v7510_v22  ;;  %v1552_v19 = vld [vmem:[%s9865_s28 + $0xc51] sm:$0xff]  ;;  %v6990_v22 = vld [vmem:[%s9865_s28 + $0x120] sm:$0xff] }
 0x157   : > { %v7541_v21 = vld [vmem:[%s9865_s28 + $0xe90] sm:$0xff] }
 0x158   : > { %8607 = vmatmul.mubr.msk.f32.gmra.mrb[34].mxu1 %vm353_vm1, %v1550_v14  ;;  %v7542_v14 = vld [vmem:[%s9865_s28 + $0xea0] sm:$0xff] }
 0x159   : > { %9049 = vmatmul.mubr.msk.f32.gmra.mrb[2].mxu0 %vm353_vm1, %v7511_v23  ;;  %8609 = vmatprep.mubr.msk.f32.mxu1 %vm353_vm1, %v1551_v17  ;;  %v6991_v23 = vld [vmem:[%s9865_s28 + $0x130] sm:$0xff] }
 0x15a   : > { %9051 = vmatprep.mubr.msk.f32.mxu0 %vm353_vm1, %v7512_v25  ;;  %v7543_v17 = vld [vmem:[%s9865_s28 + $0xeb0] sm:$0xff]  ;;  %v6992_v25 = vld [vmem:[%s9865_s28 + $0x140] sm:$0xff] }
 0x15c   : > { %8610 = vmatmul.mubr.msk.f32.gmra.mrb[36].mxu1 %vm353_vm1, %v1552_v19  ;;  %v7544_v19 = vld [vmem:[%s9865_s28 + $0xec0] sm:$0xff] }
 0x15d   : > { %9052 = vmatmul.mubr.msk.f32.gmra.mrb[4].mxu0 %vm353_vm1, %v7513_v26  ;;  %8612 = vmatprep.mubr.msk.f32.mxu1 %vm353_vm1, %v1553_v27  ;;  %v7545_v26 = vld [vmem:[%s9865_s28 + $0xed0] sm:$0xff]  ;;  %v6994_v27 = vld [vmem:[%s9865_s28 + $0x160] sm:$0xff] }
 0x15e   : > { %9054 = vmatprep.mubr.msk.f32.mxu0 %vm353_vm1, %v7514_v28  ;;  %v7546_v28 = vld [vmem:[%s9865_s28 + $0xee0] sm:$0xff] }
 0x160   : > { %8613 = vmatmul.mubr.msk.f32.gmra.mrb[38].mxu1 %vm353_vm1, %v1554_v29  ;;  %v6995_v29 = vld [vmem:[%s9865_s28 + $0x170] sm:$0xff] }
 0x161   : > { %9055 = vmatmul.mubr.msk.f32.gmra.mrb[6].mxu0 %vm353_vm1, %v7515_v30  ;;  %8615 = vmatprep.mubr.msk.f32.mxu1 %vm353_vm1, %v1555_v31  ;;  %v7547_v30 = vld [vmem:[%s9865_s28 + $0xef0] sm:$0xff]  ;;  %v6996_v31 = vld [vmem:[%s9865_s28 + $0x400] sm:$0xff] }
 0x162   : > { %9057 = vmatprep.mubr.msk.f32.mxu0 %vm353_vm1, %v7516_v32  ;;  %v7548_v32 = vld [vmem:[%s9865_s28 + $0x1180] sm:$0xff] }
 0x164   : > { %8616 = vmatmul.mubr.msk.f32.gmra.mrb[40].mxu1 %vm353_vm1, %v1556_v33  ;;  %v6997_v33 = vld [vmem:[%s9865_s28 + $0x410] sm:$0xff] }
 0x165   : > { %9058 = vmatmul.mubr.msk.f32.gmra.mrb[8].mxu0 %vm353_vm1, %v7517_v34  ;;  %8618 = vmatprep.mubr.msk.f32.mxu1 %vm353_vm1, %v1557_v35  ;;  %v7549_v34 = vld [vmem:[%s9865_s28 + $0x1190] sm:$0xff]  ;;  %v6998_v35 = vld [vmem:[%s9865_s28 + $0x420] sm:$0xff] }
 0x166   : > { %9060 = vmatprep.mubr.msk.f32.mxu0 %vm353_vm1, %v7518_v36  ;;  %v7550_v36 = vld [vmem:[%s9865_s28 + $0x11a0] sm:$0xff] }
 0x168   : > { %8619 = vmatmul.mubr.msk.f32.gmra.mrb[42].mxu1 %vm353_vm1, %v1558_v37  ;;  %v6999_v37 = vld [vmem:[%s9865_s28 + $0x430] sm:$0xff] }
 0x169   : > { %9061 = vmatmul.mubr.msk.f32.gmra.mrb[10].mxu0 %vm353_vm1, %v7519_v38  ;;  %8621 = vmatprep.mubr.msk.f32.mxu1 %vm353_vm1, %v1559_v39  ;;  %v7551_v38 = vld [vmem:[%s9865_s28 + $0x11b0] sm:$0xff]  ;;  %v7000_v39 = vld [vmem:[%s9865_s28 + $0x440] sm:$0xff] }
 0x16a   : > { %9063 = vmatprep.mubr.msk.f32.mxu0 %vm353_vm1, %v7520_v40  ;;  %v7552_v40 = vld [vmem:[%s9865_s28 + $0x11c0] sm:$0xff] }
 0x16c   : > { %8622 = vmatmul.mubr.msk.f32.gmra.mrb[44].mxu1 %vm353_vm1, %v1560_v41  ;;  %v7001_v41 = vld [vmem:[%s9865_s28 + $0x450] sm:$0xff] }
 0x16d   : > { %9064 = vmatmul.mubr.msk.f32.gmra.mrb[12].mxu0 %vm353_vm1, %v7521_v42  ;;  %8624 = vmatprep.mubr.msk.f32.mxu1 %vm353_vm1, %v1561_v43  ;;  %v7553_v42 = vld [vmem:[%s9865_s28 + $0x11d0] sm:$0xff]  ;;  %v7002_v43 = vld [vmem:[%s9865_s28 + $0x460] sm:$0xff] }
 0x16e   : > { %9066 = vmatprep.mubr.msk.f32.mxu0 %vm353_vm1, %v7522_v44  ;;  %v7554_v44 = vld [vmem:[%s9865_s28 + $0x11e0] sm:$0xff] }
 0x170   : > { %8625 = vmatmul.mubr.msk.f32.gmra.mrb[46].mxu1 %vm353_vm1, %v1562_v45  ;;  %v7003_v45 = vld [vmem:[%s9865_s28 + $0x470] sm:$0xff] }
 0x171   : > { %9067 = vmatmul.mubr.msk.f32.gmra.mrb[14].mxu0 %vm353_vm1, %v7523_v46  ;;  %8627 = vmatprep.mubr.msk.f32.mxu1 %vm353_vm1, %v1563_v47  ;;  %v7555_v46 = vld [vmem:[%s9865_s28 + $0x11f0] sm:$0xff]  ;;  %v7004_v47 = vld [vmem:[%s9865_s28 + $0x700] sm:$0xff] }
 0x172   : > { %9069 = vmatprep.mubr.msk.f32.mxu0 %vm353_vm1, %v7524_v48  ;;  %v7556_v48 = vld [vmem:[%s9865_s28 + $0x1480] sm:$0xff] }
 0x174   : > { %8628 = vmatmul.mubr.msk.f32.gmra.mrb[48].mxu1 %vm353_vm1, %v1564_v49  ;;  %v7005_v49 = vld [vmem:[%s9865_s28 + $0x710] sm:$0xff] }
 0x175   : > { %9070 = vmatmul.mubr.msk.f32.gmra.mrb[16].mxu0 %vm353_vm1, %v7525_v50  ;;  %8630 = vmatprep.mubr.msk.f32.mxu1 %vm353_vm1, %v1565_v51  ;;  %v7557_v50 = vld [vmem:[%s9865_s28 + $0x1490] sm:$0xff]  ;;  %v7006_v51 = vld [vmem:[%s9865_s28 + $0x720] sm:$0xff] }
 0x176   : > { %9072 = vmatprep.mubr.msk.f32.mxu0 %vm353_vm1, %v7526_v52  ;;  %v7558_v52 = vld [vmem:[%s9865_s28 + $0x14a0] sm:$0xff] }
 0x178   : > { %8631 = vmatmul.mubr.msk.f32.gmra.mrb[50].mxu1 %vm353_vm1, %v1566_v53  ;;  %v7007_v53 = vld [vmem:[%s9865_s28 + $0x730] sm:$0xff] }
 0x179   : > { %9073 = vmatmul.mubr.msk.f32.gmra.mrb[18].mxu0 %vm353_vm1, %v7527_v54  ;;  %8633 = vmatprep.mubr.msk.f32.mxu1 %vm353_vm1, %v1567_v55  ;;  %v7559_v54 = vld [vmem:[%s9865_s28 + $0x14b0] sm:$0xff]  ;;  %v7008_v55 = vld [vmem:[%s9865_s28 + $0x740] sm:$0xff] }
 0x17a   : > { %9075 = vmatprep.mubr.msk.f32.mxu0 %vm353_vm1, %v7528_v56  ;;  %v7560_v56 = vld [vmem:[%s9865_s28 + $0x14c0] sm:$0xff] }
 0x17c   : > { %8634 = vmatmul.mubr.msk.f32.gmra.mrb[52].mxu1 %vm353_vm1, %v1568_v57  ;;  %v7009_v57 = vld [vmem:[%s9865_s28 + $0x750] sm:$0xff] }
 0x17d   : > { %9076 = vmatmul.mubr.msk.f32.gmra.mrb[20].mxu0 %vm353_vm1, %v7529_v58  ;;  %8636 = vmatprep.mubr.msk.f32.mxu1 %vm353_vm1, %v1569_v59  ;;  %v7561_v58 = vld [vmem:[%s9865_s28 + $0x14d0] sm:$0xff]  ;;  %v7010_v59 = vld [vmem:[%s9865_s28 + $0x760] sm:$0xff] }
 0x17e   : > { %9078 = vmatprep.mubr.msk.f32.mxu0 %vm353_vm1, %v7530_v60  ;;  %v7562_v60 = vld [vmem:[%s9865_s28 + $0x14e0] sm:$0xff] }
 0x180   : > { %8637 = vmatmul.mubr.msk.f32.gmra.mrb[54].mxu1 %vm353_vm1, %v1570_v61  ;;  %v7011_v61 = vld [vmem:[%s9865_s28 + $0x770] sm:$0xff] }
 0x181   : > { %9079 = vmatmul.mubr.msk.f32.gmra.mrb[22].mxu0 %vm353_vm1, %v7531_v62  ;;  %8639 = vmatprep.mubr.msk.f32.mxu1 %vm353_vm1, %v1571_v63  ;;  %v7563_v62 = vld [vmem:[%s9865_s28 + $0x14f0] sm:$0xff]  ;;  %v7012_v63 = vld [vmem:[%s9865_s28 + $0xa00] sm:$0xff] }
 0x182   : > { %9081 = vmatprep.mubr.msk.f32.mxu0 %vm353_vm1, %v7532_v0  ;;  %v7564_v0 = vld [vmem:[%s9865_s28 + $0x1780] sm:$0xff] }
 0x184   : > { %8640 = vmatmul.mubr.msk.f32.gmra.mrb[56].mxu1 %vm353_vm1, %v1572_v1  ;;  %v7013_v1 = vld [vmem:[%s9865_s28 + $0xa10] sm:$0xff] }
 0x185   : > { %9082 = vmatmul.mubr.msk.f32.gmra.mrb[24].mxu0 %vm353_vm1, %v7533_v2  ;;  %8642 = vmatprep.mubr.msk.f32.mxu1 %vm353_vm1, %v1573_v3  ;;  %v7565_v2 = vld [vmem:[%s9865_s28 + $0x1790] sm:$0xff]  ;;  %v7014_v3 = vld [vmem:[%s9865_s28 + $0xa20] sm:$0xff] }
 0x186   : > { %9084 = vmatprep.mubr.msk.f32.mxu0 %vm353_vm1, %v7534_v4  ;;  %v7566_v4 = vld [vmem:[%s9865_s28 + $0x17a0] sm:$0xff] }
 0x188   : > { %8643 = vmatmul.mubr.msk.f32.gmra.mrb[58].mxu1 %vm353_vm1, %v1574_v5  ;;  %v7015_v5 = vld [vmem:[%s9865_s28 + $0xa30] sm:$0xff] }
 0x189   : > { %9085 = vmatmul.mubr.msk.f32.gmra.mrb[26].mxu0 %vm353_vm1, %v7535_v6  ;;  %8645 = vmatprep.mubr.msk.f32.mxu1 %vm353_vm1, %v1575_v7  ;;  %v7567_v6 = vld [vmem:[%s9865_s28 + $0x17b0] sm:$0xff]  ;;  %v7016_v7 = vld [vmem:[%s9865_s28 + $0xa40] sm:$0xff] }
 0x18a   : > { %9087 = vmatprep.mubr.msk.f32.mxu0 %vm353_vm1, %v7536_v8  ;;  %v7568_v8 = vld [vmem:[%s9865_s28 + $0x17c0] sm:$0xff] }
 0x18c   : > { %8646 = vmatmul.mubr.msk.f32.gmra.mrb[60].mxu1 %vm353_vm1, %v1576_v9  ;;  %v7017_v9 = vld [vmem:[%s9865_s28 + $0xa50] sm:$0xff] }
 0x18d   : > { %9088 = vmatmul.mubr.msk.f32.gmra.mrb[28].mxu0 %vm353_vm1, %v7537_v12  ;;  %8648 = vmatprep.mubr.msk.f32.mxu1 %vm353_vm1, %v1577_v13  ;;  %v7569_v12 = vld [vmem:[%s9865_s28 + $0x17d0] sm:$0xff]  ;;  %v7018_v13 = vld [vmem:[%s9865_s28 + $0xa60] sm:$0xff] }
 0x18e   : > { %9090 = vmatprep.mubr.msk.f32.mxu0 %vm353_vm1, %v7538_v15  ;;  %v7570_v15 = vld [vmem:[%s9865_s28 + $0x17e0] sm:$0xff] }
 0x190   : > { %8649 = vmatmul.mubr.msk.f32.gmra.mrb[62].mxu1 %vm353_vm1, %v1578_v16  ;;  %v7019_v16 = vld [vmem:[%s9865_s28 + $0xa70] sm:$0xff] }
 0x191   : > { %9091 = vmatmul.mubr.msk.f32.gmra.mrb[30].mxu0 %vm353_vm1, %v7539_v18  ;;  %8653 = vmatprep.mubr.msk.f32.mxu1 %vm353_vm1, %v6988_v10  ;;  %v7571_v18 = vld [vmem:[%s9865_s28 + $0x17f0] sm:$0xff]  ;;  %v7020_v10 = vld [vmem:[%s9865_s28 + $0xd00] sm:$0xff] }
 0x192   : > { %9093 = vmatprep.mubr.msk.f32.mxu0 %vm353_vm1, %v7540_v20  ;;  %v7638_v20 = vld [vmem:[%s9865_s28 + $0x201] sm:$0xff] }
 0x194   : > { %8654 = vmatmul.mubr.msk.f32.vlgmr.msra.gmra.mrb[0].mxu1 %vm353_vm1, %v6989_v11  ;;  %v7021_v11 = vld [vmem:[%s9865_s28 + $0xd10] sm:$0xff] }
 0x195   : > { %9094 = vmatmul.mubr.msk.f32.gmra.mrb[32].mxu0 %vm353_vm1, %v7541_v21  ;;  %9240 = vmatpush3.msk.msra.mxu1 %vm546_vm0, %v10443_v24  ;;  %v6993_v24 = vld [vmem:[%s9865_s28 + $0x150] sm:$0xff] }
 0x196   : > { %8656 = vmatprep.mubr.msk.f32.mxu1 %vm353_vm1, %v6990_v22  ;;  %9096 = vmatprep.mubr.msk.f32.mxu0 %vm353_vm1, %v7542_v14  ;;  %v7639_v21 = vld [vmem:[%s9865_s28 + $0x211] sm:$0xff]  ;;  %v7022_v22 = vld [vmem:[%s9865_s28 + $0xd20] sm:$0xff] }
 0x197   : > { %v7640_v14 = vld [vmem:[%s9865_s28 + $0x221] sm:$0xff] }
 0x198   : > { %8657 = vmatmul.mubr.msk.f32.gmra.mrb[2].mxu1 %vm353_vm1, %v6991_v23  ;;  %v7023_v23 = vld [vmem:[%s9865_s28 + $0xd30] sm:$0xff] }
 0x199   : > { %9097 = vmatmul.mubr.msk.f32.gmra.mrb[34].mxu0 %vm353_vm1, %v7543_v17  ;;  %8659 = vmatprep.mubr.msk.f32.mxu1 %vm353_vm1, %v6992_v25  ;;  %v7641_v17 = vld [vmem:[%s9865_s28 + $0x231] sm:$0xff]  ;;  %v7024_v25 = vld [vmem:[%s9865_s28 + $0xd40] sm:$0xff] }
 0x19a   : > { %9099 = vmatprep.mubr.msk.f32.mxu0 %vm353_vm1, %v7544_v19  ;;  %v7642_v19 = vld [vmem:[%s9865_s28 + $0x241] sm:$0xff] }
 0x19c   : > { %8660 = vmatmul.mubr.msk.f32.gmra.mrb[4].mxu1 %vm353_vm1, %v6993_v24  ;;  %v7025_v24 = vld [vmem:[%s9865_s28 + $0xd50] sm:$0xff] }
 0x19d   : > { %9100 = vmatmul.mubr.msk.f32.gmra.mrb[36].mxu0 %vm353_vm1, %v7545_v26  ;;  %8662 = vmatprep.mubr.msk.f32.mxu1 %vm353_vm1, %v6994_v27  ;;  %v7643_v26 = vld [vmem:[%s9865_s28 + $0x251] sm:$0xff]  ;;  %v7026_v27 = vld [vmem:[%s9865_s28 + $0xd60] sm:$0xff] }
 0x19e   : > { %9102 = vmatprep.mubr.msk.f32.mxu0 %vm353_vm1, %v7546_v28  ;;  %v7644_v28 = vld [vmem:[%s9865_s28 + $0x261] sm:$0xff] }
 0x1a0   : > { %8663 = vmatmul.mubr.msk.f32.gmra.mrb[6].mxu1 %vm353_vm1, %v6995_v29  ;;  %v7027_v29 = vld [vmem:[%s9865_s28 + $0xd70] sm:$0xff] }
 0x1a1   : > { %9103 = vmatmul.mubr.msk.f32.gmra.mrb[38].mxu0 %vm353_vm1, %v7547_v30  ;;  %8665 = vmatprep.mubr.msk.f32.mxu1 %vm353_vm1, %v6996_v31  ;;  %v7645_v30 = vld [vmem:[%s9865_s28 + $0x271] sm:$0xff]  ;;  %v7028_v31 = vld [vmem:[%s9865_s28 + $0x1000] sm:$0xff] }
 0x1a2   : > { %9105 = vmatprep.mubr.msk.f32.mxu0 %vm353_vm1, %v7548_v32  ;;  %v7646_v32 = vld [vmem:[%s9865_s28 + $0x501] sm:$0xff] }
 0x1a4   : > { %8666 = vmatmul.mubr.msk.f32.gmra.mrb[8].mxu1 %vm353_vm1, %v6997_v33  ;;  %v7029_v33 = vld [vmem:[%s9865_s28 + $0x1010] sm:$0xff] }
 0x1a5   : > { %9106 = vmatmul.mubr.msk.f32.gmra.mrb[40].mxu0 %vm353_vm1, %v7549_v34  ;;  %8668 = vmatprep.mubr.msk.f32.mxu1 %vm353_vm1, %v6998_v35  ;;  %v7647_v34 = vld [vmem:[%s9865_s28 + $0x511] sm:$0xff]  ;;  %v7030_v35 = vld [vmem:[%s9865_s28 + $0x1020] sm:$0xff] }
 0x1a6   : > { %9108 = vmatprep.mubr.msk.f32.mxu0 %vm353_vm1, %v7550_v36  ;;  %v7648_v36 = vld [vmem:[%s9865_s28 + $0x521] sm:$0xff] }
 0x1a8   : > { %8669 = vmatmul.mubr.msk.f32.gmra.mrb[10].mxu1 %vm353_vm1, %v6999_v37  ;;  %v7031_v37 = vld [vmem:[%s9865_s28 + $0x1030] sm:$0xff] }
 0x1a9   : > { %9109 = vmatmul.mubr.msk.f32.gmra.mrb[42].mxu0 %vm353_vm1, %v7551_v38  ;;  %8671 = vmatprep.mubr.msk.f32.mxu1 %vm353_vm1, %v7000_v39  ;;  %v7649_v38 = vld [vmem:[%s9865_s28 + $0x531] sm:$0xff]  ;;  %v7032_v39 = vld [vmem:[%s9865_s28 + $0x1040] sm:$0xff] }
 0x1aa   : > { %9111 = vmatprep.mubr.msk.f32.mxu0 %vm353_vm1, %v7552_v40  ;;  %v7650_v40 = vld [vmem:[%s9865_s28 + $0x541] sm:$0xff] }
 0x1ac   : > { %8672 = vmatmul.mubr.msk.f32.gmra.mrb[12].mxu1 %vm353_vm1, %v7001_v41  ;;  %v7033_v41 = vld [vmem:[%s9865_s28 + $0x1050] sm:$0xff] }
 0x1ad   : > { %9112 = vmatmul.mubr.msk.f32.gmra.mrb[44].mxu0 %vm353_vm1, %v7553_v42  ;;  %8674 = vmatprep.mubr.msk.f32.mxu1 %vm353_vm1, %v7002_v43  ;;  %v7651_v42 = vld [vmem:[%s9865_s28 + $0x551] sm:$0xff]  ;;  %v7034_v43 = vld [vmem:[%s9865_s28 + $0x1060] sm:$0xff] }
 0x1ae   : > { %9114 = vmatprep.mubr.msk.f32.mxu0 %vm353_vm1, %v7554_v44  ;;  %v7652_v44 = vld [vmem:[%s9865_s28 + $0x561] sm:$0xff] }
 0x1b0   : > { %8675 = vmatmul.mubr.msk.f32.gmra.mrb[14].mxu1 %vm353_vm1, %v7003_v45  ;;  %v7035_v45 = vld [vmem:[%s9865_s28 + $0x1070] sm:$0xff] }
 0x1b1   : > { %9115 = vmatmul.mubr.msk.f32.gmra.mrb[46].mxu0 %vm353_vm1, %v7555_v46  ;;  %8677 = vmatprep.mubr.msk.f32.mxu1 %vm353_vm1, %v7004_v47  ;;  %v7653_v46 = vld [vmem:[%s9865_s28 + $0x571] sm:$0xff]  ;;  %v7036_v47 = vld [vmem:[%s9865_s28 + $0x1300] sm:$0xff] }
 0x1b2   : > { %9117 = vmatprep.mubr.msk.f32.mxu0 %vm353_vm1, %v7556_v48  ;;  %v7654_v48 = vld [vmem:[%s9865_s28 + $0x801] sm:$0xff] }
 0x1b4   : > { %8678 = vmatmul.mubr.msk.f32.gmra.mrb[16].mxu1 %vm353_vm1, %v7005_v49  ;;  %v7037_v49 = vld [vmem:[%s9865_s28 + $0x1310] sm:$0xff] }
 0x1b5   : > { %9118 = vmatmul.mubr.msk.f32.gmra.mrb[48].mxu0 %vm353_vm1, %v7557_v50  ;;  %8680 = vmatprep.mubr.msk.f32.mxu1 %vm353_vm1, %v7006_v51  ;;  %v7655_v50 = vld [vmem:[%s9865_s28 + $0x811] sm:$0xff]  ;;  %v7038_v51 = vld [vmem:[%s9865_s28 + $0x1320] sm:$0xff] }
 0x1b6   : > { %9120 = vmatprep.mubr.msk.f32.mxu0 %vm353_vm1, %v7558_v52  ;;  %v7656_v52 = vld [vmem:[%s9865_s28 + $0x821] sm:$0xff] }
 0x1b8   : > { %8681 = vmatmul.mubr.msk.f32.gmra.mrb[18].mxu1 %vm353_vm1, %v7007_v53  ;;  %v7039_v53 = vld [vmem:[%s9865_s28 + $0x1330] sm:$0xff] }
 0x1b9   : > { %9121 = vmatmul.mubr.msk.f32.gmra.mrb[50].mxu0 %vm353_vm1, %v7559_v54  ;;  %8683 = vmatprep.mubr.msk.f32.mxu1 %vm353_vm1, %v7008_v55  ;;  %v7657_v54 = vld [vmem:[%s9865_s28 + $0x831] sm:$0xff]  ;;  %v7040_v55 = vld [vmem:[%s9865_s28 + $0x1340] sm:$0xff] }
 0x1ba   : > { %9123 = vmatprep.mubr.msk.f32.mxu0 %vm353_vm1, %v7560_v56  ;;  %v7658_v56 = vld [vmem:[%s9865_s28 + $0x841] sm:$0xff] }
 0x1bc   : > { %8684 = vmatmul.mubr.msk.f32.gmra.mrb[20].mxu1 %vm353_vm1, %v7009_v57  ;;  %v7041_v57 = vld [vmem:[%s9865_s28 + $0x1350] sm:$0xff] }
 0x1bd   : > { %9124 = vmatmul.mubr.msk.f32.gmra.mrb[52].mxu0 %vm353_vm1, %v7561_v58  ;;  %8686 = vmatprep.mubr.msk.f32.mxu1 %vm353_vm1, %v7010_v59  ;;  %v7659_v58 = vld [vmem:[%s9865_s28 + $0x851] sm:$0xff]  ;;  %v7042_v59 = vld [vmem:[%s9865_s28 + $0x1360] sm:$0xff] }
 0x1be   : > { %9126 = vmatprep.mubr.msk.f32.mxu0 %vm353_vm1, %v7562_v60  ;;  %v7660_v60 = vld [vmem:[%s9865_s28 + $0x861] sm:$0xff] }
 0x1c0   : > { %8687 = vmatmul.mubr.msk.f32.gmra.mrb[22].mxu1 %vm353_vm1, %v7011_v61  ;;  %v7043_v61 = vld [vmem:[%s9865_s28 + $0x1370] sm:$0xff] }
 0x1c1   : > { %9127 = vmatmul.mubr.msk.f32.gmra.mrb[54].mxu0 %vm353_vm1, %v7563_v62  ;;  %8689 = vmatprep.mubr.msk.f32.mxu1 %vm353_vm1, %v7012_v63  ;;  %v7661_v62 = vld [vmem:[%s9865_s28 + $0x871] sm:$0xff]  ;;  %v7044_v63 = vld [vmem:[%s9865_s28 + $0x1600] sm:$0xff] }
 0x1c2   : > { %9129 = vmatprep.mubr.msk.f32.mxu0 %vm353_vm1, %v7564_v0  ;;  %v7662_v0 = vld [vmem:[%s9865_s28 + $0xb01] sm:$0xff] }
 0x1c4   : > { %8690 = vmatmul.mubr.msk.f32.gmra.mrb[24].mxu1 %vm353_vm1, %v7013_v1  ;;  %v7045_v1 = vld [vmem:[%s9865_s28 + $0x1610] sm:$0xff] }
 0x1c5   : > { %9130 = vmatmul.mubr.msk.f32.gmra.mrb[56].mxu0 %vm353_vm1, %v7565_v2  ;;  %8692 = vmatprep.mubr.msk.f32.mxu1 %vm353_vm1, %v7014_v3  ;;  %v7663_v2 = vld [vmem:[%s9865_s28 + $0xb11] sm:$0xff]  ;;  %v7046_v3 = vld [vmem:[%s9865_s28 + $0x1620] sm:$0xff] }
 0x1c6   : > { %9132 = vmatprep.mubr.msk.f32.mxu0 %vm353_vm1, %v7566_v4  ;;  %v7664_v4 = vld [vmem:[%s9865_s28 + $0xb21] sm:$0xff] }
 0x1c8   : > { %8693 = vmatmul.mubr.msk.f32.gmra.mrb[26].mxu1 %vm353_vm1, %v7015_v5  ;;  %v7047_v5 = vld [vmem:[%s9865_s28 + $0x1630] sm:$0xff] }
 0x1c9   : > { %9133 = vmatmul.mubr.msk.f32.gmra.mrb[58].mxu0 %vm353_vm1, %v7567_v6  ;;  %8695 = vmatprep.mubr.msk.f32.mxu1 %vm353_vm1, %v7016_v7  ;;  %v7665_v6 = vld [vmem:[%s9865_s28 + $0xb31] sm:$0xff]  ;;  %v7048_v7 = vld [vmem:[%s9865_s28 + $0x1640] sm:$0xff] }
 0x1ca   : > { %9135 = vmatprep.mubr.msk.f32.mxu0 %vm353_vm1, %v7568_v8  ;;  %v7666_v8 = vld [vmem:[%s9865_s28 + $0xb41] sm:$0xff] }
 0x1cc   : > { %8696 = vmatmul.mubr.msk.f32.gmra.mrb[28].mxu1 %vm353_vm1, %v7017_v9  ;;  %v7049_v9 = vld [vmem:[%s9865_s28 + $0x1650] sm:$0xff] }
 0x1cd   : > { %9136 = vmatmul.mubr.msk.f32.gmra.mrb[60].mxu0 %vm353_vm1, %v7569_v12  ;;  %8698 = vmatprep.mubr.msk.f32.mxu1 %vm353_vm1, %v7018_v13  ;;  %v7667_v12 = vld [vmem:[%s9865_s28 + $0xb51] sm:$0xff]  ;;  %v7050_v13 = vld [vmem:[%s9865_s28 + $0x1660] sm:$0xff] }
 0x1ce   : > { %9138 = vmatprep.mubr.msk.f32.mxu0 %vm353_vm1, %v7570_v15  ;;  %v7668_v15 = vld [vmem:[%s9865_s28 + $0xb61] sm:$0xff] }
 0x1d0   : > { %8699 = vmatmul.mubr.msk.f32.gmra.mrb[30].mxu1 %vm353_vm1, %v7019_v16  ;;  %v7051_v16 = vld [vmem:[%s9865_s28 + $0x1670] sm:$0xff] }
 0x1d1   : > { %9139 = vmatmul.mubr.msk.f32.gmra.mrb[62].mxu0 %vm353_vm1, %v7571_v18  ;;  %8701 = vmatprep.mubr.msk.f32.mxu1 %vm353_vm1, %v7020_v10  ;;  %v7669_v18 = vld [vmem:[%s9865_s28 + $0xb71] sm:$0xff]  ;;  %v7150_v10 = vld [vmem:[%s9865_s28 + $0xd80] sm:$0xff] }
 0x1d2   : > { %9143 = vmatprep.mubr.msk.f32.mxu0 %vm353_vm1, %v7638_v20  ;;  %v7670_v20 = vld [vmem:[%s9865_s28 + $0xe01] sm:$0xff] }
 0x1d4   : > { %8702 = vmatmul.mubr.msk.f32.gmra.mrb[32].mxu1 %vm353_vm1, %v7021_v11  ;;  %v7151_v11 = vld [vmem:[%s9865_s28 + $0xd90] sm:$0xff] }
 0x1d5   : > { %9144 = vmatmul.mubr.msk.f32.vlgmr.msra.gmra.mrb[0].mxu0 %vm353_vm1, %v7639_v21  ;;  %8704 = vmatprep.mubr.msk.f32.mxu1 %vm353_vm1, %v7022_v22  ;;  %v7671_v21 = vld [vmem:[%s9865_s28 + $0xe11] sm:$0xff]  ;;  %v7152_v22 = vld [vmem:[%s9865_s28 + $0xda0] sm:$0xff] }
 0x1d6   : > { %9146 = vmatprep.mubr.msk.f32.mxu0 %vm353_vm1, %v7640_v14  ;;  %v7672_v14 = vld [vmem:[%s9865_s28 + $0xe21] sm:$0xff] }
 0x1d8   : > { %8705 = vmatmul.mubr.msk.f32.gmra.mrb[34].mxu1 %vm353_vm1, %v7023_v23  ;;  %v7153_v23 = vld [vmem:[%s9865_s28 + $0xdb0] sm:$0xff] }
 0x1d9   : > { %9147 = vmatmul.mubr.msk.f32.gmra.mrb[2].mxu0 %vm353_vm1, %v7641_v17  ;;  %8707 = vmatprep.mubr.msk.f32.mxu1 %vm353_vm1, %v7024_v25  ;;  %v7673_v17 = vld [vmem:[%s9865_s28 + $0xe31] sm:$0xff]  ;;  %v7154_v25 = vld [vmem:[%s9865_s28 + $0xdc0] sm:$0xff] }
 0x1da   : > { %9149 = vmatprep.mubr.msk.f32.mxu0 %vm353_vm1, %v7642_v19  ;;  %v7674_v19 = vld [vmem:[%s9865_s28 + $0xe41] sm:$0xff] }
 0x1dc   : > { %8708 = vmatmul.mubr.msk.f32.gmra.mrb[36].mxu1 %vm353_vm1, %v7025_v24  ;;  %v7155_v24 = vld [vmem:[%s9865_s28 + $0xdd0] sm:$0xff] }
 0x1dd   : > { %9150 = vmatmul.mubr.msk.f32.gmra.mrb[4].mxu0 %vm353_vm1, %v7643_v26  ;;  %8710 = vmatprep.mubr.msk.f32.mxu1 %vm353_vm1, %v7026_v27  ;;  %v7675_v26 = vld [vmem:[%s9865_s28 + $0xe51] sm:$0xff]  ;;  %v7156_v27 = vld [vmem:[%s9865_s28 + $0xde0] sm:$0xff] }
 0x1de   : > { %9152 = vmatprep.mubr.msk.f32.mxu0 %vm353_vm1, %v7644_v28  ;;  %v7676_v28 = vld [vmem:[%s9865_s28 + $0xe61] sm:$0xff] }
 0x1e0   : > { %8711 = vmatmul.mubr.msk.f32.gmra.mrb[38].mxu1 %vm353_vm1, %v7027_v29  ;;  %v7157_v29 = vld [vmem:[%s9865_s28 + $0xdf0] sm:$0xff] }
 0x1e1   : > { %9153 = vmatmul.mubr.msk.f32.gmra.mrb[6].mxu0 %vm353_vm1, %v7645_v30  ;;  %8713 = vmatprep.mubr.msk.f32.mxu1 %vm353_vm1, %v7028_v31  ;;  %v7677_v30 = vld [vmem:[%s9865_s28 + $0xe71] sm:$0xff]  ;;  %v7158_v31 = vld [vmem:[%s9865_s28 + $0x1080] sm:$0xff] }
 0x1e2   : > { %9155 = vmatprep.mubr.msk.f32.mxu0 %vm353_vm1, %v7646_v32  ;;  %v7678_v32 = vld [vmem:[%s9865_s28 + $0x1101] sm:$0xff] }
 0x1e4   : > { %8714 = vmatmul.mubr.msk.f32.gmra.mrb[40].mxu1 %vm353_vm1, %v7029_v33  ;;  %v7159_v33 = vld [vmem:[%s9865_s28 + $0x1090] sm:$0xff] }
 0x1e5   : > { %9156 = vmatmul.mubr.msk.f32.gmra.mrb[8].mxu0 %vm353_vm1, %v7647_v34  ;;  %8716 = vmatprep.mubr.msk.f32.mxu1 %vm353_vm1, %v7030_v35  ;;  %v7679_v34 = vld [vmem:[%s9865_s28 + $0x1111] sm:$0xff]  ;;  %v7160_v35 = vld [vmem:[%s9865_s28 + $0x10a0] sm:$0xff] }
 0x1e6   : > { %9158 = vmatprep.mubr.msk.f32.mxu0 %vm353_vm1, %v7648_v36  ;;  %v7680_v36 = vld [vmem:[%s9865_s28 + $0x1121] sm:$0xff] }
 0x1e8   : > { %8717 = vmatmul.mubr.msk.f32.gmra.mrb[42].mxu1 %vm353_vm1, %v7031_v37  ;;  %v7161_v37 = vld [vmem:[%s9865_s28 + $0x10b0] sm:$0xff] }
 0x1e9   : > { %9159 = vmatmul.mubr.msk.f32.gmra.mrb[10].mxu0 %vm353_vm1, %v7649_v38  ;;  %8719 = vmatprep.mubr.msk.f32.mxu1 %vm353_vm1, %v7032_v39  ;;  %v7681_v38 = vld [vmem:[%s9865_s28 + $0x1131] sm:$0xff]  ;;  %v7162_v39 = vld [vmem:[%s9865_s28 + $0x10c0] sm:$0xff] }
 0x1ea   : > { %9161 = vmatprep.mubr.msk.f32.mxu0 %vm353_vm1, %v7650_v40  ;;  %v7682_v40 = vld [vmem:[%s9865_s28 + $0x1141] sm:$0xff] }
 0x1ec   : > { %8720 = vmatmul.mubr.msk.f32.gmra.mrb[44].mxu1 %vm353_vm1, %v7033_v41  ;;  %v7163_v41 = vld [vmem:[%s9865_s28 + $0x10d0] sm:$0xff] }
 0x1ed   : > { %9162 = vmatmul.mubr.msk.f32.gmra.mrb[12].mxu0 %vm353_vm1, %v7651_v42  ;;  %8722 = vmatprep.mubr.msk.f32.mxu1 %vm353_vm1, %v7034_v43  ;;  %v7683_v42 = vld [vmem:[%s9865_s28 + $0x1151] sm:$0xff]  ;;  %v7164_v43 = vld [vmem:[%s9865_s28 + $0x10e0] sm:$0xff] }
 0x1ee   : > { %9164 = vmatprep.mubr.msk.f32.mxu0 %vm353_vm1, %v7652_v44  ;;  %v7684_v44 = vld [vmem:[%s9865_s28 + $0x1161] sm:$0xff] }
 0x1f0   : > { %8723 = vmatmul.mubr.msk.f32.gmra.mrb[46].mxu1 %vm353_vm1, %v7035_v45  ;;  %v7165_v45 = vld [vmem:[%s9865_s28 + $0x10f0] sm:$0xff] }
 0x1f1   : > { %9165 = vmatmul.mubr.msk.f32.gmra.mrb[14].mxu0 %vm353_vm1, %v7653_v46  ;;  %8725 = vmatprep.mubr.msk.f32.mxu1 %vm353_vm1, %v7036_v47  ;;  %v7685_v46 = vld [vmem:[%s9865_s28 + $0x1171] sm:$0xff]  ;;  %v7166_v47 = vld [vmem:[%s9865_s28 + $0x1380] sm:$0xff] }
 0x1f2   : > { %9167 = vmatprep.mubr.msk.f32.mxu0 %vm353_vm1, %v7654_v48  ;;  %v7686_v48 = vld [vmem:[%s9865_s28 + $0x1401] sm:$0xff] }
 0x1f4   : > { %8726 = vmatmul.mubr.msk.f32.gmra.mrb[48].mxu1 %vm353_vm1, %v7037_v49  ;;  %v7167_v49 = vld [vmem:[%s9865_s28 + $0x1390] sm:$0xff] }
 0x1f5   : > { %9168 = vmatmul.mubr.msk.f32.gmra.mrb[16].mxu0 %vm353_vm1, %v7655_v50  ;;  %8728 = vmatprep.mubr.msk.f32.mxu1 %vm353_vm1, %v7038_v51  ;;  %v7687_v50 = vld [vmem:[%s9865_s28 + $0x1411] sm:$0xff]  ;;  %v7168_v51 = vld [vmem:[%s9865_s28 + $0x13a0] sm:$0xff] }
 0x1f6   : > { %9170 = vmatprep.mubr.msk.f32.mxu0 %vm353_vm1, %v7656_v52  ;;  %v7688_v52 = vld [vmem:[%s9865_s28 + $0x1421] sm:$0xff] }
 0x1f8   : > { %8729 = vmatmul.mubr.msk.f32.gmra.mrb[50].mxu1 %vm353_vm1, %v7039_v53  ;;  %v7169_v53 = vld [vmem:[%s9865_s28 + $0x13b0] sm:$0xff] }
 0x1f9   : > { %9171 = vmatmul.mubr.msk.f32.gmra.mrb[18].mxu0 %vm353_vm1, %v7657_v54  ;;  %8731 = vmatprep.mubr.msk.f32.mxu1 %vm353_vm1, %v7040_v55  ;;  %v7689_v54 = vld [vmem:[%s9865_s28 + $0x1431] sm:$0xff]  ;;  %v7170_v55 = vld [vmem:[%s9865_s28 + $0x13c0] sm:$0xff] }
 0x1fa   : > { %9173 = vmatprep.mubr.msk.f32.mxu0 %vm353_vm1, %v7658_v56  ;;  %v7690_v56 = vld [vmem:[%s9865_s28 + $0x1441] sm:$0xff] }
 0x1fc   : > { %8732 = vmatmul.mubr.msk.f32.gmra.mrb[52].mxu1 %vm353_vm1, %v7041_v57  ;;  %v7171_v57 = vld [vmem:[%s9865_s28 + $0x13d0] sm:$0xff] }
 0x1fd   : > { %9174 = vmatmul.mubr.msk.f32.gmra.mrb[20].mxu0 %vm353_vm1, %v7659_v58  ;;  %8734 = vmatprep.mubr.msk.f32.mxu1 %vm353_vm1, %v7042_v59  ;;  %v7691_v58 = vld [vmem:[%s9865_s28 + $0x1451] sm:$0xff]  ;;  %v7172_v59 = vld [vmem:[%s9865_s28 + $0x13e0] sm:$0xff] }
 0x1fe   : > { %9176 = vmatprep.mubr.msk.f32.mxu0 %vm353_vm1, %v7660_v60  ;;  %v7692_v60 = vld [vmem:[%s9865_s28 + $0x1461] sm:$0xff] }
 0x200   : > { %8735 = vmatmul.mubr.msk.f32.gmra.mrb[54].mxu1 %vm353_vm1, %v7043_v61  ;;  %v7173_v61 = vld [vmem:[%s9865_s28 + $0x13f0] sm:$0xff] }
 0x201   : > { %9177 = vmatmul.mubr.msk.f32.gmra.mrb[22].mxu0 %vm353_vm1, %v7661_v62  ;;  %8737 = vmatprep.mubr.msk.f32.mxu1 %vm353_vm1, %v7044_v63  ;;  %v7693_v62 = vld [vmem:[%s9865_s28 + $0x1471] sm:$0xff]  ;;  %v7174_v63 = vld [vmem:[%s9865_s28 + $0x1680] sm:$0xff] }
 0x202   : > { %9179 = vmatprep.mubr.msk.f32.mxu0 %vm353_vm1, %v7662_v0  ;;  %v7694_v0 = vld [vmem:[%s9865_s28 + $0x1701] sm:$0xff] }
 0x204   : > { %8738 = vmatmul.mubr.msk.f32.gmra.mrb[56].mxu1 %vm353_vm1, %v7045_v1  ;;  %v7175_v1 = vld [vmem:[%s9865_s28 + $0x1690] sm:$0xff] }
 0x205   : > { %9180 = vmatmul.mubr.msk.f32.gmra.mrb[24].mxu0 %vm353_vm1, %v7663_v2  ;;  %8740 = vmatprep.mubr.msk.f32.mxu1 %vm353_vm1, %v7046_v3  ;;  %v7695_v2 = vld [vmem:[%s9865_s28 + $0x1711] sm:$0xff]  ;;  %v7176_v3 = vld [vmem:[%s9865_s28 + $0x16a0] sm:$0xff] }
 0x206   : > { %9182 = vmatprep.mubr.msk.f32.mxu0 %vm353_vm1, %v7664_v4  ;;  %v7696_v4 = vld [vmem:[%s9865_s28 + $0x1721] sm:$0xff] }
 0x208   : > { %8741 = vmatmul.mubr.msk.f32.gmra.mrb[58].mxu1 %vm353_vm1, %v7047_v5  ;;  %v7177_v5 = vld [vmem:[%s9865_s28 + $0x16b0] sm:$0xff] }
 0x209   : > { %9183 = vmatmul.mubr.msk.f32.gmra.mrb[26].mxu0 %vm353_vm1, %v7665_v6  ;;  %8743 = vmatprep.mubr.msk.f32.mxu1 %vm353_vm1, %v7048_v7  ;;  %v7697_v6 = vld [vmem:[%s9865_s28 + $0x1731] sm:$0xff]  ;;  %v7178_v7 = vld [vmem:[%s9865_s28 + $0x16c0] sm:$0xff] }
 0x20a   : > { %9185 = vmatprep.mubr.msk.f32.mxu0 %vm353_vm1, %v7666_v8  ;;  %v7698_v8 = vld [vmem:[%s9865_s28 + $0x1741] sm:$0xff] }
 0x20c   : > { %8744 = vmatmul.mubr.msk.f32.gmra.mrb[60].mxu1 %vm353_vm1, %v7049_v9  ;;  %v7179_v9 = vld [vmem:[%s9865_s28 + $0x16d0] sm:$0xff] }
 0x20d   : > { %9186 = vmatmul.mubr.msk.f32.gmra.mrb[28].mxu0 %vm353_vm1, %v7667_v12  ;;  %8746 = vmatprep.mubr.msk.f32.mxu1 %vm353_vm1, %v7050_v13  ;;  %v7699_v12 = vld [vmem:[%s9865_s28 + $0x1751] sm:$0xff]  ;;  %v7180_v13 = vld [vmem:[%s9865_s28 + $0x16e0] sm:$0xff] }
 0x20e   : > { %9188 = vmatprep.mubr.msk.f32.mxu0 %vm353_vm1, %v7668_v15  ;;  %v7700_v15 = vld [vmem:[%s9865_s28 + $0x1761] sm:$0xff] }
 0x210   : > { %8747 = vmatmul.mubr.msk.f32.gmra.mrb[62].mxu1 %vm353_vm1, %v7051_v16  ;;  %v7181_v16 = vld [vmem:[%s9865_s28 + $0x16f0] sm:$0xff] }
 0x211   : > { %9189 = vmatmul.mubr.msk.f32.gmra.mrb[30].mxu0 %vm353_vm1, %v7669_v18  ;;  %8799 = vmatprep.mubr.msk.f32.mxu1 %vm353_vm1, %v7150_v10  ;;  %v7701_v18 = vld [vmem:[%s9865_s28 + $0x1771] sm:$0xff] }
 0x212   : > { %9191 = vmatprep.mubr.msk.f32.mxu0 %vm353_vm1, %v7670_v20 }
 0x214   : > { %8800 = vmatmul.mubr.msk.f32.vlgmr.msra.gmra.mrb[32].mxu1 %vm353_vm1, %v7151_v11 }
 0x215   : > { %9192 = vmatmul.mubr.msk.f32.gmra.mrb[32].mxu0 %vm353_vm1, %v7671_v21  ;;  %8802 = vmatprep.mubr.msk.f32.mxu1 %vm353_vm1, %v7152_v22 }
 0x216   : > { %9194 = vmatprep.mubr.msk.f32.mxu0 %vm353_vm1, %v7672_v14 }
 0x218   : > { %8803 = vmatmul.mubr.msk.f32.gmra.mrb[34].mxu1 %vm353_vm1, %v7153_v23 }
 0x219   : > { %9195 = vmatmul.mubr.msk.f32.gmra.mrb[34].mxu0 %vm353_vm1, %v7673_v17  ;;  %8805 = vmatprep.mubr.msk.f32.mxu1 %vm353_vm1, %v7154_v25 }
 0x21a   : > { %9197 = vmatprep.mubr.msk.f32.mxu0 %vm353_vm1, %v7674_v19 }
 0x21c   : > { %8806 = vmatmul.mubr.msk.f32.gmra.mrb[36].mxu1 %vm353_vm1, %v7155_v24 }
 0x21d   : > { %9198 = vmatmul.mubr.msk.f32.gmra.mrb[36].mxu0 %vm353_vm1, %v7675_v26  ;;  %8808 = vmatprep.mubr.msk.f32.mxu1 %vm353_vm1, %v7156_v27 }
 0x21e   : > { %9200 = vmatprep.mubr.msk.f32.mxu0 %vm353_vm1, %v7676_v28 }
 0x220   : > { %8809 = vmatmul.mubr.msk.f32.gmra.mrb[38].mxu1 %vm353_vm1, %v7157_v29 }
 0x221   : > { %9201 = vmatmul.mubr.msk.f32.gmra.mrb[38].mxu0 %vm353_vm1, %v7677_v30  ;;  %8811 = vmatprep.mubr.msk.f32.mxu1 %vm353_vm1, %v7158_v31 }
 0x222   : > { %9203 = vmatprep.mubr.msk.f32.mxu0 %vm353_vm1, %v7678_v32 }
 0x224   : > { %8812 = vmatmul.mubr.msk.f32.gmra.mrb[40].mxu1 %vm353_vm1, %v7159_v33 }
 0x225   : > { %9204 = vmatmul.mubr.msk.f32.gmra.mrb[40].mxu0 %vm353_vm1, %v7679_v34  ;;  %8814 = vmatprep.mubr.msk.f32.mxu1 %vm353_vm1, %v7160_v35 }
 0x226   : > { %9206 = vmatprep.mubr.msk.f32.mxu0 %vm353_vm1, %v7680_v36 }
 0x228   : > { %8815 = vmatmul.mubr.msk.f32.gmra.mrb[42].mxu1 %vm353_vm1, %v7161_v37 }
 0x229   : > { %9207 = vmatmul.mubr.msk.f32.gmra.mrb[42].mxu0 %vm353_vm1, %v7681_v38  ;;  %8817 = vmatprep.mubr.msk.f32.mxu1 %vm353_vm1, %v7162_v39 }
 0x22a   : > { %9209 = vmatprep.mubr.msk.f32.mxu0 %vm353_vm1, %v7682_v40 }
 0x22c   : > { %8818 = vmatmul.mubr.msk.f32.gmra.mrb[44].mxu1 %vm353_vm1, %v7163_v41 }
 0x22d   : > { %9210 = vmatmul.mubr.msk.f32.gmra.mrb[44].mxu0 %vm353_vm1, %v7683_v42  ;;  %8820 = vmatprep.mubr.msk.f32.mxu1 %vm353_vm1, %v7164_v43 }
 0x22e   : > { %9212 = vmatprep.mubr.msk.f32.mxu0 %vm353_vm1, %v7684_v44 }
 0x230   : > { %8821 = vmatmul.mubr.msk.f32.gmra.mrb[46].mxu1 %vm353_vm1, %v7165_v45 }
 0x231   : > { %9213 = vmatmul.mubr.msk.f32.gmra.mrb[46].mxu0 %vm353_vm1, %v7685_v46  ;;  %8823 = vmatprep.mubr.msk.f32.mxu1 %vm353_vm1, %v7166_v47 }
 0x232   : > { %9215 = vmatprep.mubr.msk.f32.mxu0 %vm353_vm1, %v7686_v48  ;;  %v11123_v48 = vld [vmem:[%s11355_s2] ss:$0 sm:$0xff] }
 0x234   : > { %8824 = vmatmul.mubr.msk.f32.gmra.mrb[48].mxu1 %vm353_vm1, %v7167_v49 }
 0x235   : > { %9216 = vmatmul.mubr.msk.f32.gmra.mrb[48].mxu0 %vm353_vm1, %v7687_v50  ;;  %8826 = vmatprep.mubr.msk.f32.mxu1 %vm353_vm1, %v7168_v51 }
 0x236   : > { %9218 = vmatprep.mubr.msk.f32.mxu0 %vm353_vm1, %v7688_v52 }
 0x238   : > { %8827 = vmatmul.mubr.msk.f32.gmra.mrb[50].mxu1 %vm353_vm1, %v7169_v53 }
 0x239   : > { %9219 = vmatmul.mubr.msk.f32.gmra.mrb[50].mxu0 %vm353_vm1, %v7689_v54  ;;  %8829 = vmatprep.mubr.msk.f32.mxu1 %vm353_vm1, %v7170_v55 }
 0x23a   : > { %9221 = vmatprep.mubr.msk.f32.mxu0 %vm353_vm1, %v7690_v56 }
 0x23c   : > { %8830 = vmatmul.mubr.msk.f32.gmra.mrb[52].mxu1 %vm353_vm1, %v7171_v57 }
 0x23d   : > { %9222 = vmatmul.mubr.msk.f32.gmra.mrb[52].mxu0 %vm353_vm1, %v7691_v58  ;;  %8832 = vmatprep.mubr.msk.f32.mxu1 %vm353_vm1, %v7172_v59 }
 0x23e   : > { %9224 = vmatprep.mubr.msk.f32.mxu0 %vm353_vm1, %v7692_v60 }
 0x240   : > { %8833 = vmatmul.mubr.msk.f32.gmra.mrb[54].mxu1 %vm353_vm1, %v7173_v61 }
 0x241   : > { %9225 = vmatmul.mubr.msk.f32.gmra.mrb[54].mxu0 %vm353_vm1, %v7693_v62  ;;  %8835 = vmatprep.mubr.msk.f32.mxu1 %vm353_vm1, %v7174_v63 }
 0x242   : > { %9227 = vmatprep.mubr.msk.f32.mxu0 %vm353_vm1, %v7694_v0 }
 0x244   : > { %8836 = vmatmul.mubr.msk.f32.gmra.mrb[56].mxu1 %vm353_vm1, %v7175_v1 }
 0x245   : > { %9228 = vmatmul.mubr.msk.f32.gmra.mrb[56].mxu0 %vm353_vm1, %v7695_v2  ;;  %8838 = vmatprep.mubr.msk.f32.mxu1 %vm353_vm1, %v7176_v3 }
 0x246   : > { %9230 = vmatprep.mubr.msk.f32.mxu0 %vm353_vm1, %v7696_v4 }
 0x248   : > { %8839 = vmatmul.mubr.msk.f32.gmra.mrb[58].mxu1 %vm353_vm1, %v7177_v5 }
 0x249   : > { %9231 = vmatmul.mubr.msk.f32.gmra.mrb[58].mxu0 %vm353_vm1, %v7697_v6  ;;  %8841 = vmatprep.mubr.msk.f32.mxu1 %vm353_vm1, %v7178_v7 }
 0x24a   : > { %9233 = vmatprep.mubr.msk.f32.mxu0 %vm353_vm1, %v7698_v8 }
 0x24c   : > { %8842 = vmatmul.mubr.msk.f32.gmra.mrb[60].mxu1 %vm353_vm1, %v7179_v9 }
 0x24d   : > { %9234 = vmatmul.mubr.msk.f32.gmra.mrb[60].mxu0 %vm353_vm1, %v7699_v12  ;;  %8844 = vmatprep.mubr.msk.f32.mxu1 %vm353_vm1, %v7180_v13 }
 0x24e   : > { %9236 = vmatprep.mubr.msk.f32.mxu0 %vm353_vm1, %v7700_v15 }
 0x250   : > { %8845 = vmatmul.mubr.msk.f32.gmra.mrb[62].mxu1 %vm353_vm1, %v7181_v16 }
 0x251   : > { %9237 = vmatmul.mubr.msk.f32.gmra.mrb[62].mxu0 %vm353_vm1, %v7701_v18 }
 0x267   : > { %v8655_v10 = vpop.f32.mrb[0].mxu1 }
 0x268   : > { %v2553_v20 = vpop.f32.mrb[1].mxu1 }
 0x26b   : > { %v8658_v11 = vpop.f32.mrb[2].mxu1 }
 0x26c   : > { %v2563_v21 = vpop.f32.mrb[3].mxu1 }
 0x26f   : > { %v8661_v22 = vpop.f32.mrb[4].mxu1 }
 0x270   : > { %v2573_v14 = vpop.f32.mrb[5].mxu1 }
 0x273   : > { %v8664_v23 = vpop.f32.mrb[6].mxu1 }
 0x274   : > { %v2583_v17 = vpop.f32.mrb[7].mxu1 }
 0x277   : > { %v8667_v25 = vpop.f32.mrb[8].mxu1 }
 0x278   : > { %v2593_v19 = vpop.f32.mrb[9].mxu1 }
 0x27b   : > { %v11075_v24 = vpop.f32.mrb[10].mxu1 }
 0x27c   : > { %v11077_v26 = vpop.f32.mrb[11].mxu1 }
 0x27f   : > { %v11079_v27 = vpop.f32.mrb[12].mxu1 }
 0x280   : > { %v11081_v28 = vpop.f32.mrb[13].mxu1 }
 0x283   : > { %v11083_v29 = vpop.f32.mrb[14].mxu1 }
 0x284   : > { %v11085_v30 = vpop.f32.mrb[15].mxu1 }
 0x287   : > { %v11087_v31 = vpop.f32.mrb[16].mxu1 }
 0x288   : > { %v11089_v32 = vpop.f32.mrb[17].mxu1 }
 0x28b   : > { %v11091_v33 = vpop.f32.mrb[18].mxu1 }
 0x28c   : > { %v11093_v34 = vpop.f32.mrb[19].mxu1 }
 0x28f   : > { %v11095_v35 = vpop.f32.mrb[20].mxu1 }
 0x290   : > { %v11097_v36 = vpop.f32.mrb[21].mxu1 }
 0x293   : > { %v11099_v37 = vpop.f32.mrb[22].mxu1 }
 0x294   : > { %v11101_v38 = vpop.f32.mrb[23].mxu1 }
 0x297   : > { %v11103_v39 = vpop.f32.mrb[24].mxu1 }
 0x298   : > { %v11105_v40 = vpop.f32.mrb[25].mxu1 }
 0x29b   : > { %v11107_v41 = vpop.f32.mrb[26].mxu1 }
 0x29c   : > { %v11109_v42 = vpop.f32.mrb[27].mxu1 }
 0x29f   : > { %v11111_v43 = vpop.f32.mrb[28].mxu1 }
 0x2a0   : > { %v11113_v44 = vpop.f32.mrb[29].mxu1 }
 0x2a3   : > { %v11115_v45 = vpop.f32.mrb[30].mxu1 }
 0x2a4   : > { %v11117_v46 = vpop.f32.mrb[31].mxu1 }
 0x2a8   : > { %v9145_v47 = vpop.f32.mrb[0].mxu0 }
 0x2a9   : > { %v9241_v49 = vadd.f32 %v9145_v47, %v8655_v10  ;;  %v6106_v50 = vpop.f32.mrb[1].mxu0 }
 0x2aa   : > { %v9242_v51 = vadd.f32 %v6106_v50, %v2553_v20 }
 0x2ab   : > { %v6497_v52 = vadd.f32 %v9241_v49, %v11123_v48 }
 0x2ac   : > { %v6496_v53 = vadd.f32 %v9242_v51, %v11123_v48  ;;  %v9148_v54 = vpop.f32.mrb[2].mxu0 }
 0x2ad   : > { %6561 = vst.msk [vmem:[%s11128_s23 + $0x8] sm:$0xff] %vm353_vm1, %v6497_v52  ;;  %v9243_v55 = vadd.f32 %v9148_v54, %v8658_v11  ;;  %v6116_v56 = vpop.f32.mrb[3].mxu0 }
 0x2ae   : > { %6560 = vst.msk [vmem:[%s11128_s23] sm:$0xff] %vm353_vm1, %v6496_v53  ;;  %v9244_v57 = vadd.f32 %v6116_v56, %v2563_v21 }
 0x2af   : > { %v6499_v58 = vadd.f32 %v9243_v55, %v11123_v48 }
 0x2b0   : > { %v6498_v59 = vadd.f32 %v9244_v57, %v11123_v48  ;;  %v9151_v60 = vpop.f32.mrb[4].mxu0 }
 0x2b1   : > { %6563 = vst.msk [vmem:[%s11128_s23 + $0x18] sm:$0xff] %vm353_vm1, %v6499_v58  ;;  %v9245_v61 = vadd.f32 %v9151_v60, %v8661_v22  ;;  %v6126_v62 = vpop.f32.mrb[5].mxu0 }
 0x2b2   : > { %6562 = vst.msk [vmem:[%s11128_s23 + $0x10] sm:$0xff] %vm353_vm1, %v6498_v59  ;;  %v9246_v63 = vadd.f32 %v6126_v62, %v2573_v14 }
 0x2b3   : > { %v6501_v0 = vadd.f32 %v9245_v61, %v11123_v48 }
 0x2b4   : > { %v6500_v1 = vadd.f32 %v9246_v63, %v11123_v48  ;;  %v9154_v2 = vpop.f32.mrb[6].mxu0 }
 0x2b5   : > { %6565 = vst.msk [vmem:[%s11128_s23 + $0x28] sm:$0xff] %vm353_vm1, %v6501_v0  ;;  %v9247_v3 = vadd.f32 %v9154_v2, %v8664_v23  ;;  %v6136_v4 = vpop.f32.mrb[7].mxu0 }
 0x2b6   : > { %6564 = vst.msk [vmem:[%s11128_s23 + $0x20] sm:$0xff] %vm353_vm1, %v6500_v1  ;;  %v9248_v5 = vadd.f32 %v6136_v4, %v2583_v17 }
 0x2b7   : > { %v6503_v6 = vadd.f32 %v9247_v3, %v11123_v48 }
 0x2b8   : > { %v6502_v7 = vadd.f32 %v9248_v5, %v11123_v48  ;;  %v9157_v8 = vpop.f32.mrb[8].mxu0 }
 0x2b9   : > { %6567 = vst.msk [vmem:[%s11128_s23 + $0x38] sm:$0xff] %vm353_vm1, %v6503_v6  ;;  %v9249_v9 = vadd.f32 %v9157_v8, %v8667_v25  ;;  %v6146_v12 = vpop.f32.mrb[9].mxu0 }
 0x2ba   : > { %6566 = vst.msk [vmem:[%s11128_s23 + $0x30] sm:$0xff] %vm353_vm1, %v6502_v7  ;;  %v9250_v13 = vadd.f32 %v6146_v12, %v2593_v19 }
 0x2bb   : > { %v6505_v15 = vadd.f32 %v9249_v9, %v11123_v48 }
 0x2bc   : > { %v6504_v16 = vadd.f32 %v9250_v13, %v11123_v48  ;;  %v9160_v18 = vpop.f32.mrb[10].mxu0 }
 0x2bd   : > { %6569 = vst.msk [vmem:[%s11128_s23 + $0x48] sm:$0xff] %vm353_vm1, %v6505_v15  ;;  %v9251_v10 = vadd.f32 %v9160_v18, %v11075_v24  ;;  %v6156_v20 = vpop.f32.mrb[11].mxu0 }
 0x2be   : > { %6568 = vst.msk [vmem:[%s11128_s23 + $0x40] sm:$0xff] %vm353_vm1, %v6504_v16  ;;  %v9252_v11 = vadd.f32 %v6156_v20, %v11077_v26 }
 0x2bf   : > { %v6507_v21 = vadd.f32 %v9251_v10, %v11123_v48 }
 0x2c0   : > { %v6506_v22 = vadd.f32 %v9252_v11, %v11123_v48  ;;  %v9163_v14 = vpop.f32.mrb[12].mxu0 }
 0x2c1   : > { %6571 = vst.msk [vmem:[%s11128_s23 + $0x58] sm:$0xff] %vm353_vm1, %v6507_v21  ;;  %v9253_v23 = vadd.f32 %v9163_v14, %v11079_v27  ;;  %v6166_v17 = vpop.f32.mrb[13].mxu0 }
 0x2c2   : > { %6570 = vst.msk [vmem:[%s11128_s23 + $0x50] sm:$0xff] %vm353_vm1, %v6506_v22  ;;  %v9254_v25 = vadd.f32 %v6166_v17, %v11081_v28 }
 0x2c3   : > { %v6509_v19 = vadd.f32 %v9253_v23, %v11123_v48 }
 0x2c4   : > { %v6508_v24 = vadd.f32 %v9254_v25, %v11123_v48  ;;  %v9166_v26 = vpop.f32.mrb[14].mxu0 }
 0x2c5   : > { %6573 = vst.msk [vmem:[%s11128_s23 + $0x68] sm:$0xff] %vm353_vm1, %v6509_v19  ;;  %v9255_v47 = vadd.f32 %v9166_v26, %v11083_v29  ;;  %v6176_v49 = vpop.f32.mrb[15].mxu0 }
 0x2c6   : > { %6572 = vst.msk [vmem:[%s11128_s23 + $0x60] sm:$0xff] %vm353_vm1, %v6508_v24  ;;  %v9256_v27 = vadd.f32 %v6176_v49, %v11085_v30 }
 0x2c7   : > { %v6511_v50 = vadd.f32 %v9255_v47, %v11123_v48 }
 0x2c8   : > { %v6510_v28 = vadd.f32 %v9256_v27, %v11123_v48  ;;  %v9169_v51 = vpop.f32.mrb[16].mxu0 }
 0x2c9   : > { %6575 = vst.msk [vmem:[%s11128_s23 + $0x78] sm:$0xff] %vm353_vm1, %v6511_v50  ;;  %v9257_v52 = vadd.f32 %v9169_v51, %v11087_v31  ;;  %v6186_v53 = vpop.f32.mrb[17].mxu0 }
 0x2ca   : > { %6574 = vst.msk [vmem:[%s11128_s23 + $0x70] sm:$0xff] %vm353_vm1, %v6510_v28  ;;  %v9258_v29 = vadd.f32 %v6186_v53, %v11089_v32 }
 0x2cb   : > { %v6513_v54 = vadd.f32 %v9257_v52, %v11123_v48 }
 0x2cc   : > { %v6512_v30 = vadd.f32 %v9258_v29, %v11123_v48  ;;  %v9172_v55 = vpop.f32.mrb[18].mxu0 }
 0x2cd   : > { %6577 = vst.msk [vmem:[%s11128_s23 + $0x88] sm:$0xff] %vm353_vm1, %v6513_v54  ;;  %v9259_v56 = vadd.f32 %v9172_v55, %v11091_v33  ;;  %v6196_v57 = vpop.f32.mrb[19].mxu0 }
 0x2ce   : > { %6576 = vst.msk [vmem:[%s11128_s23 + $0x80] sm:$0xff] %vm353_vm1, %v6512_v30  ;;  %v9260_v31 = vadd.f32 %v6196_v57, %v11093_v34 }
 0x2cf   : > { %v6515_v58 = vadd.f32 %v9259_v56, %v11123_v48 }
 0x2d0   : > { %v6514_v32 = vadd.f32 %v9260_v31, %v11123_v48  ;;  %v9175_v59 = vpop.f32.mrb[20].mxu0 }
 0x2d1   : > { %6579 = vst.msk [vmem:[%s11128_s23 + $0x98] sm:$0xff] %vm353_vm1, %v6515_v58  ;;  %v9261_v60 = vadd.f32 %v9175_v59, %v11095_v35  ;;  %v6206_v61 = vpop.f32.mrb[21].mxu0 }
 0x2d2   : > { %6578 = vst.msk [vmem:[%s11128_s23 + $0x90] sm:$0xff] %vm353_vm1, %v6514_v32  ;;  %v9262_v33 = vadd.f32 %v6206_v61, %v11097_v36 }
 0x2d3   : > { %v6517_v62 = vadd.f32 %v9261_v60, %v11123_v48 }
 0x2d4   : > { %v6516_v34 = vadd.f32 %v9262_v33, %v11123_v48  ;;  %v9178_v63 = vpop.f32.mrb[22].mxu0 }
 0x2d5   : > { %6581 = vst.msk [vmem:[%s11128_s23 + $0xa8] sm:$0xff] %vm353_vm1, %v6517_v62  ;;  %v9263_v0 = vadd.f32 %v9178_v63, %v11099_v37  ;;  %v6216_v1 = vpop.f32.mrb[23].mxu0 }
 0x2d6   : > { %6580 = vst.msk [vmem:[%s11128_s23 + $0xa0] sm:$0xff] %vm353_vm1, %v6516_v34  ;;  %v9264_v35 = vadd.f32 %v6216_v1, %v11101_v38 }
 0x2d7   : > { %v6519_v2 = vadd.f32 %v9263_v0, %v11123_v48 }
 0x2d8   : > { %v6518_v36 = vadd.f32 %v9264_v35, %v11123_v48  ;;  %v9181_v3 = vpop.f32.mrb[24].mxu0 }
 0x2d9   : > { %6583 = vst.msk [vmem:[%s11128_s23 + $0xb8] sm:$0xff] %vm353_vm1, %v6519_v2  ;;  %v9265_v4 = vadd.f32 %v9181_v3, %v11103_v39  ;;  %v6226_v5 = vpop.f32.mrb[25].mxu0 }
 0x2da   : > { %6582 = vst.msk [vmem:[%s11128_s23 + $0xb0] sm:$0xff] %vm353_vm1, %v6518_v36  ;;  %v9266_v37 = vadd.f32 %v6226_v5, %v11105_v40 }
 0x2db   : > { %v6521_v6 = vadd.f32 %v9265_v4, %v11123_v48 }
 0x2dc   : > { %v6520_v38 = vadd.f32 %v9266_v37, %v11123_v48  ;;  %v9184_v7 = vpop.f32.mrb[26].mxu0 }
 0x2dd   : > { %6585 = vst.msk [vmem:[%s11128_s23 + $0xc8] sm:$0xff] %vm353_vm1, %v6521_v6  ;;  %v9267_v8 = vadd.f32 %v9184_v7, %v11107_v41  ;;  %v6236_v9 = vpop.f32.mrb[27].mxu0 }
 0x2de   : > { %6584 = vst.msk [vmem:[%s11128_s23 + $0xc0] sm:$0xff] %vm353_vm1, %v6520_v38  ;;  %v9268_v39 = vadd.f32 %v6236_v9, %v11109_v42 }
 0x2df   : > { %v6523_v12 = vadd.f32 %v9267_v8, %v11123_v48 }
 0x2e0   : > { %v6522_v40 = vadd.f32 %v9268_v39, %v11123_v48  ;;  %v9187_v13 = vpop.f32.mrb[28].mxu0 }
 0x2e1   : > { %6587 = vst.msk [vmem:[%s11128_s23 + $0xd8] sm:$0xff] %vm353_vm1, %v6523_v12  ;;  %v9269_v15 = vadd.f32 %v9187_v13, %v11111_v43  ;;  %v6246_v16 = vpop.f32.mrb[29].mxu0 }
 0x2e2   : > { %6586 = vst.msk [vmem:[%s11128_s23 + $0xd0] sm:$0xff] %vm353_vm1, %v6522_v40  ;;  %v9270_v41 = vadd.f32 %v6246_v16, %v11113_v44 }
 0x2e3   : > { %v6525_v18 = vadd.f32 %v9269_v15, %v11123_v48 }
 0x2e4   : > { %v6524_v42 = vadd.f32 %v9270_v41, %v11123_v48  ;;  %v9190_v10 = vpop.f32.mrb[30].mxu0 }
 0x2e5   : > { %6589 = vst.msk [vmem:[%s11128_s23 + $0xe8] sm:$0xff] %vm353_vm1, %v6525_v18  ;;  %v9271_v20 = vadd.f32 %v9190_v10, %v11115_v45  ;;  %v6256_v11 = vpop.f32.mrb[31].mxu0 }
 0x2e6   : > { %6588 = vst.msk [vmem:[%s11128_s23 + $0xe0] sm:$0xff] %vm353_vm1, %v6524_v42  ;;  %v9272_v43 = vadd.f32 %v6256_v11, %v11117_v46 }
 0x2e7   : > { %v6527_v21 = vadd.f32 %v9271_v20, %v11123_v48  ;;  %v8801_v22 = vpop.f32.mrb[32].mxu1 }
 0x2e8   : > { %v6526_v44 = vadd.f32 %v9272_v43, %v11123_v48  ;;  %v9193_v14 = vpop.f32.mrb[32].mxu0  ;;  %v3424_v17 = vpop.f32.mrb[33].mxu1 }
 0x2e9   : > { %6591 = vst.msk [vmem:[%s11128_s23 + $0xf8] sm:$0xff] %vm353_vm1, %v6527_v21  ;;  %v9273_v23 = vadd.f32 %v9193_v14, %v8801_v22  ;;  %v6266_v25 = vpop.f32.mrb[33].mxu0 }
 0x2ea   : > { %6590 = vst.msk [vmem:[%s11128_s23 + $0xf0] sm:$0xff] %vm353_vm1, %v6526_v44  ;;  %v9274_v45 = vadd.f32 %v6266_v25, %v3424_v17 }
 0x2eb   : > { %v6529_v19 = vadd.f32 %v9273_v23, %v11123_v48  ;;  %v8804_v24 = vpop.f32.mrb[34].mxu1 }
 0x2ec   : > { %v6528_v46 = vadd.f32 %v9274_v45, %v11123_v48  ;;  %v9196_v26 = vpop.f32.mrb[34].mxu0  ;;  %v3434_v49 = vpop.f32.mrb[35].mxu1 }
 0x2ed   : > { %6593 = vst.msk [vmem:[%s11128_s23 + $0x108] sm:$0xff] %vm353_vm1, %v6529_v19  ;;  %v9275_v47 = vadd.f32 %v9196_v26, %v8804_v24  ;;  %v6276_v27 = vpop.f32.mrb[35].mxu0 }
 0x2ee   : > { %6592 = vst.msk [vmem:[%s11128_s23 + $0x100] sm:$0xff] %vm353_vm1, %v6528_v46  ;;  %v9276_v50 = vadd.f32 %v6276_v27, %v3434_v49 }
 0x2ef   : > { %v6531_v28 = vadd.f32 %v9275_v47, %v11123_v48  ;;  %v8807_v52 = vpop.f32.mrb[36].mxu1 }
 0x2f0   : > { %v6530_v51 = vadd.f32 %v9276_v50, %v11123_v48  ;;  %v9199_v53 = vpop.f32.mrb[36].mxu0  ;;  %v3444_v54 = vpop.f32.mrb[37].mxu1 }
 0x2f1   : > { %6595 = vst.msk [vmem:[%s11128_s23 + $0x118] sm:$0xff] %vm353_vm1, %v6531_v28  ;;  %v9277_v29 = vadd.f32 %v9199_v53, %v8807_v52  ;;  %v6286_v30 = vpop.f32.mrb[37].mxu0 }
 0x2f2   : > { %6594 = vst.msk [vmem:[%s11128_s23 + $0x110] sm:$0xff] %vm353_vm1, %v6530_v51  ;;  %v9278_v55 = vadd.f32 %v6286_v30, %v3444_v54 }
 0x2f3   : > { %v6533_v56 = vadd.f32 %v9277_v29, %v11123_v48  ;;  %v8810_v31 = vpop.f32.mrb[38].mxu1 }
 0x2f4   : > { %v6532_v57 = vadd.f32 %v9278_v55, %v11123_v48  ;;  %v9202_v58 = vpop.f32.mrb[38].mxu0  ;;  %v3454_v59 = vpop.f32.mrb[39].mxu1 }
 0x2f5   : > { %6597 = vst.msk [vmem:[%s11128_s23 + $0x128] sm:$0xff] %vm353_vm1, %v6533_v56  ;;  %v9279_v32 = vadd.f32 %v9202_v58, %v8810_v31  ;;  %v6296_v60 = vpop.f32.mrb[39].mxu0 }
 0x2f6   : > { %6596 = vst.msk [vmem:[%s11128_s23 + $0x120] sm:$0xff] %vm353_vm1, %v6532_v57  ;;  %v9280_v61 = vadd.f32 %v6296_v60, %v3454_v59 }
 0x2f7   : > { %v6535_v33 = vadd.f32 %v9279_v32, %v11123_v48  ;;  %v8813_v34 = vpop.f32.mrb[40].mxu1 }
 0x2f8   : > { %v6534_v62 = vadd.f32 %v9280_v61, %v11123_v48  ;;  %v9205_v63 = vpop.f32.mrb[40].mxu0  ;;  %v3464_v1 = vpop.f32.mrb[41].mxu1 }
 0x2f9   : > { %6599 = vst.msk [vmem:[%s11128_s23 + $0x138] sm:$0xff] %vm353_vm1, %v6535_v33  ;;  %v9281_v0 = vadd.f32 %v9205_v63, %v8813_v34  ;;  %v6306_v35 = vpop.f32.mrb[41].mxu0 }
 0x2fa   : > { %6598 = vst.msk [vmem:[%s11128_s23 + $0x130] sm:$0xff] %vm353_vm1, %v6534_v62  ;;  %v9282_v2 = vadd.f32 %v6306_v35, %v3464_v1 }
 0x2fb   : > { %v6537_v36 = vadd.f32 %v9281_v0, %v11123_v48  ;;  %v8816_v4 = vpop.f32.mrb[42].mxu1 }
 0x2fc   : > { %v6536_v3 = vadd.f32 %v9282_v2, %v11123_v48  ;;  %v9208_v5 = vpop.f32.mrb[42].mxu0  ;;  %v3474_v6 = vpop.f32.mrb[43].mxu1 }
 0x2fd   : > { %6601 = vst.msk [vmem:[%s11128_s23 + $0x148] sm:$0xff] %vm353_vm1, %v6537_v36  ;;  %v9283_v37 = vadd.f32 %v9208_v5, %v8816_v4  ;;  %v6316_v38 = vpop.f32.mrb[43].mxu0 }
 0x2fe   : > { %6600 = vst.msk [vmem:[%s11128_s23 + $0x140] sm:$0xff] %vm353_vm1, %v6536_v3  ;;  %v9284_v7 = vadd.f32 %v6316_v38, %v3474_v6 }
 0x2ff   : > { %v6539_v8 = vadd.f32 %v9283_v37, %v11123_v48  ;;  %v8819_v39 = vpop.f32.mrb[44].mxu1 }
 0x300   : > { %v6538_v9 = vadd.f32 %v9284_v7, %v11123_v48  ;;  %v9211_v12 = vpop.f32.mrb[44].mxu0  ;;  %v3484_v13 = vpop.f32.mrb[45].mxu1 }
 0x301   : > { %6603 = vst.msk [vmem:[%s11128_s23 + $0x158] sm:$0xff] %vm353_vm1, %v6539_v8  ;;  %v9285_v40 = vadd.f32 %v9211_v12, %v8819_v39  ;;  %v6326_v15 = vpop.f32.mrb[45].mxu0 }
 0x302   : > { %6602 = vst.msk [vmem:[%s11128_s23 + $0x150] sm:$0xff] %vm353_vm1, %v6538_v9  ;;  %v9286_v16 = vadd.f32 %v6326_v15, %v3484_v13 }
 0x303   : > { %v6541_v41 = vadd.f32 %v9285_v40, %v11123_v48  ;;  %v8822_v42 = vpop.f32.mrb[46].mxu1 }
 0x304   : > { %v6540_v18 = vadd.f32 %v9286_v16, %v11123_v48  ;;  %v9214_v10 = vpop.f32.mrb[46].mxu0  ;;  %v3494_v11 = vpop.f32.mrb[47].mxu1 }
 0x305   : > { %6605 = vst.msk [vmem:[%s11128_s23 + $0x168] sm:$0xff] %vm353_vm1, %v6541_v41  ;;  %v9287_v20 = vadd.f32 %v9214_v10, %v8822_v42  ;;  %v6336_v43 = vpop.f32.mrb[47].mxu0 }
 0x306   : > { %6604 = vst.msk [vmem:[%s11128_s23 + $0x160] sm:$0xff] %vm353_vm1, %v6540_v18  ;;  %v9288_v21 = vadd.f32 %v6336_v43, %v3494_v11 }
 0x307   : > { %v6543_v44 = vadd.f32 %v9287_v20, %v11123_v48  ;;  %v8825_v14 = vpop.f32.mrb[48].mxu1 }
 0x308   : > { %v6542_v22 = vadd.f32 %v9288_v21, %v11123_v48  ;;  %v9217_v23 = vpop.f32.mrb[48].mxu0  ;;  %v3504_v25 = vpop.f32.mrb[49].mxu1 }
 0x309   : > { %6607 = vst.msk [vmem:[%s11128_s23 + $0x178] sm:$0xff] %vm353_vm1, %v6543_v44  ;;  %v9289_v17 = vadd.f32 %v9217_v23, %v8825_v14  ;;  %v6346_v45 = vpop.f32.mrb[49].mxu0 }
 0x30a   : > { %6606 = vst.msk [vmem:[%s11128_s23 + $0x170] sm:$0xff] %vm353_vm1, %v6542_v22  ;;  %v9290_v19 = vadd.f32 %v6346_v45, %v3504_v25 }
 0x30b   : > { %v6545_v46 = vadd.f32 %v9289_v17, %v11123_v48  ;;  %v8828_v26 = vpop.f32.mrb[50].mxu1 }
 0x30c   : > { %v6544_v24 = vadd.f32 %v9290_v19, %v11123_v48  ;;  %v9220_v47 = vpop.f32.mrb[50].mxu0  ;;  %v3514_v27 = vpop.f32.mrb[51].mxu1 }
 0x30d   : > { %6609 = vst.msk [vmem:[%s11128_s23 + $0x188] sm:$0xff] %vm353_vm1, %v6545_v46  ;;  %v9291_v49 = vadd.f32 %v9220_v47, %v8828_v26  ;;  %v6356_v50 = vpop.f32.mrb[51].mxu0 }
 0x30e   : > { %6608 = vst.msk [vmem:[%s11128_s23 + $0x180] sm:$0xff] %vm353_vm1, %v6544_v24  ;;  %v9292_v28 = vadd.f32 %v6356_v50, %v3514_v27 }
 0x30f   : > { %v6547_v51 = vadd.f32 %v9291_v49, %v11123_v48  ;;  %v8831_v53 = vpop.f32.mrb[52].mxu1 }
 0x310   : > { %v6546_v52 = vadd.f32 %v9292_v28, %v11123_v48  ;;  %v9223_v29 = vpop.f32.mrb[52].mxu0  ;;  %v3524_v30 = vpop.f32.mrb[53].mxu1 }
 0x311   : > { %6611 = vst.msk [vmem:[%s11128_s23 + $0x198] sm:$0xff] %vm353_vm1, %v6547_v51  ;;  %v9293_v54 = vadd.f32 %v9223_v29, %v8831_v53  ;;  %v6366_v55 = vpop.f32.mrb[53].mxu0 }
 0x312   : > { %6610 = vst.msk [vmem:[%s11128_s23 + $0x190] sm:$0xff] %vm353_vm1, %v6546_v52  ;;  %v9294_v56 = vadd.f32 %v6366_v55, %v3524_v30 }
 0x313   : > { %v6549_v57 = vadd.f32 %v9293_v54, %v11123_v48  ;;  %v8834_v58 = vpop.f32.mrb[54].mxu1 }
 0x314   : > { %v6548_v31 = vadd.f32 %v9294_v56, %v11123_v48  ;;  %v9226_v32 = vpop.f32.mrb[54].mxu0  ;;  %v3534_v60 = vpop.f32.mrb[55].mxu1 }
 0x315   : > { %6613 = vst.msk [vmem:[%s11128_s23 + $0x1a8] sm:$0xff] %vm353_vm1, %v6549_v57  ;;  %v9295_v59 = vadd.f32 %v9226_v32, %v8834_v58  ;;  %v6376_v61 = vpop.f32.mrb[55].mxu0 }
 0x316   : > { %6612 = vst.msk [vmem:[%s11128_s23 + $0x1a0] sm:$0xff] %vm353_vm1, %v6548_v31  ;;  %v9296_v33 = vadd.f32 %v6376_v61, %v3534_v60 }
 0x317   : > { %v6551_v62 = vadd.f32 %v9295_v59, %v11123_v48  ;;  %v8837_v63 = vpop.f32.mrb[56].mxu1 }
 0x318   : > { %v6550_v34 = vadd.f32 %v9296_v33, %v11123_v48  ;;  %v9229_v0 = vpop.f32.mrb[56].mxu0  ;;  %v3544_v35 = vpop.f32.mrb[57].mxu1 }
 0x319   : > { %6615 = vst.msk [vmem:[%s11128_s23 + $0x1b8] sm:$0xff] %vm353_vm1, %v6551_v62  ;;  %v9297_v1 = vadd.f32 %v9229_v0, %v8837_v63  ;;  %v6386_v2 = vpop.f32.mrb[57].mxu0 }
 0x31a   : > { %6614 = vst.msk [vmem:[%s11128_s23 + $0x1b0] sm:$0xff] %vm353_vm1, %v6550_v34  ;;  %v9298_v36 = vadd.f32 %v6386_v2, %v3544_v35 }
 0x31b   : > { %v6553_v3 = vadd.f32 %v9297_v1, %v11123_v48  ;;  %v8840_v5 = vpop.f32.mrb[58].mxu1 }
 0x31c   : > { %v6552_v4 = vadd.f32 %v9298_v36, %v11123_v48  ;;  %v9232_v37 = vpop.f32.mrb[58].mxu0  ;;  %v3554_v38 = vpop.f32.mrb[59].mxu1 }
 0x31d   : > { %6617 = vst.msk [vmem:[%s11128_s23 + $0x1c8] sm:$0xff] %vm353_vm1, %v6553_v3  ;;  %v9299_v6 = vadd.f32 %v9232_v37, %v8840_v5  ;;  %v6396_v7 = vpop.f32.mrb[59].mxu0 }
 0x31e   : > { %6616 = vst.msk [vmem:[%s11128_s23 + $0x1c0] sm:$0xff] %vm353_vm1, %v6552_v4  ;;  %v9300_v8 = vadd.f32 %v6396_v7, %v3554_v38 }
 0x31f   : > { %v6555_v9 = vadd.f32 %v9299_v6, %v11123_v48  ;;  %v8843_v12 = vpop.f32.mrb[60].mxu1 }
 0x320   : > { %v6554_v39 = vadd.f32 %v9300_v8, %v11123_v48  ;;  %v9235_v40 = vpop.f32.mrb[60].mxu0  ;;  %v3564_v15 = vpop.f32.mrb[61].mxu1 }
 0x321   : > { %6619 = vst.msk [vmem:[%s11128_s23 + $0x1d8] sm:$0xff] %vm353_vm1, %v6555_v9  ;;  %v9301_v13 = vadd.f32 %v9235_v40, %v8843_v12  ;;  %v6406_v16 = vpop.f32.mrb[61].mxu0 }
 0x322   : > { %6618 = vst.msk [vmem:[%s11128_s23 + $0x1d0] sm:$0xff] %vm353_vm1, %v6554_v39  ;;  %v9302_v41 = vadd.f32 %v6406_v16, %v3564_v15 }
 0x323   : > { %v6557_v18 = vadd.f32 %v9301_v13, %v11123_v48  ;;  %v8846_v10 = vpop.f32.mrb[62].mxu1 }
 0x324   : > { %v6556_v42 = vadd.f32 %v9302_v41, %v11123_v48  ;;  %v9238_v20 = vpop.f32.mrb[62].mxu0  ;;  %v3574_v43 = vpop.f32.mrb[63].mxu1 }
 0x325   : > { %6621 = vst.msk [vmem:[%s11128_s23 + $0x1e8] sm:$0xff] %vm353_vm1, %v6557_v18  ;;  %v9303_v11 = vadd.f32 %v9238_v20, %v8846_v10  ;;  %v6416_v21 = vpop.f32.mrb[63].mxu0 }
 0x326   : > { %6620 = vst.msk [vmem:[%s11128_s23 + $0x1e0] sm:$0xff] %vm353_vm1, %v6556_v42  ;;  %v9304_v44 = vadd.f32 %v6416_v21, %v3574_v43 }
 0x327   : > { %v6559_v22 = vadd.f32 %v9303_v11, %v11123_v48 }
 0x328   : > { %v6558_v14 = vadd.f32 %v9304_v44, %v11123_v48 }
 0x329   : > { %6623 = vst.msk [vmem:[%s11128_s23 + $0x1f8] sm:$0xff] %vm353_vm1, %v6559_v22 }
 0x32a   : > { %6622 = vst.msk [vmem:[%s11128_s23 + $0x1f0] sm:$0xff] %vm353_vm1, %v6558_v14 }
 0x32b PF: > { %s13_s14 = sadd.s32 1, %s9801_s14   ;;  %s11357_s12 = smov %s9797_s13 }
 0x32c   : > { %p10_p5 = scmp.ge.s32.totalorder %s13_s14, 4   ;;  %s11358_s13 = smov %s11360_s15 }
 0x32e   :  { %12 = sbr.rel (!%p10_p5) target bundleno = 2 (0x2), region = 75 }

</bundles_post_ra>
